<compile_context>
chip_gen: v5e
topology: v5e:2x2
jax: 0.10.0
libtpu: 0.0.40
codegen_flags: <defaults>
</compile_context>

<pallas_src>
import jax
import jax.numpy as jnp
from jax.experimental import pallas as pl
from jax.experimental.pallas import tpu as pltpu


# ----------------------------------------------------------------------------
# Pallas kernels
# ----------------------------------------------------------------------------
def _conv_pool_kernel(p_ref, w_ref, shift_ref, o_ref):
    """Conv3x3 (BN scale folded into W) + MaxPool2x2 + BN shift + ReLU.

    p_ref:     (4, Mt, K)  im2col patches, one slab per 2x2 pool offset d;
                           rows = (image-in-tile, pooled pixel), K = 9*Cin.
    w_ref:     (K, Cout)   conv weights with BN scale folded in.
    shift_ref: (1, Cout)   folded BN shift (+ conv bias).
    o_ref:     (Mt, Cout)  pooled + ReLU output.
    """
    w = w_ref[...]
    y = jnp.dot(p_ref[0], w, preferred_element_type=jnp.float32)
    for d in range(1, 4):                      # max over the 4 pool offsets
        y = jnp.maximum(y, jnp.dot(p_ref[d], w, preferred_element_type=jnp.float32))
    o_ref[...] = jnp.maximum(y + shift_ref[...], 0.0)


def _conv_pool_fc_kernel(p_ref, w_ref, shift_ref, wfc_ref, bfc_ref, o_ref, y_scr):
    """Block 3 (conv+pool+BN+ReLU) fused with the classifier Linear(256, 62).

    p_ref:   (4, 4*Bt, K)  patches; rows ordered (pooled position p, image bb).
    w_ref:   (K, 64)       conv weights (BN scale folded).
    shift_ref: (1, 64)
    wfc_ref: (4, 64, 62)   FC weight regrouped per pooled position p so that
                           wfc_ref[p, c, :] == W_fc[c*4 + p, :] (NCHW flatten).
    bfc_ref: (1, 62)
    o_ref:   (Bt, 62)      logits.
    y_scr:   VMEM (4*Bt, 64) scratch for the pooled block-3 activation.
    """
    w = w_ref[...]
    y = jnp.dot(p_ref[0], w, preferred_element_type=jnp.float32)
    for d in range(1, 4):
        y = jnp.maximum(y, jnp.dot(p_ref[d], w, preferred_element_type=jnp.float32))
    y_scr[...] = jnp.maximum(y + shift_ref[...], 0.0)      # (4*Bt, 64)

    bt = o_ref.shape[0]
    logits = bfc_ref[...] + jnp.dot(y_scr[pl.ds(0, bt), :], wfc_ref[0],
                                    preferred_element_type=jnp.float32)
    for p in range(1, 4):
        logits = logits + jnp.dot(y_scr[pl.ds(p * bt, bt), :], wfc_ref[p],
                                  preferred_element_type=jnp.float32)
    o_ref[...] = logits


# ----------------------------------------------------------------------------
# Wrappers (layout glue: padding, im2col with taps folded into K)
# ----------------------------------------------------------------------------
def _im2col_pool(x_nhwc, padding):
    """Patches (4, B*Np, 9*Cin); slab d = 2x2 pool offset, rows (b, i, j)."""
    B, H, W, Cin = x_nhwc.shape
    xp = x_nhwc
    if padding:
        xp = jnp.pad(xp, ((0, 0), (padding, padding), (padding, padding), (0, 0)))
    Ho, Wo = xp.shape[1] - 2, xp.shape[2] - 2     # valid-conv output size
    Hp, Wp = Ho // 2, Wo // 2                     # MaxPool2d floor mode
    Hc, Wc = 2 * Hp, 2 * Wp
    Np = Hp * Wp
    slabs = []
    for ky in range(3):
        for kx in range(3):
            v = xp[:, ky:ky + Hc, kx:kx + Wc, :]            # (B, Hc, Wc, Cin)
            v = v.reshape(B, Hp, 2, Wp, 2, Cin)             # (b, i, dh, j, dw, c)
            v = v.transpose(2, 4, 0, 1, 3, 5)               # (dh, dw, b, i, j, c)
            slabs.append(v.reshape(4, B * Np, Cin))
    return jnp.concatenate(slabs, axis=-1), (Hp, Wp, Np)    # K = (ky*3+kx)*Cin + c


def conv_bn_pool_relu(x_nhwc, w_hwio, scale, shift, *, padding, btile):
    """One conv block as a single batch-tiled pallas_call."""
    B, _, _, Cin = x_nhwc.shape
    Cout = w_hwio.shape[-1]
    patches, (Hp, Wp, Np) = _im2col_pool(x_nhwc, padding)
    K = 9 * Cin
    wmat = (w_hwio * scale.reshape(1, 1, 1, Cout)).reshape(K, Cout)  # fold BN scale

    nt = B // btile
    mt = btile * Np
    out = pl.pallas_call(
        _conv_pool_kernel,
        out_shape=jax.ShapeDtypeStruct((B * Np, Cout), jnp.float32),
        grid=(nt,),
        in_specs=[
            pl.BlockSpec((4, mt, K), lambda t: (0, t, 0)),
            pl.BlockSpec((K, Cout), lambda t: (0, 0)),
            pl.BlockSpec((1, Cout), lambda t: (0, 0)),
        ],
        out_specs=pl.BlockSpec((mt, Cout), lambda t: (t, 0)),
        compiler_params=pltpu.CompilerParams(dimension_semantics=("parallel",)),
    )(patches, wmat, shift)
    return out.reshape(B, Hp, Wp, Cout)


def conv_block3_fc(x_nhwc, w_hwio, scale, shift, wfc, bfc, *, btile):
    """Block 3 (pad=0) + classifier, fused in one batch-tiled pallas_call."""
    B, _, _, Cin = x_nhwc.shape                   # (B, 7, 7, 32)
    Cout = w_hwio.shape[-1]                       # 64
    Nc = wfc.shape[1]                             # 62
    nt = B // btile
    K = 9 * Cin

    # Patches (4, B*4, K); within a batch tile rows are (pooled pos p, image bb)
    # so the kernel's per-p FC slices are contiguous.
    slabs = []
    for ky in range(3):
        for kx in range(3):
            v = x_nhwc[:, ky:ky + 4, kx:kx + 4, :]              # (B, 4, 4, Cin)
            v = v.reshape(nt, btile, 2, 2, 2, 2, Cin)           # (t, bb, i, dh, j, dw, c)
            v = v.transpose(3, 5, 0, 2, 4, 1, 6)                # (dh, dw, t, i, j, bb, c)
            slabs.append(v.reshape(4, B * 4, Cin))
    patches = jnp.concatenate(slabs, axis=-1)                   # (4, B*4, 9*Cin)

    wmat = (w_hwio * scale.reshape(1, 1, 1, Cout)).reshape(K, Cout)
    # PyTorch NCHW flatten: feature index = c*4 + p  ->  regroup FC weight per p.
    wfc_p = wfc.reshape(Cout, 4, Nc).transpose(1, 0, 2)         # (4, 64, 62)

    mt = 4 * btile
    out = pl.pallas_call(
        _conv_pool_fc_kernel,
        out_shape=jax.ShapeDtypeStruct((B, Nc), jnp.float32),
        grid=(nt,),
        in_specs=[
            pl.BlockSpec((4, mt, K), lambda t: (0, t, 0)),
            pl.BlockSpec((K, Cout), lambda t: (0, 0)),
            pl.BlockSpec((1, Cout), lambda t: (0, 0)),
            pl.BlockSpec((4, Cout, Nc), lambda t: (0, 0, 0)),
            pl.BlockSpec((1, Nc), lambda t: (0, 0)),
        ],
        out_specs=pl.BlockSpec((btile, Nc), lambda t: (t, 0)),
        scratch_shapes=[pltpu.VMEM((mt, Cout), jnp.float32)],
        compiler_params=pltpu.CompilerParams(dimension_semantics=("parallel",)),
    )(patches, wmat, shift, wfc_p, bfc)
    return out


def emnist_net_forward(x_nchw, params, *, btile=None):
    """EMNISTNet forward. x_nchw: (B, 1, 28, 28) -> logits (B, 62)."""
    B = x_nchw.shape[0]
    if btile is None:
        # btile must be a multiple of 8 when the grid has >1 step (keeps the
        # (8,128) block alignment); tiny batches run as a single grid step.
        btile = 8 if B > 8 else B
    nt = -(-B // btile)
    bpad = nt * btile

    x = jnp.transpose(x_nchw, (0, 2, 3, 1)).astype(jnp.float32)   # NCHW -> NHWC
    if bpad != B:
        x = jnp.pad(x, ((0, bpad - B), (0, 0), (0, 0), (0, 0)))

    x = conv_bn_pool_relu(x, params["w1"], params["scale1"], params["shift1"],
                          padding=1, btile=btile)                 # (Bp,14,14,16)
    x = conv_bn_pool_relu(x, params["w2"], params["scale2"], params["shift2"],
                          padding=1, btile=btile)                 # (Bp, 7, 7,32)
    out = conv_block3_fc(x, params["w3"], params["scale3"], params["shift3"],
                         params["wfc"], params["bfc"], btile=btile)  # (Bp, 62)
    return out[:B]


# ----------------------------------------------------------------------------
# Deterministic synthetic parameters
# ----------------------------------------------------------------------------
def init_params(key):
    keys = jax.random.split(key, 4)
    p = {}
    for idx, (cin, cout) in enumerate([(1, 16), (16, 32), (32, 64)], start=1):
        kw, kb, kg, kbe, km, kv = jax.random.split(keys[idx - 1], 6)
        w = jax.random.normal(kw, (3, 3, cin, cout), jnp.float32) / jnp.sqrt(9.0 * cin)
        bias = 0.05 * jax.random.normal(kb, (cout,), jnp.float32)
        gamma = 1.0 + 0.1 * jax.random.normal(kg, (cout,), jnp.float32)
        beta = 0.1 * jax.random.normal(kbe, (cout,), jnp.float32)
        mean = 0.1 * jax.random.normal(km, (cout,), jnp.float32)
        var = 0.5 + jnp.abs(jax.random.normal(kv, (cout,), jnp.float32))
        scale = gamma * jax.lax.rsqrt(var + 1e-5)
        shift = (bias - mean) * scale + beta        # conv bias folded into BN shift
        p[f"w{idx}"] = w
        p[f"scale{idx}"] = scale.reshape(1, cout)
        p[f"shift{idx}"] = shift.reshape(1, cout)
    kfw, kfb = jax.random.split(keys[3], 2)
    p["wfc"] = jax.random.normal(kfw, (256, 62), jnp.float32) / jnp.sqrt(256.0)
    p["bfc"] = 0.05 * jax.random.normal(kfb, (1, 62), jnp.float32)
    return p


# ----------------------------------------------------------------------------
# Pure-JAX reference (sanity check)
# ----------------------------------------------------------------------------
def _ref_block(x, w_hwio, scale, shift, padding):
    y = jax.lax.conv_general_dilated(
        x, w_hwio, window_strides=(1, 1),
        padding=[(padding, padding), (padding, padding)],
        dimension_numbers=("NHWC", "HWIO", "NHWC"),
        precision=jax.lax.Precision.HIGHEST)
    y = y * scale.reshape(1, 1, 1, -1) + shift.reshape(1, 1, 1, -1)
    y = jax.lax.reduce_window(y, -jnp.inf, jax.lax.max,
                              (1, 2, 2, 1), (1, 2, 2, 1), "VALID")
    return jnp.maximum(y, 0.0)


def emnist_ref(x_nchw, params):
    x = jnp.transpose(x_nchw, (0, 2, 3, 1)).astype(jnp.float32)
    x = _ref_block(x, params["w1"], params["scale1"], params["shift1"], 1)
    x = _ref_block(x, params["w2"], params["scale2"], params["shift2"], 1)
    x = _ref_block(x, params["w3"], params["scale3"], params["shift3"], 0)
    B = x.shape[0]
    xf = jnp.transpose(x, (0, 3, 1, 2)).reshape(B, -1)
    return xf @ params["wfc"] + params["bfc"]


# ----------------------------------------------------------------------------
if __name__ == "__main__":
    key = jax.random.PRNGKey(0)
    pkey, xkey = jax.random.split(key)
    params = init_params(pkey)

    fwd = jax.jit(emnist_net_forward)

    # EMNIST input: the Linear(256, 62) classifier forces 28x28 single-channel.
    x = jax.random.normal(xkey, (2, 1, 28, 28), jnp.float32)
    out = jax.block_until_ready(fwd(x, params))
    assert out.shape == (2, 62), out.shape
    ref = jax.block_until_ready(emnist_ref(x, params))
    if not jnp.allclose(out, ref, atol=1e-2, rtol=1e-2):
        raise AssertionError(
            f"mismatch vs reference (B=2): max abs err = {jnp.max(jnp.abs(out - ref))}")

    # Also exercise the batch-tiled multi-step grid path (btile=8, padded batch).
    xb = jax.random.normal(jax.random.PRNGKey(7), (12, 1, 28, 28), jnp.float32)
    outb = jax.block_until_ready(fwd(xb, params))
    refb = jax.block_until_ready(emnist_ref(xb, params))
    if not jnp.allclose(outb, refb, atol=1e-2, rtol=1e-2):
        raise AssertionError(
            f"mismatch vs reference (B=12): max abs err = {jnp.max(jnp.abs(outb - refb))}")

    print("KERNEL_OK")
</pallas_src>

<mosaic_0001>
module attributes {stable_mosaic.version = 11 : i64} {
  func.func @_conv_pool_kernel(%arg0: i32, %arg1: memref<4x392x9xf32, #tpu.memory_space<vmem>>, %arg2: memref<9x16xf32, #tpu.memory_space<vmem>>, %arg3: memref<1x16xf32, #tpu.memory_space<vmem>>, %arg4: memref<392x16xf32, #tpu.memory_space<vmem>>) attributes {dimension_semantics = [#tpu.dimension_semantics<parallel>], iteration_bounds = array<i64: 1>, scalar_prefetch = 0 : i64, scratch_operands = 0 : i64, tpu.core_type = #tpu.core_type<tc>, window_params = [{transform_indices = @transform_0, window_bounds = array<i64: 4, 392, 9>}, {pipeline_mode = #tpu.pipeline_mode<synchronous>, transform_indices = @transform_1, window_bounds = array<i64: 9, 16>}, {pipeline_mode = #tpu.pipeline_mode<synchronous>, transform_indices = @transform_2, window_bounds = array<i64: 1, 16>}, {transform_indices = @transform_3, window_bounds = array<i64: 392, 16>}]} {
    %c0 = arith.constant 0 : index
    %c0_0 = arith.constant 0 : index
    %0 = vector.load %arg2[%c0, %c0_0] : memref<9x16xf32, #tpu.memory_space<vmem>>, vector<9x16xf32>
    %c0_1 = arith.constant 0 : index
    %c0_2 = arith.constant 0 : index
    %c0_3 = arith.constant 0 : index
    %1 = vector.load %arg1[%c0_1, %c0_2, %c0_3] : memref<4x392x9xf32, #tpu.memory_space<vmem>>, vector<1x392x9xf32>
    %2 = vector.shape_cast %1 : vector<1x392x9xf32> to vector<392x9xf32>
    %cst = arith.constant dense<0.000000e+00> : vector<392x16xf32>
    %3 = tpu.matmul %2, %0, %cst {dimension_numbers = #tpu.dot_dimension_numbers<[1], [0], [0], [1], [0, 0, 1, 1], [], []>} : vector<392x9xf32>, vector<9x16xf32>, vector<392x16xf32> -> vector<392x16xf32>
    %c1 = arith.constant 1 : index
    %c0_4 = arith.constant 0 : index
    %c0_5 = arith.constant 0 : index
    %4 = vector.load %arg1[%c1, %c0_4, %c0_5] : memref<4x392x9xf32, #tpu.memory_space<vmem>>, vector<1x392x9xf32>
    %5 = vector.shape_cast %4 : vector<1x392x9xf32> to vector<392x9xf32>
    %cst_6 = arith.constant dense<0.000000e+00> : vector<392x16xf32>
    %6 = tpu.matmul %5, %0, %cst_6 {dimension_numbers = #tpu.dot_dimension_numbers<[1], [0], [0], [1], [0, 0, 1, 1], [], []>} : vector<392x9xf32>, vector<9x16xf32>, vector<392x16xf32> -> vector<392x16xf32>
    %7 = arith.maximumf %3, %6 : vector<392x16xf32>
    %c2 = arith.constant 2 : index
    %c0_7 = arith.constant 0 : index
    %c0_8 = arith.constant 0 : index
    %8 = vector.load %arg1[%c2, %c0_7, %c0_8] : memref<4x392x9xf32, #tpu.memory_space<vmem>>, vector<1x392x9xf32>
    %9 = vector.shape_cast %8 : vector<1x392x9xf32> to vector<392x9xf32>
    %cst_9 = arith.constant dense<0.000000e+00> : vector<392x16xf32>
    %10 = tpu.matmul %9, %0, %cst_9 {dimension_numbers = #tpu.dot_dimension_numbers<[1], [0], [0], [1], [0, 0, 1, 1], [], []>} : vector<392x9xf32>, vector<9x16xf32>, vector<392x16xf32> -> vector<392x16xf32>
    %11 = arith.maximumf %7, %10 : vector<392x16xf32>
    %c3 = arith.constant 3 : index
    %c0_10 = arith.constant 0 : index
    %c0_11 = arith.constant 0 : index
    %12 = vector.load %arg1[%c3, %c0_10, %c0_11] : memref<4x392x9xf32, #tpu.memory_space<vmem>>, vector<1x392x9xf32>
    %13 = vector.shape_cast %12 : vector<1x392x9xf32> to vector<392x9xf32>
    %cst_12 = arith.constant dense<0.000000e+00> : vector<392x16xf32>
    %14 = tpu.matmul %13, %0, %cst_12 {dimension_numbers = #tpu.dot_dimension_numbers<[1], [0], [0], [1], [0, 0, 1, 1], [], []>} : vector<392x9xf32>, vector<9x16xf32>, vector<392x16xf32> -> vector<392x16xf32>
    %15 = arith.maximumf %11, %14 : vector<392x16xf32>
    %c0_13 = arith.constant 0 : index
    %c0_14 = arith.constant 0 : index
    %16 = vector.load %arg3[%c0_13, %c0_14] : memref<1x16xf32, #tpu.memory_space<vmem>>, vector<1x16xf32>
    %17 = vector.broadcast %16 : vector<1x16xf32> to vector<392x16xf32>
    %18 = arith.addf %15, %17 : vector<392x16xf32>
    %cst_15 = arith.constant 0.000000e+00 : f32
    %19 = vector.broadcast %cst_15 : f32 to vector<392x16xf32>
    %20 = arith.maximumf %18, %19 : vector<392x16xf32>
    %c0_16 = arith.constant 0 : index
    %c0_17 = arith.constant 0 : index
    %21 = vector.load %arg4[%c0_16, %c0_17] : memref<392x16xf32, #tpu.memory_space<vmem>>, vector<392x16xf32>
    tpu.vector_store %arg4[%c0_16, %c0_17], %20 {strides = array<i32>} : memref<392x16xf32, #tpu.memory_space<vmem>>, vector<392x16xf32>,
    return
  }
  func.func @transform_0(%arg0: i32) -> (i32, i32, i32) {
    %c0_i32 = arith.constant 0 : i32
    %c0_i32_0 = arith.constant 0 : i32
    %c0_i32_1 = arith.constant 0 : i32
    return %c0_i32, %arg0, %c0_i32_0 : i32, i32, i32
  }
  func.func @transform_1(%arg0: i32) -> (i32, i32) {
    %c0_i32 = arith.constant 0 : i32
    %c0_i32_0 = arith.constant 0 : i32
    %c0_i32_1 = arith.constant 0 : i32
    return %c0_i32, %c0_i32_0 : i32, i32
  }
  func.func @transform_2(%arg0: i32) -> (i32, i32) {
    %c0_i32 = arith.constant 0 : i32
    %c0_i32_0 = arith.constant 0 : i32
    %c0_i32_1 = arith.constant 0 : i32
    return %c0_i32, %c0_i32_0 : i32, i32
  }
  func.func @transform_3(%arg0: i32) -> (i32, i32) {
    %c0_i32 = arith.constant 0 : i32
    %c0_i32_0 = arith.constant 0 : i32
    return %arg0, %c0_i32 : i32, i32
  }
}

module attributes {stable_mosaic.version = 11 : i64} {
  func.func @_conv_pool_kernel(%arg0: i32, %arg1: memref<4x98x144xf32, #tpu.memory_space<vmem>>, %arg2: memref<144x32xf32, #tpu.memory_space<vmem>>, %arg3: memref<1x32xf32, #tpu.memory_space<vmem>>, %arg4: memref<98x32xf32, #tpu.memory_space<vmem>>) attributes {dimension_semantics = [#tpu.dimension_semantics<parallel>], iteration_bounds = array<i64: 1>, scalar_prefetch = 0 : i64, scratch_operands = 0 : i64, tpu.core_type = #tpu.core_type<tc>, window_params = [{transform_indices = @transform_0, window_bounds = array<i64: 4, 98, 144>}, {pipeline_mode = #tpu.pipeline_mode<synchronous>, transform_indices = @transform_1, window_bounds = array<i64: 144, 32>}, {pipeline_mode = #tpu.pipeline_mode<synchronous>, transform_indices = @transform_2, window_bounds = array<i64: 1, 32>}, {transform_indices = @transform_3, window_bounds = array<i64: 98, 32>}]} {
    %c0 = arith.constant 0 : index
    %c0_0 = arith.constant 0 : index
    %0 = vector.load %arg2[%c0, %c0_0] : memref<144x32xf32, #tpu.memory_space<vmem>>, vector<144x32xf32>
    %c0_1 = arith.constant 0 : index
    %c0_2 = arith.constant 0 : index
    %c0_3 = arith.constant 0 : index
    %1 = vector.load %arg1[%c0_1, %c0_2, %c0_3] : memref<4x98x144xf32, #tpu.memory_space<vmem>>, vector<1x98x144xf32>
    %2 = vector.shape_cast %1 : vector<1x98x144xf32> to vector<98x144xf32>
    %cst = arith.constant dense<0.000000e+00> : vector<98x32xf32>
    %3 = tpu.matmul %2, %0, %cst {dimension_numbers = #tpu.dot_dimension_numbers<[1], [0], [0], [1], [0, 0, 1, 1], [], []>} : vector<98x144xf32>, vector<144x32xf32>, vector<98x32xf32> -> vector<98x32xf32>
    %c1 = arith.constant 1 : index
    %c0_4 = arith.constant 0 : index
    %c0_5 = arith.constant 0 : index
    %4 = vector.load %arg1[%c1, %c0_4, %c0_5] : memref<4x98x144xf32, #tpu.memory_space<vmem>>, vector<1x98x144xf32>
    %5 = vector.shape_cast %4 : vector<1x98x144xf32> to vector<98x144xf32>
    %cst_6 = arith.constant dense<0.000000e+00> : vector<98x32xf32>
    %6 = tpu.matmul %5, %0, %cst_6 {dimension_numbers = #tpu.dot_dimension_numbers<[1], [0], [0], [1], [0, 0, 1, 1], [], []>} : vector<98x144xf32>, vector<144x32xf32>, vector<98x32xf32> -> vector<98x32xf32>
    %7 = arith.maximumf %3, %6 : vector<98x32xf32>
    %c2 = arith.constant 2 : index
    %c0_7 = arith.constant 0 : index
    %c0_8 = arith.constant 0 : index
    %8 = vector.load %arg1[%c2, %c0_7, %c0_8] : memref<4x98x144xf32, #tpu.memory_space<vmem>>, vector<1x98x144xf32>
    %9 = vector.shape_cast %8 : vector<1x98x144xf32> to vector<98x144xf32>
    %cst_9 = arith.constant dense<0.000000e+00> : vector<98x32xf32>
    %10 = tpu.matmul %9, %0, %cst_9 {dimension_numbers = #tpu.dot_dimension_numbers<[1], [0], [0], [1], [0, 0, 1, 1], [], []>} : vector<98x144xf32>, vector<144x32xf32>, vector<98x32xf32> -> vector<98x32xf32>
    %11 = arith.maximumf %7, %10 : vector<98x32xf32>
    %c3 = arith.constant 3 : index
    %c0_10 = arith.constant 0 : index
    %c0_11 = arith.constant 0 : index
    %12 = vector.load %arg1[%c3, %c0_10, %c0_11] : memref<4x98x144xf32, #tpu.memory_space<vmem>>, vector<1x98x144xf32>
    %13 = vector.shape_cast %12 : vector<1x98x144xf32> to vector<98x144xf32>
    %cst_12 = arith.constant dense<0.000000e+00> : vector<98x32xf32>
    %14 = tpu.matmul %13, %0, %cst_12 {dimension_numbers = #tpu.dot_dimension_numbers<[1], [0], [0], [1], [0, 0, 1, 1], [], []>} : vector<98x144xf32>, vector<144x32xf32>, vector<98x32xf32> -> vector<98x32xf32>
    %15 = arith.maximumf %11, %14 : vector<98x32xf32>
    %c0_13 = arith.constant 0 : index
    %c0_14 = arith.constant 0 : index
    %16 = vector.load %arg3[%c0_13, %c0_14] : memref<1x32xf32, #tpu.memory_space<vmem>>, vector<1x32xf32>
    %17 = vector.broadcast %16 : vector<1x32xf32> to vector<98x32xf32>
    %18 = arith.addf %15, %17 : vector<98x32xf32>
    %cst_15 = arith.constant 0.000000e+00 : f32
    %19 = vector.broadcast %cst_15 : f32 to vector<98x32xf32>
    %20 = arith.maximumf %18, %19 : vector<98x32xf32>
    %c0_16 = arith.constant 0 : index
    %c0_17 = arith.constant 0 : index
    %21 = vector.load %arg4[%c0_16, %c0_17] : memref<98x32xf32, #tpu.memory_space<vmem>>, vector<98x32xf32>
    tpu.vector_store %arg4[%c0_16, %c0_17], %20 {strides = array<i32>} : memref<98x32xf32, #tpu.memory_space<vmem>>, vector<98x32xf32>,
    return
  }
  func.func @transform_0(%arg0: i32) -> (i32, i32, i32) {
    %c0_i32 = arith.constant 0 : i32
    %c0_i32_0 = arith.constant 0 : i32
    %c0_i32_1 = arith.constant 0 : i32
    return %c0_i32, %arg0, %c0_i32_0 : i32, i32, i32
  }
  func.func @transform_1(%arg0: i32) -> (i32, i32) {
    %c0_i32 = arith.constant 0 : i32
    %c0_i32_0 = arith.constant 0 : i32
    %c0_i32_1 = arith.constant 0 : i32
    return %c0_i32, %c0_i32_0 : i32, i32
  }
  func.func @transform_2(%arg0: i32) -> (i32, i32) {
    %c0_i32 = arith.constant 0 : i32
    %c0_i32_0 = arith.constant 0 : i32
    %c0_i32_1 = arith.constant 0 : i32
    return %c0_i32, %c0_i32_0 : i32, i32
  }
  func.func @transform_3(%arg0: i32) -> (i32, i32) {
    %c0_i32 = arith.constant 0 : i32
    %c0_i32_0 = arith.constant 0 : i32
    return %arg0, %c0_i32 : i32, i32
  }
}

module attributes {stable_mosaic.version = 11 : i64} {
  func.func @_conv_pool_fc_kernel(%arg0: i32, %arg1: memref<4x8x288xf32, #tpu.memory_space<vmem>>, %arg2: memref<288x64xf32, #tpu.memory_space<vmem>>, %arg3: memref<1x64xf32, #tpu.memory_space<vmem>>, %arg4: memref<4x64x62xf32, #tpu.memory_space<vmem>>, %arg5: memref<1x62xf32, #tpu.memory_space<vmem>>, %arg6: memref<2x62xf32, #tpu.memory_space<vmem>>, %arg7: memref<8x64xf32, #tpu.memory_space<vmem>>) attributes {dimension_semantics = [#tpu.dimension_semantics<parallel>], iteration_bounds = array<i64: 1>, scalar_prefetch = 0 : i64, scratch_operands = 1 : i64, tpu.core_type = #tpu.core_type<tc>, window_params = [{transform_indices = @transform_0, window_bounds = array<i64: 4, 8, 288>}, {pipeline_mode = #tpu.pipeline_mode<synchronous>, transform_indices = @transform_1, window_bounds = array<i64: 288, 64>}, {pipeline_mode = #tpu.pipeline_mode<synchronous>, transform_indices = @transform_2, window_bounds = array<i64: 1, 64>}, {pipeline_mode = #tpu.pipeline_mode<synchronous>, transform_indices = @transform_3, window_bounds = array<i64: 4, 64, 62>}, {pipeline_mode = #tpu.pipeline_mode<synchronous>, transform_indices = @transform_4, window_bounds = array<i64: 1, 62>}, {transform_indices = @transform_5, window_bounds = array<i64: 2, 62>}]} {
    %c0 = arith.constant 0 : index
    %c0_0 = arith.constant 0 : index
    %0 = vector.load %arg2[%c0, %c0_0] : memref<288x64xf32, #tpu.memory_space<vmem>>, vector<288x64xf32>
    %c0_1 = arith.constant 0 : index
    %c0_2 = arith.constant 0 : index
    %c0_3 = arith.constant 0 : index
    %1 = vector.load %arg1[%c0_1, %c0_2, %c0_3] : memref<4x8x288xf32, #tpu.memory_space<vmem>>, vector<1x8x288xf32>
    %2 = vector.shape_cast %1 : vector<1x8x288xf32> to vector<8x288xf32>
    %cst = arith.constant dense<0.000000e+00> : vector<8x64xf32>
    %3 = tpu.matmul %2, %0, %cst {dimension_numbers = #tpu.dot_dimension_numbers<[1], [0], [0], [1], [0, 0, 1, 1], [], []>} : vector<8x288xf32>, vector<288x64xf32>, vector<8x64xf32> -> vector<8x64xf32>
    %c1 = arith.constant 1 : index
    %c0_4 = arith.constant 0 : index
    %c0_5 = arith.constant 0 : index
    %4 = vector.load %arg1[%c1, %c0_4, %c0_5] : memref<4x8x288xf32, #tpu.memory_space<vmem>>, vector<1x8x288xf32>
    %5 = vector.shape_cast %4 : vector<1x8x288xf32> to vector<8x288xf32>
    %cst_6 = arith.constant dense<0.000000e+00> : vector<8x64xf32>
    %6 = tpu.matmul %5, %0, %cst_6 {dimension_numbers = #tpu.dot_dimension_numbers<[1], [0], [0], [1], [0, 0, 1, 1], [], []>} : vector<8x288xf32>, vector<288x64xf32>, vector<8x64xf32> -> vector<8x64xf32>
    %7 = arith.maximumf %3, %6 : vector<8x64xf32>
    %c2 = arith.constant 2 : index
    %c0_7 = arith.constant 0 : index
    %c0_8 = arith.constant 0 : index
    %8 = vector.load %arg1[%c2, %c0_7, %c0_8] : memref<4x8x288xf32, #tpu.memory_space<vmem>>, vector<1x8x288xf32>
    %9 = vector.shape_cast %8 : vector<1x8x288xf32> to vector<8x288xf32>
    %cst_9 = arith.constant dense<0.000000e+00> : vector<8x64xf32>
    %10 = tpu.matmul %9, %0, %cst_9 {dimension_numbers = #tpu.dot_dimension_numbers<[1], [0], [0], [1], [0, 0, 1, 1], [], []>} : vector<8x288xf32>, vector<288x64xf32>, vector<8x64xf32> -> vector<8x64xf32>
    %11 = arith.maximumf %7, %10 : vector<8x64xf32>
    %c3 = arith.constant 3 : index
    %c0_10 = arith.constant 0 : index
    %c0_11 = arith.constant 0 : index
    %12 = vector.load %arg1[%c3, %c0_10, %c0_11] : memref<4x8x288xf32, #tpu.memory_space<vmem>>, vector<1x8x288xf32>
    %13 = vector.shape_cast %12 : vector<1x8x288xf32> to vector<8x288xf32>
    %cst_12 = arith.constant dense<0.000000e+00> : vector<8x64xf32>
    %14 = tpu.matmul %13, %0, %cst_12 {dimension_numbers = #tpu.dot_dimension_numbers<[1], [0], [0], [1], [0, 0, 1, 1], [], []>} : vector<8x288xf32>, vector<288x64xf32>, vector<8x64xf32> -> vector<8x64xf32>
    %15 = arith.maximumf %11, %14 : vector<8x64xf32>
    %c0_13 = arith.constant 0 : index
    %c0_14 = arith.constant 0 : index
    %16 = vector.load %arg3[%c0_13, %c0_14] : memref<1x64xf32, #tpu.memory_space<vmem>>, vector<1x64xf32>
    %17 = vector.broadcast %16 : vector<1x64xf32> to vector<8x64xf32>
    %18 = arith.addf %15, %17 : vector<8x64xf32>
    %cst_15 = arith.constant 0.000000e+00 : f32
    %19 = vector.broadcast %cst_15 : f32 to vector<8x64xf32>
    %20 = arith.maximumf %18, %19 : vector<8x64xf32>
    %c0_16 = arith.constant 0 : index
    %c0_17 = arith.constant 0 : index
    %21 = vector.load %arg7[%c0_16, %c0_17] : memref<8x64xf32, #tpu.memory_space<vmem>>, vector<8x64xf32>
    tpu.vector_store %arg7[%c0_16, %c0_17], %20 {strides = array<i32>} : memref<8x64xf32, #tpu.memory_space<vmem>>, vector<8x64xf32>,
    %c0_18 = arith.constant 0 : index
    %c0_19 = arith.constant 0 : index
    %22 = vector.load %arg5[%c0_18, %c0_19] : memref<1x62xf32, #tpu.memory_space<vmem>>, vector<1x62xf32>
    %c0_20 = arith.constant 0 : index
    %c0_21 = arith.constant 0 : index
    %23 = vector.load %arg7[%c0_20, %c0_21] : memref<8x64xf32, #tpu.memory_space<vmem>>, vector<2x64xf32>
    %c0_22 = arith.constant 0 : index
    %c0_23 = arith.constant 0 : index
    %c0_24 = arith.constant 0 : index
    %24 = vector.load %arg4[%c0_22, %c0_23, %c0_24] : memref<4x64x62xf32, #tpu.memory_space<vmem>>, vector<1x64x62xf32>
    %25 = vector.shape_cast %24 : vector<1x64x62xf32> to vector<64x62xf32>
    %cst_25 = arith.constant dense<0.000000e+00> : vector<2x62xf32>
    %26 = tpu.matmul %23, %25, %cst_25 {dimension_numbers = #tpu.dot_dimension_numbers<[1], [0], [0], [1], [0, 0, 1, 1], [], []>} : vector<2x64xf32>, vector<64x62xf32>, vector<2x62xf32> -> vector<2x62xf32>
    %27 = vector.broadcast %22 : vector<1x62xf32> to vector<2x62xf32>
    %28 = arith.addf %27, %26 : vector<2x62xf32>
    %c2_26 = arith.constant 2 : index
    %c0_27 = arith.constant 0 : index
    %29 = vector.load %arg7[%c2_26, %c0_27] : memref<8x64xf32, #tpu.memory_space<vmem>>, vector<2x64xf32>
    %c1_28 = arith.constant 1 : index
    %c0_29 = arith.constant 0 : index
    %c0_30 = arith.constant 0 : index
    %30 = vector.load %arg4[%c1_28, %c0_29, %c0_30] : memref<4x64x62xf32, #tpu.memory_space<vmem>>, vector<1x64x62xf32>
    %31 = vector.shape_cast %30 : vector<1x64x62xf32> to vector<64x62xf32>
    %cst_31 = arith.constant dense<0.000000e+00> : vector<2x62xf32>
    %32 = tpu.matmul %29, %31, %cst_31 {dimension_numbers = #tpu.dot_dimension_numbers<[1], [0], [0], [1], [0, 0, 1, 1], [], []>} : vector<2x64xf32>, vector<64x62xf32>, vector<2x62xf32> -> vector<2x62xf32>
    %33 = arith.addf %28, %32 : vector<2x62xf32>
    %c4 = arith.constant 4 : index
    %c0_32 = arith.constant 0 : index
    %34 = vector.load %arg7[%c4, %c0_32] : memref<8x64xf32, #tpu.memory_space<vmem>>, vector<2x64xf32>
    %c2_33 = arith.constant 2 : index
    %c0_34 = arith.constant 0 : index
    %c0_35 = arith.constant 0 : index
    %35 = vector.load %arg4[%c2_33, %c0_34, %c0_35] : memref<4x64x62xf32, #tpu.memory_space<vmem>>, vector<1x64x62xf32>
    %36 = vector.shape_cast %35 : vector<1x64x62xf32> to vector<64x62xf32>
    %cst_36 = arith.constant dense<0.000000e+00> : vector<2x62xf32>
    %37 = tpu.matmul %34, %36, %cst_36 {dimension_numbers = #tpu.dot_dimension_numbers<[1], [0], [0], [1], [0, 0, 1, 1], [], []>} : vector<2x64xf32>, vector<64x62xf32>, vector<2x62xf32> -> vector<2x62xf32>
    %38 = arith.addf %33, %37 : vector<2x62xf32>
    %c6 = arith.constant 6 : index
    %c0_37 = arith.constant 0 : index
    %39 = vector.load %arg7[%c6, %c0_37] : memref<8x64xf32, #tpu.memory_space<vmem>>, vector<2x64xf32>
    %c3_38 = arith.constant 3 : index
    %c0_39 = arith.constant 0 : index
    %c0_40 = arith.constant 0 : index
    %40 = vector.load %arg4[%c3_38, %c0_39, %c0_40] : memref<4x64x62xf32, #tpu.memory_space<vmem>>, vector<1x64x62xf32>
    %41 = vector.shape_cast %40 : vector<1x64x62xf32> to vector<64x62xf32>
    %cst_41 = arith.constant dense<0.000000e+00> : vector<2x62xf32>
    %42 = tpu.matmul %39, %41, %cst_41 {dimension_numbers = #tpu.dot_dimension_numbers<[1], [0], [0], [1], [0, 0, 1, 1], [], []>} : vector<2x64xf32>, vector<64x62xf32>, vector<2x62xf32> -> vector<2x62xf32>
    %43 = arith.addf %38, %42 : vector<2x62xf32>
    %c0_42 = arith.constant 0 : index
    %c0_43 = arith.constant 0 : index
    %44 = vector.load %arg6[%c0_42, %c0_43] : memref<2x62xf32, #tpu.memory_space<vmem>>, vector<2x62xf32>
    tpu.vector_store %arg6[%c0_42, %c0_43], %43 {strides = array<i32>} : memref<2x62xf32, #tpu.memory_space<vmem>>, vector<2x62xf32>,
    return
  }
  func.func @transform_0(%arg0: i32) -> (i32, i32, i32) {
    %c0_i32 = arith.constant 0 : i32
    %c0_i32_0 = arith.constant 0 : i32
    %c0_i32_1 = arith.constant 0 : i32
    return %c0_i32, %arg0, %c0_i32_0 : i32, i32, i32
  }
  func.func @transform_1(%arg0: i32) -> (i32, i32) {
    %c0_i32 = arith.constant 0 : i32
    %c0_i32_0 = arith.constant 0 : i32
    %c0_i32_1 = arith.constant 0 : i32
    return %c0_i32, %c0_i32_0 : i32, i32
  }
  func.func @transform_2(%arg0: i32) -> (i32, i32) {
    %c0_i32 = arith.constant 0 : i32
    %c0_i32_0 = arith.constant 0 : i32
    %c0_i32_1 = arith.constant 0 : i32
    return %c0_i32, %c0_i32_0 : i32, i32
  }
  func.func @transform_3(%arg0: i32) -> (i32, i32, i32) {
    %c0_i32 = arith.constant 0 : i32
    %c0_i32_0 = arith.constant 0 : i32
    %c0_i32_1 = arith.constant 0 : i32
    %c0_i32_2 = arith.constant 0 : i32
    return %c0_i32, %c0_i32_0, %c0_i32_1 : i32, i32, i32
  }
  func.func @transform_4(%arg0: i32) -> (i32, i32) {
    %c0_i32 = arith.constant 0 : i32
    %c0_i32_0 = arith.constant 0 : i32
    %c0_i32_1 = arith.constant 0 : i32
    return %c0_i32, %c0_i32_0 : i32, i32
  }
  func.func @transform_5(%arg0: i32) -> (i32, i32) {
    %c0_i32 = arith.constant 0 : i32
    %c0_i32_0 = arith.constant 0 : i32
    return %arg0, %c0_i32 : i32, i32
  }
}

</mosaic_0001>

<bundles_post_ra>
// kernel: emnist_net_forward.3
= control target key start
LH: loop header
LB: loop body
LE: loop exit
PB: predicated region body
PF: predicated region fallthrough
CT: control target
= control target key end

     0   :  { %vm213_vm0 = vcmask 1040384   ;;  %vm65_vm1 = vcmask 72704   ;;  %vm1713_vm2 = vcmask 130048   ;;  %s3181_s1 = inlined_call_operand.vmem [shape: f32[9,16], index: 1, kind: input, shape index: {}]   ;;  %s3182_s0 = inlined_call_operand.vmem [shape: f32[4,392,9], index: 0, kind: input, shape index: {}]   ;;  %s3183_s2 = inlined_call_operand.vmem [shape: f32[1,16], index: 2, kind: input, shape index: {}]   ;;  %s3184_s3 = inlined_call_operand.vmem [shape: f32[392,16], index: 3, kind: output, shape index: {}]  }
   0x1   :  { %v15_v0 = vld [vmem:[%s3181_s1 + $0x8] sm:$0x1]  ;;  %v14_v1 = vld [vmem:[%s3181_s1] sm:$0xff]  ;;  %v1916_v2 = vld [vmem:[%s3182_s0 + $0x310] sm:$0xff] }
   0x2   :  { %1965 = vmatpush.msk.msra.mxu2 %vm213_vm0, %v15_v0  ;;  %2064 = vmatpush.msk.msra.mxu3 %vm213_vm0, %v15_v0  ;;  %v2015_v3 = vld [vmem:[%s3182_s0 + $0x498] sm:$0xff]  ;;  %v16_v4 = vld [vmem:[%s3182_s0] sm:$0xff]  ;;  %v1817_v5 = vld [vmem:[%s3182_s0 + $0x188] sm:$0xff] }
   0x3   :  { %1767 = vmatpush.msk.msra.mxu0 %vm213_vm0, %v15_v0  ;;  %1866 = vmatpush.msk.msra.mxu1 %vm213_vm0, %v15_v0  ;;  %v1917_v6 = vld [vmem:[%s3182_s0 + $0x318] sm:$0xff]  ;;  %v2016_v7 = vld [vmem:[%s3182_s0 + $0x4a0] sm:$0xff]  ;;  %v17_v8 = vld [vmem:[%s3182_s0 + $0x8] sm:$0xff] }
   0x4   :  { %1003 = vmatpush.msra.mxu2 %v14_v1  ;;  %1413 = vmatpush.msra.mxu3 %v14_v1  ;;  %v1818_v9 = vld [vmem:[%s3182_s0 + $0x190] sm:$0xff]  ;;  %v1918_v10 = vld [vmem:[%s3182_s0 + $0x320] sm:$0xff]  ;;  %v2017_v11 = vld [vmem:[%s3182_s0 + $0x4a8] sm:$0xff] }
   0x5   :  { %1966 = vmatmul.msk.f32.vlgmr.msra.gmra.mxu2 %vm65_vm1, %v1916_v2  ;;  %2065 = vmatmul.msk.f32.vlgmr.msra.gmra.mxu3 %vm65_vm1, %v2015_v3  ;;  %v18_v12 = vld [vmem:[%s3182_s0 + $0x10] sm:$0xff]  ;;  %v1819_v13 = vld [vmem:[%s3182_s0 + $0x198] sm:$0xff]  ;;  %v1919_v14 = vld [vmem:[%s3182_s0 + $0x328] sm:$0xff] }
   0x6   :  { %232 = vmatpush.msra.mxu0 %v14_v1  ;;  %593 = vmatpush.msra.mxu1 %v14_v1  ;;  %v2018_v15 = vld [vmem:[%s3182_s0 + $0x4b0] sm:$0xff]  ;;  %v19_v16 = vld [vmem:[%s3182_s0 + $0x18] sm:$0xff]  ;;  %v1820_v17 = vld [vmem:[%s3182_s0 + $0x1a0] sm:$0xff] }
   0x7   :  { %1768 = vmatmul.msk.f32.vlgmr.msra.gmra.mxu0 %vm65_vm1, %v16_v4  ;;  %1867 = vmatmul.msk.f32.vlgmr.msra.gmra.mxu1 %vm65_vm1, %v1817_v5  ;;  %v1920_v18 = vld [vmem:[%s3182_s0 + $0x330] sm:$0xff]  ;;  %v2019_v19 = vld [vmem:[%s3182_s0 + $0x4b8] sm:$0xff]  ;;  %v20_v20 = vld [vmem:[%s3182_s0 + $0x20] sm:$0xff] }
   0x8   :  { %v1821_v21 = vld [vmem:[%s3182_s0 + $0x1a8] sm:$0xff]  ;;  %v1921_v22 = vld [vmem:[%s3182_s0 + $0x338] sm:$0xff]  ;;  %v2020_v23 = vld [vmem:[%s3182_s0 + $0x4c0] sm:$0xff] }
   0x9   :  { %v21_v24 = vld [vmem:[%s3182_s0 + $0x28] sm:$0xff]  ;;  %v1822_v25 = vld [vmem:[%s3182_s0 + $0x1b0] sm:$0xff]  ;;  %v1922_v26 = vld [vmem:[%s3182_s0 + $0x340] sm:$0xff] }
   0xa   :  { %v2021_v27 = vld [vmem:[%s3182_s0 + $0x4c8] sm:$0xff]  ;;  %v22_v28 = vld [vmem:[%s3182_s0 + $0x30] sm:$0xff]  ;;  %v1823_v29 = vld [vmem:[%s3182_s0 + $0x1b8] sm:$0xff] }
   0xb   :  { %v1923_v30 = vld [vmem:[%s3182_s0 + $0x348] sm:$0xff]  ;;  %v2022_v31 = vld [vmem:[%s3182_s0 + $0x4d0] sm:$0xff]  ;;  %v23_v32 = vld [vmem:[%s3182_s0 + $0x38] sm:$0xff] }
   0xc   :  { %v1824_v33 = vld [vmem:[%s3182_s0 + $0x1c0] sm:$0xff]  ;;  %v1924_v34 = vld [vmem:[%s3182_s0 + $0x350] sm:$0xff]  ;;  %v2023_v35 = vld [vmem:[%s3182_s0 + $0x4d8] sm:$0xff] }
   0xd   :  { %1967 = vmatmul.msk.f32.gmra.mxu2 %vm65_vm1, %v1917_v6  ;;  %2066 = vmatmul.msk.f32.gmra.mxu3 %vm65_vm1, %v2016_v7  ;;  %v24_v36 = vld [vmem:[%s3182_s0 + $0x40] sm:$0xff]  ;;  %v1825_v37 = vld [vmem:[%s3182_s0 + $0x1c8] sm:$0xff]  ;;  %v1925_v38 = vld [vmem:[%s3182_s0 + $0x358] sm:$0xff] }
   0xe   :  { %v2024_v39 = vld [vmem:[%s3182_s0 + $0x4e0] sm:$0xff]  ;;  %v25_v40 = vld [vmem:[%s3182_s0 + $0x48] sm:$0xff]  ;;  %v1826_v41 = vld [vmem:[%s3182_s0 + $0x1d0] sm:$0xff] }
   0xf   :  { %1769 = vmatmul.msk.f32.gmra.mxu0 %vm65_vm1, %v17_v8  ;;  %1868 = vmatmul.msk.f32.gmra.mxu1 %vm65_vm1, %v1818_v9  ;;  %v1926_v42 = vld [vmem:[%s3182_s0 + $0x360] sm:$0xff]  ;;  %v2025_v43 = vld [vmem:[%s3182_s0 + $0x4e8] sm:$0xff]  ;;  %v26_v44 = vld [vmem:[%s3182_s0 + $0x50] sm:$0xff] }
  0x10   :  { %v1827_v45 = vld [vmem:[%s3182_s0 + $0x1d8] sm:$0xff]  ;;  %v1927_v46 = vld [vmem:[%s3182_s0 + $0x368] sm:$0xff]  ;;  %v2026_v47 = vld [vmem:[%s3182_s0 + $0x4f0] sm:$0xff] }
  0x11   :  { %v27_v48 = vld [vmem:[%s3182_s0 + $0x58] sm:$0xff]  ;;  %v1828_v49 = vld [vmem:[%s3182_s0 + $0x1e0] sm:$0xff]  ;;  %v1928_v50 = vld [vmem:[%s3182_s0 + $0x370] sm:$0xff] }
  0x12   :  { %v2027_v51 = vld [vmem:[%s3182_s0 + $0x4f8] sm:$0xff]  ;;  %v28_v52 = vld [vmem:[%s3182_s0 + $0x60] sm:$0xff]  ;;  %v1829_v53 = vld [vmem:[%s3182_s0 + $0x1e8] sm:$0xff] }
  0x13   :  { %v1929_v54 = vld [vmem:[%s3182_s0 + $0x378] sm:$0xff]  ;;  %v2028_v55 = vld [vmem:[%s3182_s0 + $0x500] sm:$0xff]  ;;  %v29_v56 = vld [vmem:[%s3182_s0 + $0x68] sm:$0xff] }
  0x14   :  { %v1830_v57 = vld [vmem:[%s3182_s0 + $0x1f0] sm:$0xff]  ;;  %v1930_v58 = vld [vmem:[%s3182_s0 + $0x380] sm:$0xff]  ;;  %v2029_v59 = vld [vmem:[%s3182_s0 + $0x508] sm:$0xff] }
  0x15   :  { %1968 = vmatmul.msk.f32.gmra.mxu2 %vm65_vm1, %v1918_v10  ;;  %2067 = vmatmul.msk.f32.gmra.mxu3 %vm65_vm1, %v2017_v11  ;;  %v30_v60 = vld [vmem:[%s3182_s0 + $0x70] sm:$0xff]  ;;  %v1831_v61 = vld [vmem:[%s3182_s0 + $0x1f8] sm:$0xff]  ;;  %v1931_v62 = vld [vmem:[%s3182_s0 + $0x388] sm:$0xff] }
  0x16   :  { %v2030_v63 = vld [vmem:[%s3182_s0 + $0x510] sm:$0xff]  ;;  %v31_v0 = vld [vmem:[%s3182_s0 + $0x78] sm:$0xff]  ;;  %v1832_v1 = vld [vmem:[%s3182_s0 + $0x200] sm:$0xff] }
  0x17   :  { %1770 = vmatmul.msk.f32.gmra.mxu0 %vm65_vm1, %v18_v12  ;;  %1869 = vmatmul.msk.f32.gmra.mxu1 %vm65_vm1, %v1819_v13  ;;  %v1932_v2 = vld [vmem:[%s3182_s0 + $0x390] sm:$0xff]  ;;  %v2031_v3 = vld [vmem:[%s3182_s0 + $0x518] sm:$0xff]  ;;  %v32_v6 = vld [vmem:[%s3182_s0 + $0x80] sm:$0xff] }
  0x18   :  { %v1833_v7 = vld [vmem:[%s3182_s0 + $0x208] sm:$0xff]  ;;  %v2417_v12 = vld [vmem:[%s3183_s2] ss:$0 sm:$0xff]  ;;  %v1933_v13 = vld [vmem:[%s3182_s0 + $0x398] sm:$0xff] }
  0x1d   :  { %1969 = vmatmul.msk.f32.gmra.mxu2 %vm65_vm1, %v1919_v14  ;;  %2068 = vmatmul.msk.f32.gmra.mxu3 %vm65_vm1, %v2018_v15  ;;  %v2032_v14 = vld [vmem:[%s3182_s0 + $0x520] sm:$0xff] }
  0x1f   :  { %1771 = vmatmul.msk.f32.gmra.mxu0 %vm65_vm1, %v19_v16  ;;  %1870 = vmatmul.msk.f32.gmra.mxu1 %vm65_vm1, %v1820_v17 }
  0x25   :  { %1970 = vmatmul.msk.f32.gmra.mxu2 %vm65_vm1, %v1920_v18  ;;  %2069 = vmatmul.msk.f32.gmra.mxu3 %vm65_vm1, %v2019_v19  ;;  %v33_v18 = vld [vmem:[%s3182_s0 + $0x88] sm:$0xff]  ;;  %v1834_v19 = vld [vmem:[%s3182_s0 + $0x210] sm:$0xff] }
  0x27   :  { %1772 = vmatmul.msk.f32.gmra.mxu0 %vm65_vm1, %v20_v20  ;;  %1871 = vmatmul.msk.f32.gmra.mxu1 %vm65_vm1, %v1821_v21 }
  0x2d   :  { %1971 = vmatmul.msk.f32.gmra.mxu2 %vm65_vm1, %v1921_v22  ;;  %2070 = vmatmul.msk.f32.gmra.mxu3 %vm65_vm1, %v2020_v23 }
  0x2f   :  { %1773 = vmatmul.msk.f32.gmra.mxu0 %vm65_vm1, %v21_v24  ;;  %1872 = vmatmul.msk.f32.gmra.mxu1 %vm65_vm1, %v1822_v25 }
  0x35   :  { %1972 = vmatmul.msk.f32.gmra.mxu2 %vm65_vm1, %v1922_v26  ;;  %2071 = vmatmul.msk.f32.gmra.mxu3 %vm65_vm1, %v2021_v27  ;;  %v1934_v26 = vld [vmem:[%s3182_s0 + $0x3a0] sm:$0xff]  ;;  %v2033_v27 = vld [vmem:[%s3182_s0 + $0x528] sm:$0xff] }
  0x37   :  { %1774 = vmatmul.msk.f32.gmra.mxu0 %vm65_vm1, %v22_v28  ;;  %1873 = vmatmul.msk.f32.gmra.mxu1 %vm65_vm1, %v1823_v29 }
  0x3d   :  { %1973 = vmatmul.msk.f32.gmra.mxu2 %vm65_vm1, %v1923_v30  ;;  %2072 = vmatmul.msk.f32.gmra.mxu3 %vm65_vm1, %v2022_v31  ;;  %v34_v31 = vld [vmem:[%s3182_s0 + $0x90] sm:$0xff] }
  0x3f   :  { %1775 = vmatmul.msk.f32.gmra.mxu0 %vm65_vm1, %v23_v32  ;;  %1874 = vmatmul.msk.f32.gmra.mxu1 %vm65_vm1, %v1824_v33  ;;  %v1835_v32 = vld [vmem:[%s3182_s0 + $0x218] sm:$0xff] }
  0x45   :  { %1974 = vmatmul.msk.f32.gmra.mxu2 %vm65_vm1, %v1924_v34  ;;  %2073 = vmatmul.msk.f32.gmra.mxu3 %vm65_vm1, %v2023_v35 }
  0x47   :  { %1776 = vmatmul.msk.f32.gmra.mxu0 %vm65_vm1, %v24_v36  ;;  %1875 = vmatmul.msk.f32.gmra.mxu1 %vm65_vm1, %v1825_v37 }
  0x4d   :  { %1975 = vmatmul.msk.f32.gmra.mxu2 %vm65_vm1, %v1925_v38  ;;  %2074 = vmatmul.msk.f32.gmra.mxu3 %vm65_vm1, %v2024_v39  ;;  %v1935_v39 = vld [vmem:[%s3182_s0 + $0x3a8] sm:$0xff] }
  0x4f   :  { %1777 = vmatmul.msk.f32.gmra.mxu0 %vm65_vm1, %v25_v40  ;;  %1876 = vmatmul.msk.f32.gmra.mxu1 %vm65_vm1, %v1826_v41  ;;  %v2034_v40 = vld [vmem:[%s3182_s0 + $0x530] sm:$0xff] }
  0x55   :  { %1976 = vmatmul.msk.f32.gmra.mxu2 %vm65_vm1, %v1926_v42  ;;  %2075 = vmatmul.msk.f32.gmra.mxu3 %vm65_vm1, %v2025_v43 }
  0x57   :  { %1778 = vmatmul.msk.f32.gmra.mxu0 %vm65_vm1, %v26_v44  ;;  %1877 = vmatmul.msk.f32.gmra.mxu1 %vm65_vm1, %v1827_v45  ;;  %v35_v44 = vld [vmem:[%s3182_s0 + $0x98] sm:$0xff]  ;;  %v1836_v45 = vld [vmem:[%s3182_s0 + $0x220] sm:$0xff] }
  0x5d   :  { %1977 = vmatmul.msk.f32.gmra.mxu2 %vm65_vm1, %v1927_v46  ;;  %2076 = vmatmul.msk.f32.gmra.mxu3 %vm65_vm1, %v2026_v47 }
  0x5f   :  { %1779 = vmatmul.msk.f32.gmra.mxu0 %vm65_vm1, %v27_v48  ;;  %1878 = vmatmul.msk.f32.gmra.mxu1 %vm65_vm1, %v1828_v49 }
  0x65   :  { %1978 = vmatmul.msk.f32.gmra.mxu2 %vm65_vm1, %v1928_v50  ;;  %2077 = vmatmul.msk.f32.gmra.mxu3 %vm65_vm1, %v2027_v51 }
  0x67   :  { %1780 = vmatmul.msk.f32.gmra.mxu0 %vm65_vm1, %v28_v52  ;;  %1879 = vmatmul.msk.f32.gmra.mxu1 %vm65_vm1, %v1829_v53  ;;  %v1936_v52 = vld [vmem:[%s3182_s0 + $0x3b0] sm:$0xff]  ;;  %v2035_v53 = vld [vmem:[%s3182_s0 + $0x538] sm:$0xff] }
  0x6d   :  { %1979 = vmatmul.msk.f32.gmra.mxu2 %vm65_vm1, %v1929_v54  ;;  %2078 = vmatmul.msk.f32.gmra.mxu3 %vm65_vm1, %v2028_v55 }
  0x6f   :  { %1781 = vmatmul.msk.f32.gmra.mxu0 %vm65_vm1, %v29_v56  ;;  %1880 = vmatmul.msk.f32.gmra.mxu1 %vm65_vm1, %v1830_v57  ;;  %v36_v57 = vld [vmem:[%s3182_s0 + $0xa0] sm:$0xff] }
  0x75   :  { %1980 = vmatmul.msk.f32.gmra.mxu2 %vm65_vm1, %v1930_v58  ;;  %2079 = vmatmul.msk.f32.gmra.mxu3 %vm65_vm1, %v2029_v59  ;;  %v1837_v58 = vld [vmem:[%s3182_s0 + $0x228] sm:$0xff] }
  0x77   :  { %1782 = vmatmul.msk.f32.gmra.mxu0 %vm65_vm1, %v30_v60  ;;  %1881 = vmatmul.msk.f32.gmra.mxu1 %vm65_vm1, %v1831_v61 }
  0x7d   :  { %1981 = vmatmul.msk.f32.gmra.mxu2 %vm65_vm1, %v1931_v62  ;;  %2080 = vmatmul.msk.f32.gmra.mxu3 %vm65_vm1, %v2030_v63 }
  0x7f   :  { %1783 = vmatmul.msk.f32.gmra.mxu0 %vm65_vm1, %v31_v0  ;;  %1882 = vmatmul.msk.f32.gmra.mxu1 %vm65_vm1, %v1832_v1  ;;  %v1937_v1 = vld [vmem:[%s3182_s0 + $0x3b8] sm:$0xff] }
  0x84   :  { %v234_v4 = vpop.f32.mrf.mxu0  ;;  %v595_v5 = vpop.f32.mrf.mxu1 }
  0x85   :  { %1982 = vmatmul.msk.f32.gmra.mxu2 %vm65_vm1, %v1932_v2  ;;  %v742_v8 = vmax.f32 %v234_v4, %v595_v5  ;;  %2081 = vmatmul.msk.f32.gmra.mxu3 %vm65_vm1, %v2031_v3  ;;  %v2036_v2 = vld [vmem:[%s3182_s0 + $0x540] sm:$0xff] }
  0x87   :  { %1784 = vmatmul.msk.f32.gmra.mxu0 %vm65_vm1, %v32_v6  ;;  %1883 = vmatmul.msk.f32.gmra.mxu1 %vm65_vm1, %v1833_v7  ;;  %v37_v6 = vld [vmem:[%s3182_s0 + $0xa8] sm:$0xff]  ;;  %v1838_v7 = vld [vmem:[%s3182_s0 + $0x230] sm:$0xff] }
  0x88   :  { %v1005_v9 = vpop.f32.mrf.mxu2  ;;  %v1415_v10 = vpop.f32.mrf.mxu3 }
  0x89   :  { %v1152_v11 = vmax.f32 %v742_v8, %v1005_v9 }
  0x8b   :  { %v1562_v15 = vmax.f32 %v1152_v11, %v1415_v10 }
  0x8c   :  { %v237_v16 = vpop.f32.mrf.mxu0  ;;  %v598_v17 = vpop.f32.mrf.mxu1 }
  0x8d   :  { %v1615_v20 = vadd.f32 %v2417_v12, %v1562_v15  ;;  %1983 = vmatmul.msk.f32.gmra.mxu2 %vm65_vm1, %v1933_v13  ;;  %v743_v21 = vmax.f32 %v237_v16, %v598_v17  ;;  %2082 = vmatmul.msk.f32.gmra.mxu3 %vm65_vm1, %v2032_v14  ;;  %v1938_v15 = vld [vmem:[%s3182_s0 + $0x3c0] sm:$0xff]  ;;  %v2037_v16 = vld [vmem:[%s3182_s0 + $0x548] sm:$0xff] }
  0x8f   :  { %v1664_v22 = vmax.f32 %v1615_v20, 0.0  ;;  %1785 = vmatmul.msk.f32.gmra.mxu0 %vm65_vm1, %v33_v18  ;;  %1884 = vmatmul.msk.f32.gmra.mxu1 %vm65_vm1, %v1834_v19  ;;  %v38_v20 = vld [vmem:[%s3182_s0 + $0xb0] sm:$0xff] }
  0x90   :  { %v1008_v23 = vpop.f32.mrf.mxu2  ;;  %v1418_v24 = vpop.f32.mrf.mxu3 }
  0x91   :  { %1714 = vst.msk [vmem:[%s3184_s3] sm:$0xff] %vm1713_vm2, %v1664_v22  ;;  %v1153_v25 = vmax.f32 %v743_v21, %v1008_v23  ;;  %v1839_v21 = vld [vmem:[%s3182_s0 + $0x238] sm:$0xff] }
  0x93   :  { %v1563_v28 = vmax.f32 %v1153_v25, %v1418_v24 }
  0x94   :  { %v240_v29 = vpop.f32.mrf.mxu0  ;;  %v601_v30 = vpop.f32.mrf.mxu1 }
  0x95   :  { %v1616_v33 = vadd.f32 %v2417_v12, %v1563_v28  ;;  %1984 = vmatmul.msk.f32.gmra.mxu2 %vm65_vm1, %v1934_v26  ;;  %v744_v34 = vmax.f32 %v240_v29, %v601_v30  ;;  %2083 = vmatmul.msk.f32.gmra.mxu3 %vm65_vm1, %v2033_v27  ;;  %v1939_v28 = vld [vmem:[%s3182_s0 + $0x3c8] sm:$0xff]  ;;  %v2038_v29 = vld [vmem:[%s3182_s0 + $0x550] sm:$0xff] }
  0x97   :  { %v1665_v35 = vmax.f32 %v1616_v33, 0.0  ;;  %1786 = vmatmul.msk.f32.gmra.mxu0 %vm65_vm1, %v34_v31  ;;  %1885 = vmatmul.msk.f32.gmra.mxu1 %vm65_vm1, %v1835_v32  ;;  %v39_v33 = vld [vmem:[%s3182_s0 + $0xb8] sm:$0xff] }
  0x98   :  { %v1011_v36 = vpop.f32.mrf.mxu2  ;;  %v1421_v37 = vpop.f32.mrf.mxu3 }
  0x99   :  { %1715 = vst.msk [vmem:[%s3184_s3 + $0x8] sm:$0xff] %vm1713_vm2, %v1665_v35  ;;  %v1154_v38 = vmax.f32 %v744_v34, %v1011_v36  ;;  %v1840_v34 = vld [vmem:[%s3182_s0 + $0x240] sm:$0xff] }
  0x9b   :  { %v1564_v41 = vmax.f32 %v1154_v38, %v1421_v37 }
  0x9c   :  { %v243_v42 = vpop.f32.mrf.mxu0  ;;  %v604_v43 = vpop.f32.mrf.mxu1 }
  0x9d   :  { %v1617_v46 = vadd.f32 %v2417_v12, %v1564_v41  ;;  %1985 = vmatmul.msk.f32.gmra.mxu2 %vm65_vm1, %v1935_v39  ;;  %v745_v47 = vmax.f32 %v243_v42, %v604_v43  ;;  %2084 = vmatmul.msk.f32.gmra.mxu3 %vm65_vm1, %v2034_v40  ;;  %v1940_v41 = vld [vmem:[%s3182_s0 + $0x3d0] sm:$0xff]  ;;  %v2039_v42 = vld [vmem:[%s3182_s0 + $0x558] sm:$0xff] }
  0x9f   :  { %v1666_v48 = vmax.f32 %v1617_v46, 0.0  ;;  %1787 = vmatmul.msk.f32.gmra.mxu0 %vm65_vm1, %v35_v44  ;;  %1886 = vmatmul.msk.f32.gmra.mxu1 %vm65_vm1, %v1836_v45  ;;  %v40_v46 = vld [vmem:[%s3182_s0 + $0xc0] sm:$0xff] }
  0xa0   :  { %v1014_v49 = vpop.f32.mrf.mxu2  ;;  %v1424_v50 = vpop.f32.mrf.mxu3 }
  0xa1   :  { %1716 = vst.msk [vmem:[%s3184_s3 + $0x10] sm:$0xff] %vm1713_vm2, %v1666_v48  ;;  %v1155_v51 = vmax.f32 %v745_v47, %v1014_v49  ;;  %v1841_v47 = vld [vmem:[%s3182_s0 + $0x248] sm:$0xff] }
  0xa3   :  { %v1565_v54 = vmax.f32 %v1155_v51, %v1424_v50 }
  0xa4   :  { %v246_v55 = vpop.f32.mrf.mxu0  ;;  %v607_v56 = vpop.f32.mrf.mxu1 }
  0xa5   :  { %v1618_v59 = vadd.f32 %v2417_v12, %v1565_v54  ;;  %1986 = vmatmul.msk.f32.gmra.mxu2 %vm65_vm1, %v1936_v52  ;;  %v746_v60 = vmax.f32 %v246_v55, %v607_v56  ;;  %2085 = vmatmul.msk.f32.gmra.mxu3 %vm65_vm1, %v2035_v53  ;;  %v1941_v54 = vld [vmem:[%s3182_s0 + $0x3d8] sm:$0xff]  ;;  %v2040_v55 = vld [vmem:[%s3182_s0 + $0x560] sm:$0xff] }
  0xa7   :  { %v1667_v61 = vmax.f32 %v1618_v59, 0.0  ;;  %1788 = vmatmul.msk.f32.gmra.mxu0 %vm65_vm1, %v36_v57  ;;  %1887 = vmatmul.msk.f32.gmra.mxu1 %vm65_vm1, %v1837_v58  ;;  %v41_v59 = vld [vmem:[%s3182_s0 + $0xc8] sm:$0xff] }
  0xa8   :  { %v1017_v62 = vpop.f32.mrf.mxu2  ;;  %v1427_v63 = vpop.f32.mrf.mxu3 }
  0xa9   :  { %1717 = vst.msk [vmem:[%s3184_s3 + $0x18] sm:$0xff] %vm1713_vm2, %v1667_v61  ;;  %v1156_v0 = vmax.f32 %v746_v60, %v1017_v62  ;;  %v1842_v60 = vld [vmem:[%s3182_s0 + $0x250] sm:$0xff] }
  0xab   :  { %v1566_v3 = vmax.f32 %v1156_v0, %v1427_v63 }
  0xac   :  { %v249_v4 = vpop.f32.mrf.mxu0  ;;  %v610_v5 = vpop.f32.mrf.mxu1 }
  0xad   :  { %v1619_v8 = vadd.f32 %v2417_v12, %v1566_v3  ;;  %1987 = vmatmul.msk.f32.gmra.mxu2 %vm65_vm1, %v1937_v1  ;;  %v747_v9 = vmax.f32 %v249_v4, %v610_v5  ;;  %2086 = vmatmul.msk.f32.gmra.mxu3 %vm65_vm1, %v2036_v2  ;;  %v1942_v3 = vld [vmem:[%s3182_s0 + $0x3e0] sm:$0xff]  ;;  %v2041_v4 = vld [vmem:[%s3182_s0 + $0x568] sm:$0xff] }
  0xaf   :  { %v1668_v10 = vmax.f32 %v1619_v8, 0.0  ;;  %1789 = vmatmul.msk.f32.gmra.mxu0 %vm65_vm1, %v37_v6  ;;  %1888 = vmatmul.msk.f32.gmra.mxu1 %vm65_vm1, %v1838_v7  ;;  %v42_v8 = vld [vmem:[%s3182_s0 + $0xd0] sm:$0xff] }
  0xb0   :  { %v1020_v11 = vpop.f32.mrf.mxu2  ;;  %v1430_v13 = vpop.f32.mrf.mxu3 }
  0xb1   :  { %1718 = vst.msk [vmem:[%s3184_s3 + $0x20] sm:$0xff] %vm1713_vm2, %v1668_v10  ;;  %v1157_v14 = vmax.f32 %v747_v9, %v1020_v11  ;;  %v1843_v9 = vld [vmem:[%s3182_s0 + $0x258] sm:$0xff] }
  0xb3   :  { %v1567_v17 = vmax.f32 %v1157_v14, %v1430_v13 }
  0xb4   :  { %v252_v18 = vpop.f32.mrf.mxu0  ;;  %v613_v19 = vpop.f32.mrf.mxu1 }
  0xb5   :  { %v1620_v22 = vadd.f32 %v2417_v12, %v1567_v17  ;;  %1988 = vmatmul.msk.f32.gmra.mxu2 %vm65_vm1, %v1938_v15  ;;  %v748_v23 = vmax.f32 %v252_v18, %v613_v19  ;;  %2087 = vmatmul.msk.f32.gmra.mxu3 %vm65_vm1, %v2037_v16  ;;  %v1943_v17 = vld [vmem:[%s3182_s0 + $0x3e8] sm:$0xff]  ;;  %v2042_v18 = vld [vmem:[%s3182_s0 + $0x570] sm:$0xff] }
  0xb7   :  { %v1669_v24 = vmax.f32 %v1620_v22, 0.0  ;;  %1790 = vmatmul.msk.f32.gmra.mxu0 %vm65_vm1, %v38_v20  ;;  %1889 = vmatmul.msk.f32.gmra.mxu1 %vm65_vm1, %v1839_v21  ;;  %v43_v22 = vld [vmem:[%s3182_s0 + $0xd8] sm:$0xff] }
  0xb8   :  { %v1023_v25 = vpop.f32.mrf.mxu2  ;;  %v1433_v26 = vpop.f32.mrf.mxu3 }
  0xb9   :  { %1719 = vst.msk [vmem:[%s3184_s3 + $0x28] sm:$0xff] %vm1713_vm2, %v1669_v24  ;;  %v1158_v27 = vmax.f32 %v748_v23, %v1023_v25  ;;  %v1844_v23 = vld [vmem:[%s3182_s0 + $0x260] sm:$0xff] }
  0xbb   :  { %v1568_v30 = vmax.f32 %v1158_v27, %v1433_v26 }
  0xbc   :  { %v255_v31 = vpop.f32.mrf.mxu0  ;;  %v616_v32 = vpop.f32.mrf.mxu1 }
  0xbd   :  { %v1621_v35 = vadd.f32 %v2417_v12, %v1568_v30  ;;  %1989 = vmatmul.msk.f32.gmra.mxu2 %vm65_vm1, %v1939_v28  ;;  %v749_v36 = vmax.f32 %v255_v31, %v616_v32  ;;  %2088 = vmatmul.msk.f32.gmra.mxu3 %vm65_vm1, %v2038_v29  ;;  %v1944_v30 = vld [vmem:[%s3182_s0 + $0x3f0] sm:$0xff]  ;;  %v2043_v31 = vld [vmem:[%s3182_s0 + $0x578] sm:$0xff] }
  0xbf   :  { %v1670_v37 = vmax.f32 %v1621_v35, 0.0  ;;  %1791 = vmatmul.msk.f32.gmra.mxu0 %vm65_vm1, %v39_v33  ;;  %1890 = vmatmul.msk.f32.gmra.mxu1 %vm65_vm1, %v1840_v34  ;;  %v44_v35 = vld [vmem:[%s3182_s0 + $0xe0] sm:$0xff] }
  0xc0   :  { %v1026_v38 = vpop.f32.mrf.mxu2  ;;  %v1436_v39 = vpop.f32.mrf.mxu3 }
  0xc1   :  { %1720 = vst.msk [vmem:[%s3184_s3 + $0x30] sm:$0xff] %vm1713_vm2, %v1670_v37  ;;  %v1159_v40 = vmax.f32 %v749_v36, %v1026_v38  ;;  %v1845_v36 = vld [vmem:[%s3182_s0 + $0x268] sm:$0xff] }
  0xc3   :  { %v1569_v43 = vmax.f32 %v1159_v40, %v1436_v39 }
  0xc4   :  { %v258_v44 = vpop.f32.mrf.mxu0  ;;  %v619_v45 = vpop.f32.mrf.mxu1 }
  0xc5   :  { %v1622_v48 = vadd.f32 %v2417_v12, %v1569_v43  ;;  %1990 = vmatmul.msk.f32.gmra.mxu2 %vm65_vm1, %v1940_v41  ;;  %v750_v49 = vmax.f32 %v258_v44, %v619_v45  ;;  %2089 = vmatmul.msk.f32.gmra.mxu3 %vm65_vm1, %v2039_v42  ;;  %v1945_v43 = vld [vmem:[%s3182_s0 + $0x3f8] sm:$0xff]  ;;  %v2044_v44 = vld [vmem:[%s3182_s0 + $0x580] sm:$0xff] }
  0xc7   :  { %v1671_v50 = vmax.f32 %v1622_v48, 0.0  ;;  %1792 = vmatmul.msk.f32.gmra.mxu0 %vm65_vm1, %v40_v46  ;;  %1891 = vmatmul.msk.f32.gmra.mxu1 %vm65_vm1, %v1841_v47  ;;  %v45_v48 = vld [vmem:[%s3182_s0 + $0xe8] sm:$0xff] }
  0xc8   :  { %v1029_v51 = vpop.f32.mrf.mxu2  ;;  %v1439_v52 = vpop.f32.mrf.mxu3 }
  0xc9   :  { %1721 = vst.msk [vmem:[%s3184_s3 + $0x38] sm:$0xff] %vm1713_vm2, %v1671_v50  ;;  %v1160_v53 = vmax.f32 %v750_v49, %v1029_v51  ;;  %v1846_v49 = vld [vmem:[%s3182_s0 + $0x270] sm:$0xff] }
  0xcb   :  { %v1570_v56 = vmax.f32 %v1160_v53, %v1439_v52 }
  0xcc   :  { %v261_v57 = vpop.f32.mrf.mxu0  ;;  %v622_v58 = vpop.f32.mrf.mxu1 }
  0xcd   :  { %v1623_v61 = vadd.f32 %v2417_v12, %v1570_v56  ;;  %1991 = vmatmul.msk.f32.gmra.mxu2 %vm65_vm1, %v1941_v54  ;;  %v751_v62 = vmax.f32 %v261_v57, %v622_v58  ;;  %2090 = vmatmul.msk.f32.gmra.mxu3 %vm65_vm1, %v2040_v55  ;;  %v1946_v56 = vld [vmem:[%s3182_s0 + $0x400] sm:$0xff]  ;;  %v2045_v57 = vld [vmem:[%s3182_s0 + $0x588] sm:$0xff] }
  0xcf   :  { %v1672_v63 = vmax.f32 %v1623_v61, 0.0  ;;  %1793 = vmatmul.msk.f32.gmra.mxu0 %vm65_vm1, %v41_v59  ;;  %1892 = vmatmul.msk.f32.gmra.mxu1 %vm65_vm1, %v1842_v60  ;;  %v46_v61 = vld [vmem:[%s3182_s0 + $0xf0] sm:$0xff] }
  0xd0   :  { %v1032_v0 = vpop.f32.mrf.mxu2  ;;  %v1442_v1 = vpop.f32.mrf.mxu3 }
  0xd1   :  { %1722 = vst.msk [vmem:[%s3184_s3 + $0x40] sm:$0xff] %vm1713_vm2, %v1672_v63  ;;  %v1161_v2 = vmax.f32 %v751_v62, %v1032_v0  ;;  %v1847_v62 = vld [vmem:[%s3182_s0 + $0x278] sm:$0xff] }
  0xd3   :  { %v1571_v5 = vmax.f32 %v1161_v2, %v1442_v1 }
  0xd4   :  { %v264_v6 = vpop.f32.mrf.mxu0  ;;  %v625_v7 = vpop.f32.mrf.mxu1 }
  0xd5   :  { %v1624_v10 = vadd.f32 %v2417_v12, %v1571_v5  ;;  %1992 = vmatmul.msk.f32.gmra.mxu2 %vm65_vm1, %v1942_v3  ;;  %v752_v11 = vmax.f32 %v264_v6, %v625_v7  ;;  %2091 = vmatmul.msk.f32.gmra.mxu3 %vm65_vm1, %v2041_v4  ;;  %v1947_v5 = vld [vmem:[%s3182_s0 + $0x408] sm:$0xff]  ;;  %v2046_v6 = vld [vmem:[%s3182_s0 + $0x590] sm:$0xff] }
  0xd7   :  { %v1673_v13 = vmax.f32 %v1624_v10, 0.0  ;;  %1794 = vmatmul.msk.f32.gmra.mxu0 %vm65_vm1, %v42_v8  ;;  %1893 = vmatmul.msk.f32.gmra.mxu1 %vm65_vm1, %v1843_v9  ;;  %v47_v10 = vld [vmem:[%s3182_s0 + $0xf8] sm:$0xff] }
  0xd8   :  { %v1035_v14 = vpop.f32.mrf.mxu2  ;;  %v1445_v15 = vpop.f32.mrf.mxu3 }
  0xd9   :  { %1723 = vst.msk [vmem:[%s3184_s3 + $0x48] sm:$0xff] %vm1713_vm2, %v1673_v13  ;;  %v1162_v16 = vmax.f32 %v752_v11, %v1035_v14  ;;  %v1848_v11 = vld [vmem:[%s3182_s0 + $0x280] sm:$0xff] }
  0xdb   :  { %v1572_v19 = vmax.f32 %v1162_v16, %v1445_v15 }
  0xdc   :  { %v267_v20 = vpop.f32.mrf.mxu0  ;;  %v628_v21 = vpop.f32.mrf.mxu1 }
  0xdd   :  { %v1625_v24 = vadd.f32 %v2417_v12, %v1572_v19  ;;  %1993 = vmatmul.msk.f32.gmra.mxu2 %vm65_vm1, %v1943_v17  ;;  %v753_v25 = vmax.f32 %v267_v20, %v628_v21  ;;  %2092 = vmatmul.msk.f32.gmra.mxu3 %vm65_vm1, %v2042_v18  ;;  %v1948_v19 = vld [vmem:[%s3182_s0 + $0x410] sm:$0xff]  ;;  %v2047_v20 = vld [vmem:[%s3182_s0 + $0x598] sm:$0xff] }
  0xdf   :  { %v1674_v26 = vmax.f32 %v1625_v24, 0.0  ;;  %1795 = vmatmul.msk.f32.gmra.mxu0 %vm65_vm1, %v43_v22  ;;  %1894 = vmatmul.msk.f32.gmra.mxu1 %vm65_vm1, %v1844_v23  ;;  %v48_v24 = vld [vmem:[%s3182_s0 + $0x100] sm:$0xff] }
  0xe0   :  { %v1038_v27 = vpop.f32.mrf.mxu2  ;;  %v1448_v28 = vpop.f32.mrf.mxu3 }
  0xe1   :  { %1724 = vst.msk [vmem:[%s3184_s3 + $0x50] sm:$0xff] %vm1713_vm2, %v1674_v26  ;;  %v1163_v29 = vmax.f32 %v753_v25, %v1038_v27  ;;  %v1849_v25 = vld [vmem:[%s3182_s0 + $0x288] sm:$0xff] }
  0xe3   :  { %v1573_v32 = vmax.f32 %v1163_v29, %v1448_v28 }
  0xe4   :  { %v270_v33 = vpop.f32.mrf.mxu0  ;;  %v631_v34 = vpop.f32.mrf.mxu1 }
  0xe5   :  { %v1626_v37 = vadd.f32 %v2417_v12, %v1573_v32  ;;  %1994 = vmatmul.msk.f32.gmra.mxu2 %vm65_vm1, %v1944_v30  ;;  %v754_v38 = vmax.f32 %v270_v33, %v631_v34  ;;  %2093 = vmatmul.msk.f32.gmra.mxu3 %vm65_vm1, %v2043_v31  ;;  %v1949_v32 = vld [vmem:[%s3182_s0 + $0x418] sm:$0xff]  ;;  %v2048_v33 = vld [vmem:[%s3182_s0 + $0x5a0] sm:$0xff] }
  0xe7   :  { %v1675_v39 = vmax.f32 %v1626_v37, 0.0  ;;  %1796 = vmatmul.msk.f32.gmra.mxu0 %vm65_vm1, %v44_v35  ;;  %1895 = vmatmul.msk.f32.gmra.mxu1 %vm65_vm1, %v1845_v36  ;;  %v49_v37 = vld [vmem:[%s3182_s0 + $0x108] sm:$0xff] }
  0xe8   :  { %v1041_v40 = vpop.f32.mrf.mxu2  ;;  %v1451_v41 = vpop.f32.mrf.mxu3 }
  0xe9   :  { %1725 = vst.msk [vmem:[%s3184_s3 + $0x58] sm:$0xff] %vm1713_vm2, %v1675_v39  ;;  %v1164_v42 = vmax.f32 %v754_v38, %v1041_v40  ;;  %v1850_v38 = vld [vmem:[%s3182_s0 + $0x290] sm:$0xff] }
  0xeb   :  { %v1574_v45 = vmax.f32 %v1164_v42, %v1451_v41 }
  0xec   :  { %v273_v46 = vpop.f32.mrf.mxu0  ;;  %v634_v47 = vpop.f32.mrf.mxu1 }
  0xed   :  { %v1627_v50 = vadd.f32 %v2417_v12, %v1574_v45  ;;  %1995 = vmatmul.msk.f32.gmra.mxu2 %vm65_vm1, %v1945_v43  ;;  %v755_v51 = vmax.f32 %v273_v46, %v634_v47  ;;  %2094 = vmatmul.msk.f32.gmra.mxu3 %vm65_vm1, %v2044_v44  ;;  %v1950_v45 = vld [vmem:[%s3182_s0 + $0x420] sm:$0xff]  ;;  %v2049_v46 = vld [vmem:[%s3182_s0 + $0x5a8] sm:$0xff] }
  0xef   :  { %v1676_v52 = vmax.f32 %v1627_v50, 0.0  ;;  %1797 = vmatmul.msk.f32.gmra.mxu0 %vm65_vm1, %v45_v48  ;;  %1896 = vmatmul.msk.f32.gmra.mxu1 %vm65_vm1, %v1846_v49  ;;  %v50_v50 = vld [vmem:[%s3182_s0 + $0x110] sm:$0xff] }
  0xf0   :  { %v1044_v53 = vpop.f32.mrf.mxu2  ;;  %v1454_v54 = vpop.f32.mrf.mxu3 }
  0xf1   :  { %1726 = vst.msk [vmem:[%s3184_s3 + $0x60] sm:$0xff] %vm1713_vm2, %v1676_v52  ;;  %v1165_v55 = vmax.f32 %v755_v51, %v1044_v53  ;;  %v1851_v51 = vld [vmem:[%s3182_s0 + $0x298] sm:$0xff] }
  0xf3   :  { %v1575_v58 = vmax.f32 %v1165_v55, %v1454_v54 }
  0xf4   :  { %v276_v59 = vpop.f32.mrf.mxu0  ;;  %v637_v60 = vpop.f32.mrf.mxu1 }
  0xf5   :  { %v1628_v63 = vadd.f32 %v2417_v12, %v1575_v58  ;;  %1996 = vmatmul.msk.f32.gmra.mxu2 %vm65_vm1, %v1946_v56  ;;  %v756_v0 = vmax.f32 %v276_v59, %v637_v60  ;;  %2095 = vmatmul.msk.f32.gmra.mxu3 %vm65_vm1, %v2045_v57  ;;  %v1951_v58 = vld [vmem:[%s3182_s0 + $0x428] sm:$0xff]  ;;  %v2050_v59 = vld [vmem:[%s3182_s0 + $0x5b0] sm:$0xff] }
  0xf7   :  { %v1677_v1 = vmax.f32 %v1628_v63, 0.0  ;;  %1798 = vmatmul.msk.f32.gmra.mxu0 %vm65_vm1, %v46_v61  ;;  %1897 = vmatmul.msk.f32.gmra.mxu1 %vm65_vm1, %v1847_v62  ;;  %v51_v63 = vld [vmem:[%s3182_s0 + $0x118] sm:$0xff] }
  0xf8   :  { %v1047_v2 = vpop.f32.mrf.mxu2  ;;  %v1457_v3 = vpop.f32.mrf.mxu3 }
  0xf9   :  { %1727 = vst.msk [vmem:[%s3184_s3 + $0x68] sm:$0xff] %vm1713_vm2, %v1677_v1  ;;  %v1166_v4 = vmax.f32 %v756_v0, %v1047_v2  ;;  %v1852_v0 = vld [vmem:[%s3182_s0 + $0x2a0] sm:$0xff] }
  0xfb   :  { %v1576_v7 = vmax.f32 %v1166_v4, %v1457_v3 }
  0xfc   :  { %v279_v8 = vpop.f32.mrf.mxu0  ;;  %v640_v9 = vpop.f32.mrf.mxu1 }
  0xfd   :  { %v1629_v13 = vadd.f32 %v2417_v12, %v1576_v7  ;;  %1997 = vmatmul.msk.f32.gmra.mxu2 %vm65_vm1, %v1947_v5  ;;  %v757_v14 = vmax.f32 %v279_v8, %v640_v9  ;;  %2096 = vmatmul.msk.f32.gmra.mxu3 %vm65_vm1, %v2046_v6  ;;  %v1952_v7 = vld [vmem:[%s3182_s0 + $0x430] sm:$0xff]  ;;  %v2051_v8 = vld [vmem:[%s3182_s0 + $0x5b8] sm:$0xff] }
  0xff   :  { %v1678_v15 = vmax.f32 %v1629_v13, 0.0  ;;  %1799 = vmatmul.msk.f32.gmra.mxu0 %vm65_vm1, %v47_v10  ;;  %1898 = vmatmul.msk.f32.gmra.mxu1 %vm65_vm1, %v1848_v11  ;;  %v52_v13 = vld [vmem:[%s3182_s0 + $0x120] sm:$0xff] }
 0x100   :  { %v1050_v16 = vpop.f32.mrf.mxu2  ;;  %v1460_v17 = vpop.f32.mrf.mxu3 }
 0x101   :  { %1728 = vst.msk [vmem:[%s3184_s3 + $0x70] sm:$0xff] %vm1713_vm2, %v1678_v15  ;;  %v1167_v18 = vmax.f32 %v757_v14, %v1050_v16  ;;  %v1853_v14 = vld [vmem:[%s3182_s0 + $0x2a8] sm:$0xff] }
 0x103   :  { %v1577_v21 = vmax.f32 %v1167_v18, %v1460_v17 }
 0x104   :  { %v282_v22 = vpop.f32.mrf.mxu0  ;;  %v643_v23 = vpop.f32.mrf.mxu1 }
 0x105   :  { %v1630_v26 = vadd.f32 %v2417_v12, %v1577_v21  ;;  %1998 = vmatmul.msk.f32.gmra.mxu2 %vm65_vm1, %v1948_v19  ;;  %v758_v27 = vmax.f32 %v282_v22, %v643_v23  ;;  %2097 = vmatmul.msk.f32.gmra.mxu3 %vm65_vm1, %v2047_v20  ;;  %v1953_v21 = vld [vmem:[%s3182_s0 + $0x438] sm:$0xff]  ;;  %v2052_v22 = vld [vmem:[%s3182_s0 + $0x5c0] sm:$0xff] }
 0x107   :  { %v1679_v28 = vmax.f32 %v1630_v26, 0.0  ;;  %1800 = vmatmul.msk.f32.gmra.mxu0 %vm65_vm1, %v48_v24  ;;  %1899 = vmatmul.msk.f32.gmra.mxu1 %vm65_vm1, %v1849_v25  ;;  %v53_v26 = vld [vmem:[%s3182_s0 + $0x128] sm:$0xff] }
 0x108   :  { %v1053_v29 = vpop.f32.mrf.mxu2  ;;  %v1463_v30 = vpop.f32.mrf.mxu3 }
 0x109   :  { %1729 = vst.msk [vmem:[%s3184_s3 + $0x78] sm:$0xff] %vm1713_vm2, %v1679_v28  ;;  %v1168_v31 = vmax.f32 %v758_v27, %v1053_v29  ;;  %v1854_v27 = vld [vmem:[%s3182_s0 + $0x2b0] sm:$0xff] }
 0x10b   :  { %v1578_v34 = vmax.f32 %v1168_v31, %v1463_v30 }
 0x10c   :  { %v285_v35 = vpop.f32.mrf.mxu0  ;;  %v646_v36 = vpop.f32.mrf.mxu1 }
 0x10d   :  { %v1631_v39 = vadd.f32 %v2417_v12, %v1578_v34  ;;  %1999 = vmatmul.msk.f32.gmra.mxu2 %vm65_vm1, %v1949_v32  ;;  %v759_v40 = vmax.f32 %v285_v35, %v646_v36  ;;  %2098 = vmatmul.msk.f32.gmra.mxu3 %vm65_vm1, %v2048_v33  ;;  %v1954_v34 = vld [vmem:[%s3182_s0 + $0x440] sm:$0xff]  ;;  %v2053_v35 = vld [vmem:[%s3182_s0 + $0x5c8] sm:$0xff] }
 0x10f   :  { %v1680_v41 = vmax.f32 %v1631_v39, 0.0  ;;  %1801 = vmatmul.msk.f32.gmra.mxu0 %vm65_vm1, %v49_v37  ;;  %1900 = vmatmul.msk.f32.gmra.mxu1 %vm65_vm1, %v1850_v38  ;;  %v54_v39 = vld [vmem:[%s3182_s0 + $0x130] sm:$0xff] }
 0x110   :  { %v1056_v42 = vpop.f32.mrf.mxu2  ;;  %v1466_v43 = vpop.f32.mrf.mxu3 }
 0x111   :  { %1730 = vst.msk [vmem:[%s3184_s3 + $0x80] sm:$0xff] %vm1713_vm2, %v1680_v41  ;;  %v1169_v44 = vmax.f32 %v759_v40, %v1056_v42  ;;  %v1855_v40 = vld [vmem:[%s3182_s0 + $0x2b8] sm:$0xff] }
 0x113   :  { %v1579_v47 = vmax.f32 %v1169_v44, %v1466_v43 }
 0x114   :  { %v288_v48 = vpop.f32.mrf.mxu0  ;;  %v649_v49 = vpop.f32.mrf.mxu1 }
 0x115   :  { %v1632_v52 = vadd.f32 %v2417_v12, %v1579_v47  ;;  %2000 = vmatmul.msk.f32.gmra.mxu2 %vm65_vm1, %v1950_v45  ;;  %v760_v53 = vmax.f32 %v288_v48, %v649_v49  ;;  %2099 = vmatmul.msk.f32.gmra.mxu3 %vm65_vm1, %v2049_v46  ;;  %v1955_v47 = vld [vmem:[%s3182_s0 + $0x448] sm:$0xff]  ;;  %v2054_v48 = vld [vmem:[%s3182_s0 + $0x5d0] sm:$0xff] }
 0x117   :  { %v1681_v54 = vmax.f32 %v1632_v52, 0.0  ;;  %1802 = vmatmul.msk.f32.gmra.mxu0 %vm65_vm1, %v50_v50  ;;  %1901 = vmatmul.msk.f32.gmra.mxu1 %vm65_vm1, %v1851_v51  ;;  %v55_v52 = vld [vmem:[%s3182_s0 + $0x138] sm:$0xff] }
 0x118   :  { %v1059_v55 = vpop.f32.mrf.mxu2  ;;  %v1469_v56 = vpop.f32.mrf.mxu3 }
 0x119   :  { %1731 = vst.msk [vmem:[%s3184_s3 + $0x88] sm:$0xff] %vm1713_vm2, %v1681_v54  ;;  %v1170_v57 = vmax.f32 %v760_v53, %v1059_v55  ;;  %v1856_v53 = vld [vmem:[%s3182_s0 + $0x2c0] sm:$0xff] }
 0x11b   :  { %v1580_v60 = vmax.f32 %v1170_v57, %v1469_v56 }
 0x11c   :  { %v291_v61 = vpop.f32.mrf.mxu0  ;;  %v652_v62 = vpop.f32.mrf.mxu1 }
 0x11d   :  { %v1633_v1 = vadd.f32 %v2417_v12, %v1580_v60  ;;  %2001 = vmatmul.msk.f32.gmra.mxu2 %vm65_vm1, %v1951_v58  ;;  %v761_v2 = vmax.f32 %v291_v61, %v652_v62  ;;  %2100 = vmatmul.msk.f32.gmra.mxu3 %vm65_vm1, %v2050_v59  ;;  %v1956_v60 = vld [vmem:[%s3182_s0 + $0x450] sm:$0xff]  ;;  %v2055_v61 = vld [vmem:[%s3182_s0 + $0x5d8] sm:$0xff] }
 0x11f   :  { %v1682_v3 = vmax.f32 %v1633_v1, 0.0  ;;  %1803 = vmatmul.msk.f32.gmra.mxu0 %vm65_vm1, %v51_v63  ;;  %1902 = vmatmul.msk.f32.gmra.mxu1 %vm65_vm1, %v1852_v0  ;;  %v56_v1 = vld [vmem:[%s3182_s0 + $0x140] sm:$0xff] }
 0x120   :  { %v1062_v4 = vpop.f32.mrf.mxu2  ;;  %v1472_v5 = vpop.f32.mrf.mxu3 }
 0x121   :  { %1732 = vst.msk [vmem:[%s3184_s3 + $0x90] sm:$0xff] %vm1713_vm2, %v1682_v3  ;;  %v1171_v6 = vmax.f32 %v761_v2, %v1062_v4  ;;  %v1857_v2 = vld [vmem:[%s3182_s0 + $0x2c8] sm:$0xff] }
 0x123   :  { %v1581_v9 = vmax.f32 %v1171_v6, %v1472_v5 }
 0x124   :  { %v294_v10 = vpop.f32.mrf.mxu0  ;;  %v655_v11 = vpop.f32.mrf.mxu1 }
 0x125   :  { %v1634_v15 = vadd.f32 %v2417_v12, %v1581_v9  ;;  %2002 = vmatmul.msk.f32.gmra.mxu2 %vm65_vm1, %v1952_v7  ;;  %v762_v16 = vmax.f32 %v294_v10, %v655_v11  ;;  %2101 = vmatmul.msk.f32.gmra.mxu3 %vm65_vm1, %v2051_v8  ;;  %v1957_v9 = vld [vmem:[%s3182_s0 + $0x458] sm:$0xff]  ;;  %v2056_v10 = vld [vmem:[%s3182_s0 + $0x5e0] sm:$0xff] }
 0x127   :  { %v1683_v17 = vmax.f32 %v1634_v15, 0.0  ;;  %1804 = vmatmul.msk.f32.gmra.mxu0 %vm65_vm1, %v52_v13  ;;  %1903 = vmatmul.msk.f32.gmra.mxu1 %vm65_vm1, %v1853_v14  ;;  %v57_v15 = vld [vmem:[%s3182_s0 + $0x148] sm:$0xff] }
 0x128   :  { %v1065_v18 = vpop.f32.mrf.mxu2  ;;  %v1475_v19 = vpop.f32.mrf.mxu3 }
 0x129   :  { %1733 = vst.msk [vmem:[%s3184_s3 + $0x98] sm:$0xff] %vm1713_vm2, %v1683_v17  ;;  %v1172_v20 = vmax.f32 %v762_v16, %v1065_v18  ;;  %v1858_v16 = vld [vmem:[%s3182_s0 + $0x2d0] sm:$0xff] }
 0x12b   :  { %v1582_v23 = vmax.f32 %v1172_v20, %v1475_v19 }
 0x12c   :  { %v297_v24 = vpop.f32.mrf.mxu0  ;;  %v658_v25 = vpop.f32.mrf.mxu1 }
 0x12d   :  { %v1635_v28 = vadd.f32 %v2417_v12, %v1582_v23  ;;  %2003 = vmatmul.msk.f32.gmra.mxu2 %vm65_vm1, %v1953_v21  ;;  %v763_v29 = vmax.f32 %v297_v24, %v658_v25  ;;  %2102 = vmatmul.msk.f32.gmra.mxu3 %vm65_vm1, %v2052_v22  ;;  %v1958_v23 = vld [vmem:[%s3182_s0 + $0x460] sm:$0xff]  ;;  %v2057_v24 = vld [vmem:[%s3182_s0 + $0x5e8] sm:$0xff] }
 0x12f   :  { %v1684_v30 = vmax.f32 %v1635_v28, 0.0  ;;  %1805 = vmatmul.msk.f32.gmra.mxu0 %vm65_vm1, %v53_v26  ;;  %1904 = vmatmul.msk.f32.gmra.mxu1 %vm65_vm1, %v1854_v27  ;;  %v58_v28 = vld [vmem:[%s3182_s0 + $0x150] sm:$0xff] }
 0x130   :  { %v1068_v31 = vpop.f32.mrf.mxu2  ;;  %v1478_v32 = vpop.f32.mrf.mxu3 }
 0x131   :  { %1734 = vst.msk [vmem:[%s3184_s3 + $0xa0] sm:$0xff] %vm1713_vm2, %v1684_v30  ;;  %v1173_v33 = vmax.f32 %v763_v29, %v1068_v31  ;;  %v1859_v29 = vld [vmem:[%s3182_s0 + $0x2d8] sm:$0xff] }
 0x133   :  { %v1583_v36 = vmax.f32 %v1173_v33, %v1478_v32 }
 0x134   :  { %v300_v37 = vpop.f32.mrf.mxu0  ;;  %v661_v38 = vpop.f32.mrf.mxu1 }
 0x135   :  { %v1636_v41 = vadd.f32 %v2417_v12, %v1583_v36  ;;  %2004 = vmatmul.msk.f32.gmra.mxu2 %vm65_vm1, %v1954_v34  ;;  %v764_v42 = vmax.f32 %v300_v37, %v661_v38  ;;  %2103 = vmatmul.msk.f32.gmra.mxu3 %vm65_vm1, %v2053_v35  ;;  %v1959_v36 = vld [vmem:[%s3182_s0 + $0x468] sm:$0xff]  ;;  %v2058_v37 = vld [vmem:[%s3182_s0 + $0x5f0] sm:$0xff] }
 0x137   :  { %v1685_v43 = vmax.f32 %v1636_v41, 0.0  ;;  %1806 = vmatmul.msk.f32.gmra.mxu0 %vm65_vm1, %v54_v39  ;;  %1905 = vmatmul.msk.f32.gmra.mxu1 %vm65_vm1, %v1855_v40  ;;  %v59_v41 = vld [vmem:[%s3182_s0 + $0x158] sm:$0xff] }
 0x138   :  { %v1071_v44 = vpop.f32.mrf.mxu2  ;;  %v1481_v45 = vpop.f32.mrf.mxu3 }
 0x139   :  { %1735 = vst.msk [vmem:[%s3184_s3 + $0xa8] sm:$0xff] %vm1713_vm2, %v1685_v43  ;;  %v1174_v46 = vmax.f32 %v764_v42, %v1071_v44  ;;  %v1860_v42 = vld [vmem:[%s3182_s0 + $0x2e0] sm:$0xff] }
 0x13b   :  { %v1584_v49 = vmax.f32 %v1174_v46, %v1481_v45 }
 0x13c   :  { %v303_v50 = vpop.f32.mrf.mxu0  ;;  %v664_v51 = vpop.f32.mrf.mxu1 }
 0x13d   :  { %v1637_v54 = vadd.f32 %v2417_v12, %v1584_v49  ;;  %2005 = vmatmul.msk.f32.gmra.mxu2 %vm65_vm1, %v1955_v47  ;;  %v765_v55 = vmax.f32 %v303_v50, %v664_v51  ;;  %2104 = vmatmul.msk.f32.gmra.mxu3 %vm65_vm1, %v2054_v48  ;;  %v1960_v49 = vld [vmem:[%s3182_s0 + $0x470] sm:$0xff]  ;;  %v2059_v50 = vld [vmem:[%s3182_s0 + $0x5f8] sm:$0xff] }
 0x13f   :  { %v1686_v56 = vmax.f32 %v1637_v54, 0.0  ;;  %1807 = vmatmul.msk.f32.gmra.mxu0 %vm65_vm1, %v55_v52  ;;  %1906 = vmatmul.msk.f32.gmra.mxu1 %vm65_vm1, %v1856_v53  ;;  %v60_v54 = vld [vmem:[%s3182_s0 + $0x160] sm:$0xff] }
 0x140   :  { %v1074_v57 = vpop.f32.mrf.mxu2  ;;  %v1484_v58 = vpop.f32.mrf.mxu3 }
 0x141   :  { %1736 = vst.msk [vmem:[%s3184_s3 + $0xb0] sm:$0xff] %vm1713_vm2, %v1686_v56  ;;  %v1175_v59 = vmax.f32 %v765_v55, %v1074_v57  ;;  %v1861_v55 = vld [vmem:[%s3182_s0 + $0x2e8] sm:$0xff] }
 0x143   :  { %v1585_v62 = vmax.f32 %v1175_v59, %v1484_v58 }
 0x144   :  { %v306_v63 = vpop.f32.mrf.mxu0  ;;  %v667_v0 = vpop.f32.mrf.mxu1 }
 0x145   :  { %v1638_v3 = vadd.f32 %v2417_v12, %v1585_v62  ;;  %2006 = vmatmul.msk.f32.gmra.mxu2 %vm65_vm1, %v1956_v60  ;;  %v766_v4 = vmax.f32 %v306_v63, %v667_v0  ;;  %2105 = vmatmul.msk.f32.gmra.mxu3 %vm65_vm1, %v2055_v61  ;;  %v2060_v62 = vld [vmem:[%s3182_s0 + $0x600] sm:$0xff] }
 0x147   :  { %v1687_v5 = vmax.f32 %v1638_v3, 0.0  ;;  %1808 = vmatmul.msk.f32.gmra.mxu0 %vm65_vm1, %v56_v1  ;;  %1907 = vmatmul.msk.f32.gmra.mxu1 %vm65_vm1, %v1857_v2  ;;  %v61_v2 = vld [vmem:[%s3182_s0 + $0x168] sm:$0xff]  ;;  %v1862_v3 = vld [vmem:[%s3182_s0 + $0x2f0] sm:$0xff] }
 0x148   :  { %v1077_v6 = vpop.f32.mrf.mxu2  ;;  %v1487_v7 = vpop.f32.mrf.mxu3 }
 0x149   :  { %1737 = vst.msk [vmem:[%s3184_s3 + $0xb8] sm:$0xff] %vm1713_vm2, %v1687_v5  ;;  %v1176_v8 = vmax.f32 %v766_v4, %v1077_v6  ;;  %v3022_v4 = vld [vmem:[%s3183_s2] ss:$0 sm:$0xff] }
 0x14b   :  { %v1586_v11 = vmax.f32 %v1176_v8, %v1487_v7 }
 0x14c   :  { %v309_v13 = vpop.f32.mrf.mxu0  ;;  %v670_v14 = vpop.f32.mrf.mxu1 }
 0x14d   :  { %v1639_v17 = vadd.f32 %v2417_v12, %v1586_v11  ;;  %2007 = vmatmul.msk.f32.gmra.mxu2 %vm65_vm1, %v1957_v9  ;;  %v767_v18 = vmax.f32 %v309_v13, %v670_v14  ;;  %2106 = vmatmul.msk.f32.gmra.mxu3 %vm65_vm1, %v2056_v10  ;;  %v1962_v11 = vld [vmem:[%s3182_s0 + $0x480] sm:$0xff]  ;;  %v2061_v13 = vld [vmem:[%s3182_s0 + $0x608] sm:$0xff] }
 0x14f   :  { %v1688_v19 = vmax.f32 %v1639_v17, 0.0  ;;  %1809 = vmatmul.msk.f32.gmra.mxu0 %vm65_vm1, %v57_v15  ;;  %1908 = vmatmul.msk.f32.gmra.mxu1 %vm65_vm1, %v1858_v16  ;;  %v62_v17 = vld [vmem:[%s3182_s0 + $0x170] sm:$0xff] }
 0x150   :  { %v1080_v20 = vpop.f32.mrf.mxu2  ;;  %v1490_v21 = vpop.f32.mrf.mxu3 }
 0x151   :  { %1738 = vst.msk [vmem:[%s3184_s3 + $0xc0] sm:$0xff] %vm1713_vm2, %v1688_v19  ;;  %v1177_v22 = vmax.f32 %v767_v18, %v1080_v20  ;;  %v1863_v18 = vld [vmem:[%s3182_s0 + $0x2f8] sm:$0xff] }
 0x153   :  { %v1587_v25 = vmax.f32 %v1177_v22, %v1490_v21 }
 0x154   :  { %v312_v26 = vpop.f32.mrf.mxu0  ;;  %v673_v27 = vpop.f32.mrf.mxu1 }
 0x155   :  { %v1640_v30 = vadd.f32 %v2417_v12, %v1587_v25  ;;  %2008 = vmatmul.msk.f32.gmra.mxu2 %vm65_vm1, %v1958_v23  ;;  %v768_v31 = vmax.f32 %v312_v26, %v673_v27  ;;  %2107 = vmatmul.msk.f32.gmra.mxu3 %vm65_vm1, %v2057_v24  ;;  %v1963_v25 = vld [vmem:[%s3182_s0 + $0x488] sm:$0xff]  ;;  %v2062_v26 = vld [vmem:[%s3182_s0 + $0x610] sm:$0xff] }
 0x157   :  { %v1689_v32 = vmax.f32 %v1640_v30, 0.0  ;;  %1810 = vmatmul.msk.f32.gmra.mxu0 %vm65_vm1, %v58_v28  ;;  %1909 = vmatmul.msk.f32.gmra.mxu1 %vm65_vm1, %v1859_v29  ;;  %v63_v30 = vld [vmem:[%s3182_s0 + $0x178] sm:$0xff] }
 0x158   :  { %v1083_v33 = vpop.f32.mrf.mxu2  ;;  %v1493_v34 = vpop.f32.mrf.mxu3 }
 0x159   :  { %1739 = vst.msk [vmem:[%s3184_s3 + $0xc8] sm:$0xff] %vm1713_vm2, %v1689_v32  ;;  %v1178_v35 = vmax.f32 %v768_v31, %v1083_v33  ;;  %v1864_v31 = vld [vmem:[%s3182_s0 + $0x300] sm:$0xff] }
 0x15b   :  { %v1588_v38 = vmax.f32 %v1178_v35, %v1493_v34 }
 0x15c   :  { %v315_v39 = vpop.f32.mrf.mxu0  ;;  %v676_v40 = vpop.f32.mrf.mxu1 }
 0x15d   :  { %v1641_v43 = vadd.f32 %v2417_v12, %v1588_v38  ;;  %2009 = vmatmul.msk.f32.gmra.mxu2 %vm65_vm1, %v1959_v36  ;;  %v769_v44 = vmax.f32 %v315_v39, %v676_v40  ;;  %2108 = vmatmul.msk.f32.gmra.mxu3 %vm65_vm1, %v2058_v37  ;;  %v1964_v38 = vld [vmem:[%s3182_s0 + $0x490] sm:$0xff]  ;;  %v2063_v39 = vld [vmem:[%s3182_s0 + $0x618] sm:$0xff] }
 0x15f   :  { %v1690_v45 = vmax.f32 %v1641_v43, 0.0  ;;  %1811 = vmatmul.msk.f32.gmra.mxu0 %vm65_vm1, %v59_v41  ;;  %1910 = vmatmul.msk.f32.gmra.mxu1 %vm65_vm1, %v1860_v42  ;;  %v64_v43 = vld [vmem:[%s3182_s0 + $0x180] sm:$0xff] }
 0x160   :  { %v1086_v46 = vpop.f32.mrf.mxu2  ;;  %v1496_v47 = vpop.f32.mrf.mxu3 }
 0x161   :  { %1740 = vst.msk [vmem:[%s3184_s3 + $0xd0] sm:$0xff] %vm1713_vm2, %v1690_v45  ;;  %v1179_v48 = vmax.f32 %v769_v44, %v1086_v46  ;;  %v1865_v44 = vld [vmem:[%s3182_s0 + $0x308] sm:$0xff] }
 0x163   :  { %v1589_v51 = vmax.f32 %v1179_v48, %v1496_v47 }
 0x164   :  { %v318_v52 = vpop.f32.mrf.mxu0  ;;  %v679_v53 = vpop.f32.mrf.mxu1 }
 0x165   :  { %v1642_v56 = vadd.f32 %v2417_v12, %v1589_v51  ;;  %2010 = vmatmul.msk.f32.gmra.mxu2 %vm65_vm1, %v1960_v49  ;;  %v770_v57 = vmax.f32 %v318_v52, %v679_v53  ;;  %2109 = vmatmul.msk.f32.gmra.mxu3 %vm65_vm1, %v2059_v50  ;;  %v1961_v12 = vld [vmem:[%s3182_s0 + $0x478] sm:$0xff] }
 0x167   :  { %v1691_v58 = vmax.f32 %v1642_v56, 0.0  ;;  %1812 = vmatmul.msk.f32.gmra.mxu0 %vm65_vm1, %v60_v54  ;;  %1911 = vmatmul.msk.f32.gmra.mxu1 %vm65_vm1, %v1861_v55 }
 0x168   :  { %v1089_v59 = vpop.f32.mrf.mxu2  ;;  %v1499_v60 = vpop.f32.mrf.mxu3 }
 0x169   :  { %1741 = vst.msk [vmem:[%s3184_s3 + $0xd8] sm:$0xff] %vm1713_vm2, %v1691_v58  ;;  %v1180_v61 = vmax.f32 %v770_v57, %v1089_v59 }
 0x16b   :  { %v1590_v63 = vmax.f32 %v1180_v61, %v1499_v60 }
 0x16c   :  { %v321_v0 = vpop.f32.mrf.mxu0  ;;  %v682_v1 = vpop.f32.mrf.mxu1 }
 0x16d   :  { %v1643_v5 = vadd.f32 %v3022_v4, %v1590_v63  ;;  %2011 = vmatmul.msk.f32.gmra.mxu2 %vm65_vm1, %v1961_v12  ;;  %v771_v6 = vmax.f32 %v321_v0, %v682_v1  ;;  %2110 = vmatmul.msk.f32.gmra.mxu3 %vm65_vm1, %v2060_v62 }
 0x16f   :  { %v1692_v7 = vmax.f32 %v1643_v5, 0.0  ;;  %1813 = vmatmul.msk.f32.gmra.mxu0 %vm65_vm1, %v61_v2  ;;  %1912 = vmatmul.msk.f32.gmra.mxu1 %vm65_vm1, %v1862_v3 }
 0x170   :  { %v1092_v8 = vpop.f32.mrf.mxu2  ;;  %v1502_v9 = vpop.f32.mrf.mxu3 }
 0x171   :  { %1742 = vst.msk [vmem:[%s3184_s3 + $0xe0] sm:$0xff] %vm1713_vm2, %v1692_v7  ;;  %v1181_v10 = vmax.f32 %v771_v6, %v1092_v8 }
 0x173   :  { %v1591_v14 = vmax.f32 %v1181_v10, %v1502_v9 }
 0x174   :  { %v324_v15 = vpop.f32.mrf.mxu0  ;;  %v685_v16 = vpop.f32.mrf.mxu1 }
 0x175   :  { %v1644_v19 = vadd.f32 %v3022_v4, %v1591_v14  ;;  %2012 = vmatmul.msk.f32.gmra.mxu2 %vm65_vm1, %v1962_v11  ;;  %v772_v20 = vmax.f32 %v324_v15, %v685_v16  ;;  %2111 = vmatmul.msk.f32.gmra.mxu3 %vm65_vm1, %v2061_v13 }
 0x177   :  { %v1693_v21 = vmax.f32 %v1644_v19, 0.0  ;;  %1814 = vmatmul.msk.f32.gmra.mxu0 %vm65_vm1, %v62_v17  ;;  %1913 = vmatmul.msk.f32.gmra.mxu1 %vm65_vm1, %v1863_v18 }
 0x178   :  { %v1095_v22 = vpop.f32.mrf.mxu2  ;;  %v1505_v23 = vpop.f32.mrf.mxu3 }
 0x179   :  { %1743 = vst.msk [vmem:[%s3184_s3 + $0xe8] sm:$0xff] %vm1713_vm2, %v1693_v21  ;;  %v1182_v24 = vmax.f32 %v772_v20, %v1095_v22 }
 0x17b   :  { %v1592_v27 = vmax.f32 %v1182_v24, %v1505_v23 }
 0x17c   :  { %v327_v28 = vpop.f32.mrf.mxu0  ;;  %v688_v29 = vpop.f32.mrf.mxu1 }
 0x17d   :  { %v1645_v32 = vadd.f32 %v3022_v4, %v1592_v27  ;;  %2013 = vmatmul.msk.f32.gmra.mxu2 %vm65_vm1, %v1963_v25  ;;  %v773_v33 = vmax.f32 %v327_v28, %v688_v29  ;;  %2112 = vmatmul.msk.f32.gmra.mxu3 %vm65_vm1, %v2062_v26 }
 0x17f   :  { %v1694_v34 = vmax.f32 %v1645_v32, 0.0  ;;  %1815 = vmatmul.msk.f32.gmra.mxu0 %vm65_vm1, %v63_v30  ;;  %1914 = vmatmul.msk.f32.gmra.mxu1 %vm65_vm1, %v1864_v31 }
 0x180   :  { %v1098_v35 = vpop.f32.mrf.mxu2  ;;  %v1508_v36 = vpop.f32.mrf.mxu3 }
 0x181   :  { %1744 = vst.msk [vmem:[%s3184_s3 + $0xf0] sm:$0xff] %vm1713_vm2, %v1694_v34  ;;  %v1183_v37 = vmax.f32 %v773_v33, %v1098_v35 }
 0x183   :  { %v1593_v40 = vmax.f32 %v1183_v37, %v1508_v36 }
 0x184   :  { %v330_v41 = vpop.f32.mrf.mxu0  ;;  %v691_v42 = vpop.f32.mrf.mxu1 }
 0x185   :  { %v1646_v45 = vadd.f32 %v3022_v4, %v1593_v40  ;;  %2014 = vmatmul.msk.f32.gmra.mxu2 %vm65_vm1, %v1964_v38  ;;  %v774_v46 = vmax.f32 %v330_v41, %v691_v42  ;;  %2113 = vmatmul.msk.f32.gmra.mxu3 %vm65_vm1, %v2063_v39 }
 0x187   :  { %v1695_v47 = vmax.f32 %v1646_v45, 0.0  ;;  %1816 = vmatmul.msk.f32.gmra.mxu0 %vm65_vm1, %v64_v43  ;;  %1915 = vmatmul.msk.f32.gmra.mxu1 %vm65_vm1, %v1865_v44 }
 0x188   :  { %v1101_v48 = vpop.f32.mrf.mxu2  ;;  %v1511_v49 = vpop.f32.mrf.mxu3 }
 0x189   :  { %1745 = vst.msk [vmem:[%s3184_s3 + $0xf8] sm:$0xff] %vm1713_vm2, %v1695_v47  ;;  %v1184_v50 = vmax.f32 %v774_v46, %v1101_v48 }
 0x18b   :  { %v1594_v51 = vmax.f32 %v1184_v50, %v1511_v49 }
 0x18c   :  { %v333_v52 = vpop.f32.mrf.mxu0  ;;  %v694_v53 = vpop.f32.mrf.mxu1 }
 0x18d   :  { %v1647_v54 = vadd.f32 %v3022_v4, %v1594_v51  ;;  %v775_v55 = vmax.f32 %v333_v52, %v694_v53 }
 0x18f   :  { %v1696_v56 = vmax.f32 %v1647_v54, 0.0 }
 0x190   :  { %v1104_v57 = vpop.f32.mrf.mxu2  ;;  %v1514_v58 = vpop.f32.mrf.mxu3 }
 0x191   :  { %1746 = vst.msk [vmem:[%s3184_s3 + $0x100] sm:$0xff] %vm1713_vm2, %v1696_v56  ;;  %v1185_v59 = vmax.f32 %v775_v55, %v1104_v57 }
 0x193   :  { %v1595_v60 = vmax.f32 %v1185_v59, %v1514_v58 }
 0x194   :  { %v336_v61 = vpop.f32.mrf.mxu0  ;;  %v697_v12 = vpop.f32.mrf.mxu1 }
 0x195   :  { %v1648_v62 = vadd.f32 %v3022_v4, %v1595_v60  ;;  %v776_v63 = vmax.f32 %v336_v61, %v697_v12 }
 0x197   :  { %v1697_v0 = vmax.f32 %v1648_v62, 0.0 }
 0x198   :  { %v1107_v1 = vpop.f32.mrf.mxu2  ;;  %v1517_v2 = vpop.f32.mrf.mxu3 }
 0x199   :  { %1747 = vst.msk [vmem:[%s3184_s3 + $0x108] sm:$0xff] %vm1713_vm2, %v1697_v0  ;;  %v1186_v3 = vmax.f32 %v776_v63, %v1107_v1 }
 0x19b   :  { %v1596_v5 = vmax.f32 %v1186_v3, %v1517_v2 }
 0x19c   :  { %v339_v6 = vpop.f32.mrf.mxu0  ;;  %v700_v7 = vpop.f32.mrf.mxu1 }
 0x19d   :  { %v1649_v8 = vadd.f32 %v3022_v4, %v1596_v5  ;;  %v777_v9 = vmax.f32 %v339_v6, %v700_v7 }
 0x19f   :  { %v1698_v10 = vmax.f32 %v1649_v8, 0.0 }
 0x1a0   :  { %v1110_v11 = vpop.f32.mrf.mxu2  ;;  %v1520_v13 = vpop.f32.mrf.mxu3 }
 0x1a1   :  { %1748 = vst.msk [vmem:[%s3184_s3 + $0x110] sm:$0xff] %vm1713_vm2, %v1698_v10  ;;  %v1187_v14 = vmax.f32 %v777_v9, %v1110_v11 }
 0x1a3   :  { %v1597_v15 = vmax.f32 %v1187_v14, %v1520_v13 }
 0x1a4   :  { %v342_v16 = vpop.f32.mrf.mxu0  ;;  %v703_v17 = vpop.f32.mrf.mxu1 }
 0x1a5   :  { %v1650_v18 = vadd.f32 %v3022_v4, %v1597_v15  ;;  %v778_v19 = vmax.f32 %v342_v16, %v703_v17 }
 0x1a7   :  { %v1699_v20 = vmax.f32 %v1650_v18, 0.0 }
 0x1a8   :  { %v1113_v21 = vpop.f32.mrf.mxu2  ;;  %v1523_v22 = vpop.f32.mrf.mxu3 }
 0x1a9   :  { %1749 = vst.msk [vmem:[%s3184_s3 + $0x118] sm:$0xff] %vm1713_vm2, %v1699_v20  ;;  %v1188_v23 = vmax.f32 %v778_v19, %v1113_v21 }
 0x1ab   :  { %v1598_v24 = vmax.f32 %v1188_v23, %v1523_v22 }
 0x1ac   :  { %v345_v25 = vpop.f32.mrf.mxu0  ;;  %v706_v26 = vpop.f32.mrf.mxu1 }
 0x1ad   :  { %v1651_v27 = vadd.f32 %v3022_v4, %v1598_v24  ;;  %v779_v28 = vmax.f32 %v345_v25, %v706_v26 }
 0x1af   :  { %v1700_v29 = vmax.f32 %v1651_v27, 0.0 }
 0x1b0   :  { %v1116_v30 = vpop.f32.mrf.mxu2  ;;  %v1526_v31 = vpop.f32.mrf.mxu3 }
 0x1b1   :  { %1750 = vst.msk [vmem:[%s3184_s3 + $0x120] sm:$0xff] %vm1713_vm2, %v1700_v29  ;;  %v1189_v32 = vmax.f32 %v779_v28, %v1116_v30 }
 0x1b3   :  { %v1599_v33 = vmax.f32 %v1189_v32, %v1526_v31 }
 0x1b4   :  { %v348_v34 = vpop.f32.mrf.mxu0  ;;  %v709_v35 = vpop.f32.mrf.mxu1 }
 0x1b5   :  { %v1652_v36 = vadd.f32 %v3022_v4, %v1599_v33  ;;  %v780_v37 = vmax.f32 %v348_v34, %v709_v35 }
 0x1b7   :  { %v1701_v38 = vmax.f32 %v1652_v36, 0.0 }
 0x1b8   :  { %v1119_v39 = vpop.f32.mrf.mxu2  ;;  %v1529_v40 = vpop.f32.mrf.mxu3 }
 0x1b9   :  { %1751 = vst.msk [vmem:[%s3184_s3 + $0x128] sm:$0xff] %vm1713_vm2, %v1701_v38  ;;  %v1190_v41 = vmax.f32 %v780_v37, %v1119_v39 }
 0x1bb   :  { %v1600_v42 = vmax.f32 %v1190_v41, %v1529_v40 }
 0x1bc   :  { %v351_v43 = vpop.f32.mrf.mxu0  ;;  %v712_v44 = vpop.f32.mrf.mxu1 }
 0x1bd   :  { %v1653_v45 = vadd.f32 %v3022_v4, %v1600_v42  ;;  %v781_v46 = vmax.f32 %v351_v43, %v712_v44 }
 0x1bf   :  { %v1702_v47 = vmax.f32 %v1653_v45, 0.0 }
 0x1c0   :  { %v1122_v48 = vpop.f32.mrf.mxu2  ;;  %v1532_v49 = vpop.f32.mrf.mxu3 }
 0x1c1   :  { %1752 = vst.msk [vmem:[%s3184_s3 + $0x130] sm:$0xff] %vm1713_vm2, %v1702_v47  ;;  %v1191_v50 = vmax.f32 %v781_v46, %v1122_v48 }
 0x1c3   :  { %v1601_v51 = vmax.f32 %v1191_v50, %v1532_v49 }
 0x1c4   :  { %v354_v52 = vpop.f32.mrf.mxu0  ;;  %v715_v53 = vpop.f32.mrf.mxu1 }
 0x1c5   :  { %v1654_v54 = vadd.f32 %v3022_v4, %v1601_v51  ;;  %v782_v55 = vmax.f32 %v354_v52, %v715_v53 }
 0x1c7   :  { %v1703_v56 = vmax.f32 %v1654_v54, 0.0 }
 0x1c8   :  { %v1125_v57 = vpop.f32.mrf.mxu2  ;;  %v1535_v58 = vpop.f32.mrf.mxu3 }
 0x1c9   :  { %1753 = vst.msk [vmem:[%s3184_s3 + $0x138] sm:$0xff] %vm1713_vm2, %v1703_v56  ;;  %v1192_v59 = vmax.f32 %v782_v55, %v1125_v57 }
 0x1cb   :  { %v1602_v60 = vmax.f32 %v1192_v59, %v1535_v58 }
 0x1cc   :  { %v357_v61 = vpop.f32.mrf.mxu0  ;;  %v718_v12 = vpop.f32.mrf.mxu1 }
 0x1cd   :  { %v1655_v62 = vadd.f32 %v3022_v4, %v1602_v60  ;;  %v783_v63 = vmax.f32 %v357_v61, %v718_v12 }
 0x1cf   :  { %v1704_v0 = vmax.f32 %v1655_v62, 0.0 }
 0x1d0   :  { %v1128_v1 = vpop.f32.mrf.mxu2  ;;  %v1538_v2 = vpop.f32.mrf.mxu3 }
 0x1d1   :  { %1754 = vst.msk [vmem:[%s3184_s3 + $0x140] sm:$0xff] %vm1713_vm2, %v1704_v0  ;;  %v1193_v3 = vmax.f32 %v783_v63, %v1128_v1 }
 0x1d3   :  { %v1603_v5 = vmax.f32 %v1193_v3, %v1538_v2 }
 0x1d4   :  { %v360_v6 = vpop.f32.mrf.mxu0  ;;  %v721_v7 = vpop.f32.mrf.mxu1 }
 0x1d5   :  { %v1656_v8 = vadd.f32 %v3022_v4, %v1603_v5  ;;  %v784_v9 = vmax.f32 %v360_v6, %v721_v7 }
 0x1d7   :  { %v1705_v10 = vmax.f32 %v1656_v8, 0.0 }
 0x1d8   :  { %v1131_v11 = vpop.f32.mrf.mxu2  ;;  %v1541_v13 = vpop.f32.mrf.mxu3 }
 0x1d9   :  { %1755 = vst.msk [vmem:[%s3184_s3 + $0x148] sm:$0xff] %vm1713_vm2, %v1705_v10  ;;  %v1194_v14 = vmax.f32 %v784_v9, %v1131_v11 }
 0x1db   :  { %v1604_v15 = vmax.f32 %v1194_v14, %v1541_v13 }
 0x1dc   :  { %v363_v16 = vpop.f32.mrf.mxu0  ;;  %v724_v17 = vpop.f32.mrf.mxu1 }
 0x1dd   :  { %v1657_v18 = vadd.f32 %v3022_v4, %v1604_v15  ;;  %v785_v19 = vmax.f32 %v363_v16, %v724_v17 }
 0x1df   :  { %v1706_v20 = vmax.f32 %v1657_v18, 0.0 }
 0x1e0   :  { %v1134_v21 = vpop.f32.mrf.mxu2  ;;  %v1544_v22 = vpop.f32.mrf.mxu3 }
 0x1e1   :  { %1756 = vst.msk [vmem:[%s3184_s3 + $0x150] sm:$0xff] %vm1713_vm2, %v1706_v20  ;;  %v1195_v23 = vmax.f32 %v785_v19, %v1134_v21 }
 0x1e3   :  { %v1605_v24 = vmax.f32 %v1195_v23, %v1544_v22 }
 0x1e4   :  { %v366_v25 = vpop.f32.mrf.mxu0  ;;  %v727_v26 = vpop.f32.mrf.mxu1 }
 0x1e5   :  { %v1658_v27 = vadd.f32 %v3022_v4, %v1605_v24  ;;  %v786_v28 = vmax.f32 %v366_v25, %v727_v26 }
 0x1e7   :  { %v1707_v29 = vmax.f32 %v1658_v27, 0.0 }
 0x1e8   :  { %v1137_v30 = vpop.f32.mrf.mxu2  ;;  %v1547_v31 = vpop.f32.mrf.mxu3 }
 0x1e9   :  { %1757 = vst.msk [vmem:[%s3184_s3 + $0x158] sm:$0xff] %vm1713_vm2, %v1707_v29  ;;  %v1196_v32 = vmax.f32 %v786_v28, %v1137_v30 }
 0x1eb   :  { %v1606_v33 = vmax.f32 %v1196_v32, %v1547_v31 }
 0x1ec   :  { %v369_v34 = vpop.f32.mrf.mxu0  ;;  %v730_v35 = vpop.f32.mrf.mxu1 }
 0x1ed   :  { %v1659_v36 = vadd.f32 %v3022_v4, %v1606_v33  ;;  %v787_v37 = vmax.f32 %v369_v34, %v730_v35 }
 0x1ef   :  { %v1708_v38 = vmax.f32 %v1659_v36, 0.0 }
 0x1f0   :  { %v1140_v39 = vpop.f32.mrf.mxu2  ;;  %v1550_v40 = vpop.f32.mrf.mxu3 }
 0x1f1   :  { %1758 = vst.msk [vmem:[%s3184_s3 + $0x160] sm:$0xff] %vm1713_vm2, %v1708_v38  ;;  %v1197_v41 = vmax.f32 %v787_v37, %v1140_v39 }
 0x1f3   :  { %v1607_v42 = vmax.f32 %v1197_v41, %v1550_v40 }
 0x1f4   :  { %v372_v43 = vpop.f32.mrf.mxu0  ;;  %v733_v44 = vpop.f32.mrf.mxu1 }
 0x1f5   :  { %v1660_v45 = vadd.f32 %v3022_v4, %v1607_v42  ;;  %v788_v46 = vmax.f32 %v372_v43, %v733_v44 }
 0x1f7   :  { %v1709_v47 = vmax.f32 %v1660_v45, 0.0 }
 0x1f8   :  { %v1143_v48 = vpop.f32.mrf.mxu2  ;;  %v1553_v49 = vpop.f32.mrf.mxu3 }
 0x1f9   :  { %1759 = vst.msk [vmem:[%s3184_s3 + $0x168] sm:$0xff] %vm1713_vm2, %v1709_v47  ;;  %v1198_v50 = vmax.f32 %v788_v46, %v1143_v48 }
 0x1fb   :  { %v1608_v51 = vmax.f32 %v1198_v50, %v1553_v49 }
 0x1fc   :  { %v375_v52 = vpop.f32.mrf.mxu0  ;;  %v736_v53 = vpop.f32.mrf.mxu1 }
 0x1fd   :  { %v1661_v54 = vadd.f32 %v3022_v4, %v1608_v51  ;;  %v789_v55 = vmax.f32 %v375_v52, %v736_v53 }
 0x1ff   :  { %v1710_v56 = vmax.f32 %v1661_v54, 0.0 }
 0x200   :  { %v1146_v57 = vpop.f32.mrf.mxu2  ;;  %v1556_v58 = vpop.f32.mrf.mxu3 }
 0x201   :  { %1760 = vst.msk [vmem:[%s3184_s3 + $0x170] sm:$0xff] %vm1713_vm2, %v1710_v56  ;;  %v1199_v59 = vmax.f32 %v789_v55, %v1146_v57 }
 0x203   :  { %v1609_v60 = vmax.f32 %v1199_v59, %v1556_v58 }
 0x204   :  { %v378_v61 = vpop.f32.mrf.mxu0  ;;  %v739_v12 = vpop.f32.mrf.mxu1 }
 0x205   :  { %v1662_v62 = vadd.f32 %v3022_v4, %v1609_v60  ;;  %v790_v63 = vmax.f32 %v378_v61, %v739_v12 }
 0x207   :  { %v1711_v0 = vmax.f32 %v1662_v62, 0.0 }
 0x208   :  { %v1149_v1 = vpop.f32.mrf.mxu2  ;;  %v1559_v2 = vpop.f32.mrf.mxu3 }
 0x209   :  { %1761 = vst.msk [vmem:[%s3184_s3 + $0x178] sm:$0xff] %vm1713_vm2, %v1711_v0  ;;  %v1200_v3 = vmax.f32 %v790_v63, %v1149_v1 }
 0x20b   :  { %v1610_v5 = vmax.f32 %v1200_v3, %v1559_v2 }
 0x20d   :  { %v1663_v6 = vadd.f32 %v3022_v4, %v1610_v5 }
 0x20f   :  { %v1712_v7 = vmax.f32 %v1663_v6, 0.0 }
 0x211   :  { %1762 = vst.msk [vmem:[%s3184_s3 + $0x180] sm:$0xff] %vm1713_vm2, %v1712_v7 }

// kernel: emnist_net_forward.4
= control target key start
LH: loop header
LB: loop body
LE: loop exit
PB: predicated region body
PF: predicated region fallthrough
CT: control target
= control target key end

     0   :  { %vm58_vm0 = vcmask 130048   ;;  %vm813_vm1 = vcmask 261120   ;;  %vm826_vm2 = vcmask 254976   ;;  %s1731_s1 = inlined_call_operand.vmem [shape: f32[144,32], index: 1, kind: input, shape index: {}]   ;;  %s1732_s0 = inlined_call_operand.vmem [shape: f32[4,98,144], index: 0, kind: input, shape index: {}]   ;;  %s1733_s2 = inlined_call_operand.vmem [shape: f32[1,32], index: 2, kind: input, shape index: {}]   ;;  %s1734_s3 = inlined_call_operand.vmem [shape: f32[98,32], index: 3, kind: output, shape index: {}]  }
   0x1   :  { %v1004_v0 = vld [vmem:[%s1731_s1 + $0x78] sm:$0xff]  ;;  %v1009_v1 = vld [vmem:[%s1731_s1 + $0x88] sm:$0xff]  ;;  %v1014_v2 = vld [vmem:[%s1731_s1 + $0x70] sm:$0xff] }
   0x2   :  { %98 = vmatpush.msra.mxu0 %v1004_v0  ;;  %276 = vmatpush.msra.mxu2 %v1004_v0  ;;  %v1021_v3 = vld [vmem:[%s1731_s1 + $0x80] sm:$0xff]  ;;  %v846_v4 = vld [vmem:[%s1732_s0 + $0xd8] sm:$0xff]  ;;  %v1030_v5 = vld [vmem:[%s1731_s1 + $0x68] sm:$0xff] }
   0x3   :  { %346 = vmatpush.msra.mxu3 %v1009_v1  ;;  %168 = vmatpush.msra.mxu1 %v1009_v1  ;;  %v33_v6 = vld [vmem:[%s1732_s0 + $0x8] sm:$0xff]  ;;  %v1042_v7 = vld [vmem:[%s1731_s1 + $0x60] sm:$0xff]  ;;  %v1051_v8 = vld [vmem:[%s1731_s1 + $0x58] sm:$0xff] }
   0x4   :  { %99 = vmatpush.msra.mxu0 %v1014_v2  ;;  %277 = vmatpush.msra.mxu2 %v1014_v2  ;;  %v1060_v9 = vld [vmem:[%s1731_s1 + $0x50] sm:$0xff]  ;;  %v848_v10 = vld [vmem:[%s1732_s0 + $0xe8] sm:$0xff]  ;;  %v35_v12 = vld [vmem:[%s1732_s0 + $0x18] sm:$0xff] }
   0x5   :  { %347 = vmatpush.msra.mxu3 %v1021_v3  ;;  %169 = vmatpush.msra.mxu1 %v1021_v3  ;;  %v1072_v11 = vld [vmem:[%s1731_s1 + $0x48] sm:$0xff]  ;;  %v1084_v13 = vld [vmem:[%s1731_s1 + $0x40] sm:$0xff]  ;;  %v1093_v14 = vld [vmem:[%s1731_s1 + $0x38] sm:$0xff] }
   0x6   :  { %871 = vmatmul.msk.f32.vlgmr.msra.gmra.mxu3 %vm58_vm0, %v846_v4  ;;  %100 = vmatpush.msra.mxu0 %v1030_v5  ;;  %v1102_v15 = vld [vmem:[%s1731_s1 + $0x30] sm:$0xff]  ;;  %v850_v16 = vld [vmem:[%s1732_s0 + $0xf8] sm:$0xff]  ;;  %v1114_v17 = vld [vmem:[%s1731_s1 + $0x28] sm:$0xff] }
   0x7   :  { %278 = vmatpush.msra.mxu2 %v1030_v5  ;;  %832 = vmatmul.msk.f32.vlgmr.msra.gmra.mxu1 %vm58_vm0, %v33_v6  ;;  %v37_v18 = vld [vmem:[%s1732_s0 + $0x28] sm:$0xff]  ;;  %v1125_v19 = vld [vmem:[%s1731_s1 + $0x20] sm:$0xff]  ;;  %v1133_v20 = vld [vmem:[%s1731_s1 + $0x18] sm:$0xff] }
   0x8   :  { %101 = vmatpush.msra.mxu0 %v1042_v7  ;;  %537 = vmatpush.msrb.mxu3 %v1009_v1  ;;  %v1142_v21 = vld [vmem:[%s1731_s1 + $0x10] sm:$0xff]  ;;  %v852_v22 = vld [vmem:[%s1732_s0 + $0x108] sm:$0xff]  ;;  %v39_v24 = vld [vmem:[%s1732_s0 + $0x38] sm:$0xff] }
   0x9   :  { %279 = vmatpush.msra.mxu2 %v1042_v7  ;;  %467 = vmatpush.msrb.mxu1 %v1004_v0  ;;  %v1153_v23 = vld [vmem:[%s1731_s1 + $0x8] sm:$0xff]  ;;  %v1164_v25 = vld [vmem:[%s1731_s1] sm:$0xff]  ;;  %v845_v27 = vld [vmem:[%s1732_s0 + $0xd0] sm:$0xff] }
   0xa   :  { %102 = vmatpush.msra.mxu0 %v1051_v8  ;;  %538 = vmatpush.msrb.mxu3 %v1021_v3  ;;  %v32_v26 = vld [vmem:[%s1732_s0] sm:$0xff]  ;;  %v854_v28 = vld [vmem:[%s1732_s0 + $0x118] sm:$0xff]  ;;  %v41_v29 = vld [vmem:[%s1732_s0 + $0x48] sm:$0xff] }
   0xb   :  { %280 = vmatpush.msra.mxu2 %v1051_v8  ;;  %468 = vmatpush.msrb.mxu1 %v1014_v2  ;;  %v34_v30 = vld [vmem:[%s1732_s0 + $0x10] sm:$0xff]  ;;  %v847_v31 = vld [vmem:[%s1732_s0 + $0xe0] sm:$0xff]  ;;  %v856_v32 = vld [vmem:[%s1732_s0 + $0x128] sm:$0xff] }
   0xc   :  { %103 = vmatpush.msra.mxu0 %v1060_v9  ;;  %978 = vmatpush.msra.mxu3 %v1009_v1  ;;  %v43_v33 = vld [vmem:[%s1732_s0 + $0x58] sm:$0xff]  ;;  %v36_v34 = vld [vmem:[%s1732_s0 + $0x20] sm:$0xff]  ;;  %v849_v35 = vld [vmem:[%s1732_s0 + $0xf0] sm:$0xff] }
   0xd   :  { %281 = vmatpush.msra.mxu2 %v1060_v9  ;;  %469 = vmatpush.msrb.mxu1 %v1030_v5  ;;  %v858_v36 = vld [vmem:[%s1732_s0 + $0x138] sm:$0xff]  ;;  %v45_v37 = vld [vmem:[%s1732_s0 + $0x68] sm:$0xff]  ;;  %v38_v38 = vld [vmem:[%s1732_s0 + $0x30] sm:$0xff] }
   0xe   :  { %872 = vmatmul.msk.f32.gmra.mxu3 %vm58_vm0, %v848_v10  ;;  %104 = vmatpush.msra.mxu0 %v1072_v11  ;;  %v851_v39 = vld [vmem:[%s1732_s0 + $0x100] sm:$0xff]  ;;  %v860_v40 = vld [vmem:[%s1732_s0 + $0x148] sm:$0xff]  ;;  %v47_v41 = vld [vmem:[%s1732_s0 + $0x78] sm:$0xff] }
   0xf   :  { %282 = vmatpush.msra.mxu2 %v1072_v11  ;;  %833 = vmatmul.msk.f32.gmra.mxu1 %vm58_vm0, %v35_v12  ;;  %v40_v42 = vld [vmem:[%s1732_s0 + $0x40] sm:$0xff]  ;;  %v853_v43 = vld [vmem:[%s1732_s0 + $0x110] sm:$0xff]  ;;  %v862_v44 = vld [vmem:[%s1732_s0 + $0x158] sm:$0xff] }
  0x10   :  { %105 = vmatpush.msra.mxu0 %v1084_v13  ;;  %470 = vmatpush.msrb.mxu1 %v1042_v7  ;;  %v49_v45 = vld [vmem:[%s1732_s0 + $0x88] sm:$0xff]  ;;  %v42_v46 = vld [vmem:[%s1732_s0 + $0x50] sm:$0xff]  ;;  %v855_v47 = vld [vmem:[%s1732_s0 + $0x120] sm:$0xff] }
  0x11   :  { %283 = vmatpush.msra.mxu2 %v1084_v13  ;;  %979 = vmatpush.msra.mxu3 %v1021_v3  ;;  %v864_v48 = vld [vmem:[%s1732_s0 + $0x168] sm:$0xff]  ;;  %v51_v49 = vld [vmem:[%s1732_s0 + $0x98] sm:$0xff]  ;;  %v44_v50 = vld [vmem:[%s1732_s0 + $0x60] sm:$0xff] }
  0x12   :  { %106 = vmatpush.msra.mxu0 %v1093_v14  ;;  %471 = vmatpush.msrb.mxu1 %v1051_v8  ;;  %v857_v51 = vld [vmem:[%s1732_s0 + $0x130] sm:$0xff]  ;;  %v866_v52 = vld [vmem:[%s1732_s0 + $0x178] sm:$0xff]  ;;  %v53_v53 = vld [vmem:[%s1732_s0 + $0xa8] sm:$0xff] }
  0x13   :  { %284 = vmatpush.msra.mxu2 %v1093_v14  ;;  %v46_v54 = vld [vmem:[%s1732_s0 + $0x70] sm:$0xff]  ;;  %v859_v55 = vld [vmem:[%s1732_s0 + $0x140] sm:$0xff]  ;;  %v868_v56 = vld [vmem:[%s1732_s0 + $0x188] sm:$0xff] }
  0x14   :  { %107 = vmatpush.msra.mxu0 %v1102_v15  ;;  %472 = vmatpush.msrb.mxu1 %v1060_v9  ;;  %v55_v57 = vld [vmem:[%s1732_s0 + $0xb8] sm:$0xff]  ;;  %v48_v58 = vld [vmem:[%s1732_s0 + $0x80] sm:$0xff]  ;;  %v861_v59 = vld [vmem:[%s1732_s0 + $0x150] sm:$0xff] }
  0x15   :  { %285 = vmatpush.msra.mxu2 %v1102_v15  ;;  %v870_v60 = vld [vmem:[%s1732_s0 + $0x198] sm:$0x3]  ;;  %v57_v61 = vld [vmem:[%s1732_s0 + $0xc8] sm:$0x3]  ;;  %v50_v62 = vld [vmem:[%s1732_s0 + $0x90] sm:$0xff] }
  0x16   :  { %873 = vmatmul.msk.f32.gmra.mxu3 %vm58_vm0, %v850_v16  ;;  %108 = vmatpush.msra.mxu0 %v1114_v17  ;;  %v863_v63 = vld [vmem:[%s1732_s0 + $0x160] sm:$0xff]  ;;  %v887_v4 = vld [vmem:[%s1732_s0 + $0x1b8] sm:$0xff]  ;;  %v54_v6 = vld [vmem:[%s1732_s0 + $0xb0] sm:$0xff] }
  0x17   :  { %286 = vmatpush.msra.mxu2 %v1114_v17  ;;  %834 = vmatmul.msk.f32.gmra.mxu1 %vm58_vm0, %v37_v18  ;;  %v56_v10 = vld [vmem:[%s1732_s0 + $0xc0] sm:$0x3]  ;;  %v891_v12 = vld [vmem:[%s1732_s0 + $0x1d8] sm:$0xff]  ;;  %v893_v18 = vld [vmem:[%s1732_s0 + $0x1e8] sm:$0xff] }
  0x18   :  { %109 = vmatpush.msra.mxu0 %v1125_v19  ;;  %473 = vmatpush.msrb.mxu1 %v1072_v11  ;;  %v924_v16 = vld [vmem:[%s1732_s0 + $0x278] sm:$0xff] }
  0x19   :  { %287 = vmatpush.msra.mxu2 %v1125_v19 }
  0x1a   :  { %110 = vmatpush.msra.mxu0 %v1133_v20  ;;  %474 = vmatpush.msrb.mxu1 %v1084_v13 }
  0x1b   :  { %288 = vmatpush.msra.mxu2 %v1133_v20 }
  0x1c   :  { %111 = vmatpush.msra.mxu0 %v1142_v21  ;;  %475 = vmatpush.msrb.mxu1 %v1093_v14 }
  0x1d   :  { %289 = vmatpush.msra.mxu2 %v1142_v21 }
  0x1e   :  { %874 = vmatmul.msk.f32.gmra.mxu3 %vm58_vm0, %v852_v22  ;;  %112 = vmatpush.msra.mxu0 %v1153_v23  ;;  %v926_v22 = vld [vmem:[%s1732_s0 + $0x288] sm:$0xff] }
  0x1f   :  { %290 = vmatpush.msra.mxu2 %v1153_v23  ;;  %835 = vmatmul.msk.f32.gmra.mxu1 %vm58_vm0, %v39_v24  ;;  %v895_v24 = vld [vmem:[%s1732_s0 + $0x1f8] sm:$0xff] }
  0x20   :  { %113 = vmatpush.msra.mxu0 %v1164_v25  ;;  %476 = vmatpush.msrb.mxu1 %v1102_v15 }
  0x21   :  { %291 = vmatpush.msra.mxu2 %v1164_v25  ;;  %114 = vmatmul.f32.vlgmr.msra.gmra.mxu0 %v32_v26  ;;  %v894_v26 = vld [vmem:[%s1732_s0 + $0x1f0] sm:$0xff] }
  0x22   :  { %292 = vmatmul.f32.vlgmr.msra.gmra.mxu2 %v845_v27  ;;  %658 = vmatpush.msrb.mxu0 %v1004_v0  ;;  %v927_v27 = vld [vmem:[%s1732_s0 + $0x290] sm:$0xff] }
  0x23   :  { %728 = vmatpush.msrb.mxu2 %v1009_v1  ;;  %477 = vmatpush.msrb.mxu1 %v1114_v17  ;;  %v884_v1 = vld [vmem:[%s1732_s0 + $0x1a0] sm:$0xff] }
  0x24   :  { %659 = vmatpush.msrb.mxu0 %v1014_v2 }
  0x25   :  { %729 = vmatpush.msrb.mxu2 %v1021_v3  ;;  %478 = vmatpush.msrb.mxu1 %v1125_v19  ;;  %v865_v3 = vld [vmem:[%s1732_s0 + $0x170] sm:$0xff] }
  0x26   :  { %875 = vmatmul.msk.f32.gmra.mxu3 %vm58_vm0, %v854_v28  ;;  %660 = vmatpush.msrb.mxu0 %v1030_v5  ;;  %v928_v28 = vld [vmem:[%s1732_s0 + $0x298] sm:$0xff] }
  0x27   :  { %836 = vmatmul.msk.f32.gmra.mxu1 %vm58_vm0, %v41_v29 }
  0x28   :  { %661 = vmatpush.msrb.mxu0 %v1042_v7  ;;  %479 = vmatpush.msrb.mxu1 %v1133_v20 }
  0x29   :  { %117 = vmatmul.f32.gmra.mxu0 %v34_v30  ;;  %v897_v30 = vld [vmem:[%s1732_s0 + $0x208] sm:$0xff] }
  0x2a   :  { %295 = vmatmul.f32.gmra.mxu2 %v847_v31  ;;  %662 = vmatpush.msrb.mxu0 %v1051_v8 }
  0x2b   :  { %480 = vmatpush.msrb.mxu1 %v1142_v21 }
  0x2c   :  { %663 = vmatpush.msrb.mxu0 %v1060_v9 }
  0x2d   :  { %481 = vmatpush.msrb.mxu1 %v1153_v23 }
  0x2e   :  { %876 = vmatmul.msk.f32.gmra.mxu3 %vm58_vm0, %v856_v32  ;;  %664 = vmatpush.msrb.mxu0 %v1072_v11  ;;  %v896_v32 = vld [vmem:[%s1732_s0 + $0x200] sm:$0xff] }
  0x2f   :  { %837 = vmatmul.msk.f32.gmra.mxu1 %vm58_vm0, %v43_v33 }
  0x30   :  { %665 = vmatpush.msrb.mxu0 %v1084_v13  ;;  %482 = vmatpush.msrb.mxu1 %v1164_v25 }
  0x31   :  { %120 = vmatmul.f32.gmra.mxu0 %v36_v34  ;;  %v929_v34 = vld [vmem:[%s1732_s0 + $0x2a0] sm:$0xff] }
  0x32   :  { %962 = vmatpush.msra.mxu1 %v1004_v0  ;;  %298 = vmatmul.f32.gmra.mxu2 %v849_v35  ;;  %v885_v0 = vld [vmem:[%s1732_s0 + $0x1a8] sm:$0xff] }
  0x33   :  { %666 = vmatpush.msrb.mxu0 %v1093_v14  ;;  %v930_v35 = vld [vmem:[%s1732_s0 + $0x2a8] sm:$0xff] }
  0x34   :  { %963 = vmatpush.msra.mxu1 %v1014_v2  ;;  %v52_v2 = vld [vmem:[%s1732_s0 + $0xa0] sm:$0xff] }
  0x35   :  { %667 = vmatpush.msrb.mxu0 %v1102_v15 }
  0x36   :  { %964 = vmatpush.msra.mxu1 %v1030_v5  ;;  %877 = vmatmul.msk.f32.gmra.mxu3 %vm58_vm0, %v858_v36  ;;  %v886_v5 = vld [vmem:[%s1732_s0 + $0x1b0] sm:$0xff] }
  0x37   :  { %668 = vmatpush.msrb.mxu0 %v1114_v17  ;;  %838 = vmatmul.msk.f32.gmra.mxu1 %vm58_vm0, %v45_v37  ;;  %v899_v37 = vld [vmem:[%s1732_s0 + $0x218] sm:$0xff] }
  0x38   :  { %965 = vmatpush.msra.mxu1 %v1042_v7  ;;  %v867_v7 = vld [vmem:[%s1732_s0 + $0x180] sm:$0xff] }
  0x39   :  { %669 = vmatpush.msrb.mxu0 %v1125_v19 }
  0x3a   :  { %123 = vmatmul.f32.gmra.mxu0 %v38_v38  ;;  %301 = vmatmul.f32.gmra.mxu2 %v851_v39  ;;  %v898_v39 = vld [vmem:[%s1732_s0 + $0x210] sm:$0xff] }
  0x3b   :  { %670 = vmatpush.msrb.mxu0 %v1133_v20  ;;  %966 = vmatpush.msra.mxu1 %v1051_v8  ;;  %v889_v8 = vld [vmem:[%s1732_s0 + $0x1c8] sm:$0xff] }
  0x3d   :  { %671 = vmatpush.msrb.mxu0 %v1142_v21  ;;  %967 = vmatpush.msra.mxu1 %v1060_v9  ;;  %v888_v9 = vld [vmem:[%s1732_s0 + $0x1c0] sm:$0xff] }
  0x3e   :  { %878 = vmatmul.msk.f32.gmra.mxu3 %vm58_vm0, %v860_v40 }
  0x3f   :  { %672 = vmatpush.msrb.mxu0 %v1153_v23  ;;  %839 = vmatmul.msk.f32.gmra.mxu1 %vm58_vm0, %v47_v41 }
  0x40   :  { %968 = vmatpush.msra.mxu1 %v1072_v11  ;;  %v869_v11 = vld [vmem:[%s1732_s0 + $0x190] sm:$0x3] }
  0x41   :  { %673 = vmatpush.msrb.mxu0 %v1164_v25 }
  0x42   :  { %126 = vmatmul.f32.gmra.mxu0 %v40_v42  ;;  %304 = vmatmul.f32.gmra.mxu2 %v853_v43 }
  0x43   :  { %969 = vmatpush.msra.mxu1 %v1084_v13 }
  0x45   :  { %970 = vmatpush.msra.mxu1 %v1093_v14  ;;  %v890_v14 = vld [vmem:[%s1732_s0 + $0x1d0] sm:$0xff] }
  0x46   :  { %879 = vmatmul.msk.f32.gmra.mxu3 %vm58_vm0, %v862_v44  ;;  %v931_v44 = vld [vmem:[%s1732_s0 + $0x2b0] sm:$0xff] }
  0x47   :  { %971 = vmatpush.msra.mxu1 %v1102_v15  ;;  %v923_v15 = vld [vmem:[%s1732_s0 + $0x270] sm:$0xff] }
  0x48   :  { %840 = vmatmul.msk.f32.gmra.mxu1 %vm58_vm0, %v49_v45 }
  0x49   :  { %972 = vmatpush.msra.mxu1 %v1114_v17 }
  0x4a   :  { %129 = vmatmul.f32.gmra.mxu0 %v42_v46  ;;  %307 = vmatmul.f32.gmra.mxu2 %v855_v47  ;;  %v932_v46 = vld [vmem:[%s1732_s0 + $0x2b8] sm:$0xff] }
  0x4b   :  { %973 = vmatpush.msra.mxu1 %v1125_v19 }
  0x4d   :  { %974 = vmatpush.msra.mxu1 %v1133_v20  ;;  %v892_v20 = vld [vmem:[%s1732_s0 + $0x1e0] sm:$0xff] }
  0x4e   :  { %880 = vmatmul.msk.f32.gmra.mxu3 %vm58_vm0, %v864_v48 }
  0x4f   :  { %975 = vmatpush.msra.mxu1 %v1142_v21  ;;  %v925_v21 = vld [vmem:[%s1732_s0 + $0x280] sm:$0xff] }
  0x50   :  { %841 = vmatmul.msk.f32.gmra.mxu1 %vm58_vm0, %v51_v49  ;;  %v901_v49 = vld [vmem:[%s1732_s0 + $0x228] sm:$0xff] }
  0x51   :  { %976 = vmatpush.msra.mxu1 %v1153_v23 }
  0x52   :  { %132 = vmatmul.f32.gmra.mxu0 %v44_v50  ;;  %310 = vmatmul.f32.gmra.mxu2 %v857_v51  ;;  %v900_v51 = vld [vmem:[%s1732_s0 + $0x220] sm:$0xff] }
  0x53   :  { %977 = vmatpush.msra.mxu1 %v1164_v25 }
  0x56   :  { %881 = vmatmul.msk.f32.gmra.mxu3 %vm58_vm0, %v866_v52 }
  0x58   :  { %842 = vmatmul.msk.f32.gmra.mxu1 %vm58_vm0, %v53_v53 }
  0x5a   :  { %135 = vmatmul.f32.gmra.mxu0 %v46_v54  ;;  %313 = vmatmul.f32.gmra.mxu2 %v859_v55  ;;  %v933_v55 = vld [vmem:[%s1732_s0 + $0x2c0] sm:$0xff] }
  0x5e   :  { %882 = vmatmul.msk.f32.gmra.mxu3 %vm58_vm0, %v868_v56 }
  0x60   :  { %843 = vmatmul.msk.f32.gmra.mxu1 %vm58_vm0, %v55_v57  ;;  %v934_v57 = vld [vmem:[%s1732_s0 + $0x2c8] sm:$0xff] }
  0x62   :  { %138 = vmatmul.f32.gmra.mxu0 %v48_v58  ;;  %316 = vmatmul.f32.gmra.mxu2 %v861_v59 }
  0x66   :  { %883 = vmatmul.msk.f32.gmra.mxu3 %vm58_vm0, %v870_v60  ;;  %v903_v60 = vld [vmem:[%s1732_s0 + $0x238] sm:$0xff] }
  0x68   :  { %844 = vmatmul.msk.f32.gmra.mxu1 %vm58_vm0, %v57_v61 }
  0x6a   :  { %141 = vmatmul.f32.gmra.mxu0 %v50_v62  ;;  %319 = vmatmul.f32.gmra.mxu2 %v863_v63  ;;  %v902_v62 = vld [vmem:[%s1732_s0 + $0x230] sm:$0xff] }
  0x6e   :  { %910 = vmatmul.msk.f32.vlgmr.msrb.gmra.mxu3 %vm58_vm0, %v885_v0 }
  0x70   :  { %483 = vmatmul.f32.vlgmr.msrb.gmra.mxu1 %v884_v1 }
  0x72   :  { %144 = vmatmul.f32.gmra.mxu0 %v52_v2  ;;  %322 = vmatmul.f32.gmra.mxu2 %v865_v3  ;;  %v935_v2 = vld [vmem:[%s1732_s0 + $0x2d0] sm:$0xff] }
  0x76   :  { %911 = vmatmul.msk.f32.gmra.mxu3 %vm58_vm0, %v887_v4  ;;  %v936_v4 = vld [vmem:[%s1732_s0 + $0x2d8] sm:$0xff] }
  0x78   :  { %486 = vmatmul.f32.gmra.mxu1 %v886_v5 }
  0x7a   :  { %147 = vmatmul.f32.gmra.mxu0 %v54_v6  ;;  %325 = vmatmul.f32.gmra.mxu2 %v867_v7  ;;  %v905_v7 = vld [vmem:[%s1732_s0 + $0x248] sm:$0xff] }
  0x7e   :  { %912 = vmatmul.msk.f32.gmra.mxu3 %vm58_vm0, %v889_v8 }
  0x80   :  { %489 = vmatmul.f32.gmra.mxu1 %v888_v9  ;;  %v904_v9 = vld [vmem:[%s1732_s0 + $0x240] sm:$0xff] }
  0x82   :  { %150 = vmatmul.f32.gmra.mxu0 %v56_v10  ;;  %328 = vmatmul.f32.gmra.mxu2 %v869_v11 }
  0x84   :  { %v171_v13 = vpop.f32.mrf.mxu1 }
  0x86   :  { %913 = vmatmul.msk.f32.gmra.mxu3 %vm58_vm0, %v891_v12 }
  0x88   :  { %492 = vmatmul.f32.gmra.mxu1 %v890_v14 }
  0x89   :  { %v349_v17 = vpop.f32.mrf.mxu3 }
  0x8a   :  { %674 = vmatmul.f32.vlgmr.msrb.gmra.mxu0 %v923_v15  ;;  %949 = vmatmul.msk.f32.vlgmr.msrb.gmra.mxu2 %vm58_vm0, %v924_v16  ;;  %v938_v15 = vld [vmem:[%s1732_s0 + $0x2e8] sm:$0xff] }
  0x8c   :  { %v174_v19 = vpop.f32.mrf.mxu1 }
  0x8e   :  { %914 = vmatmul.msk.f32.gmra.mxu3 %vm58_vm0, %v893_v18  ;;  %v907_v18 = vld [vmem:[%s1732_s0 + $0x258] sm:$0xff] }
  0x90   :  { %495 = vmatmul.f32.gmra.mxu1 %v892_v20  ;;  %v906_v20 = vld [vmem:[%s1732_s0 + $0x250] sm:$0xff] }
  0x91   :  { %v352_v23 = vpop.f32.mrf.mxu3 }
  0x92   :  { %677 = vmatmul.f32.gmra.mxu0 %v925_v21  ;;  %950 = vmatmul.msk.f32.gmra.mxu2 %vm58_vm0, %v926_v22 }
  0x94   :  { %v177_v25 = vpop.f32.mrf.mxu1 }
  0x96   :  { %915 = vmatmul.msk.f32.gmra.mxu3 %vm58_vm0, %v895_v24  ;;  %v939_v24 = vld [vmem:[%s1732_s0 + $0x2f0] sm:$0xff] }
  0x98   :  { %498 = vmatmul.f32.gmra.mxu1 %v894_v26  ;;  %v940_v26 = vld [vmem:[%s1732_s0 + $0x2f8] sm:$0xff] }
  0x99   :  { %v355_v29 = vpop.f32.mrf.mxu3 }
  0x9a   :  { %680 = vmatmul.f32.gmra.mxu0 %v927_v27  ;;  %951 = vmatmul.msk.f32.gmra.mxu2 %vm58_vm0, %v928_v28 }
  0x9c   :  { %v180_v31 = vpop.f32.mrf.mxu1 }
  0x9e   :  { %916 = vmatmul.msk.f32.gmra.mxu3 %vm58_vm0, %v897_v30  ;;  %v115_v33 = vpop.f32.mrf.mxu0 }
  0x9f   :  { %v1446_v41 = vadd.f32 %v171_v13, %v115_v33  ;;  %v937_v13 = vld [vmem:[%s1732_s0 + $0x2e0] sm:$0xff] }
  0xa0   :  { %501 = vmatmul.f32.gmra.mxu1 %v896_v32 }
  0xa1   :  { %v358_v36 = vpop.f32.mrf.mxu3 }
  0xa2   :  { %683 = vmatmul.f32.gmra.mxu0 %v929_v34  ;;  %952 = vmatmul.msk.f32.gmra.mxu2 %vm58_vm0, %v930_v35  ;;  %v941_v35 = vld [vmem:[%s1732_s0 + $0x300] sm:$0xff] }
  0xa4   :  { %v183_v38 = vpop.f32.mrf.mxu1 }
  0xa5   :  { %v293_v40 = vpop.f32.mrf.mxu2 }
  0xa6   :  { %v1448_v42 = vadd.f32 %v349_v17, %v293_v40  ;;  %917 = vmatmul.msk.f32.gmra.mxu3 %vm58_vm0, %v899_v37  ;;  %v118_v43 = vpop.f32.mrf.mxu0  ;;  %v942_v37 = vld [vmem:[%s1732_s0 + $0x308] sm:$0xff]  ;;  %v948_v40 = vld [vmem:[%s1732_s0 + $0x338] sm:$0x3] }
  0xa7   :  { %v1454_v45 = vadd.f32 %v174_v19, %v118_v43 }
  0xa8   :  { %504 = vmatmul.f32.gmra.mxu1 %v898_v39  ;;  %v388_v47 = vmax.f32 %v1446_v41, %v1448_v42 }
  0xa9   :  { %v361_v48 = vpop.f32.mrf.mxu3 }
  0xaa   :  { %686 = vmatmul.f32.gmra.mxu0 %v931_v44  ;;  %953 = vmatmul.msk.f32.gmra.mxu2 %vm58_vm0, %v932_v46  ;;  %v947_v44 = vld [vmem:[%s1732_s0 + $0x330] sm:$0x3] }
  0xac   :  { %v186_v50 = vpop.f32.mrf.mxu1 }
  0xad   :  { %v296_v52 = vpop.f32.mrf.mxu2 }
  0xae   :  { %v1468_v53 = vadd.f32 %v352_v23, %v296_v52  ;;  %918 = vmatmul.msk.f32.gmra.mxu3 %vm58_vm0, %v901_v49  ;;  %v121_v54 = vpop.f32.mrf.mxu0  ;;  %v944_v52 = vld [vmem:[%s1732_s0 + $0x318] sm:$0xff] }
  0xaf   :  { %v1474_v56 = vadd.f32 %v177_v25, %v121_v54 }
  0xb0   :  { %507 = vmatmul.f32.gmra.mxu1 %v900_v51  ;;  %v389_v58 = vmax.f32 %v1454_v45, %v1468_v53 }
  0xb1   :  { %v364_v59 = vpop.f32.mrf.mxu3 }
  0xb2   :  { %689 = vmatmul.f32.gmra.mxu0 %v933_v55  ;;  %954 = vmatmul.msk.f32.gmra.mxu2 %vm58_vm0, %v934_v57 }
  0xb4   :  { %v189_v61 = vpop.f32.mrf.mxu1 }
  0xb5   :  { %v299_v63 = vpop.f32.mrf.mxu2 }
  0xb6   :  { %v1488_v0 = vadd.f32 %v355_v29, %v299_v63  ;;  %919 = vmatmul.msk.f32.gmra.mxu3 %vm58_vm0, %v903_v60  ;;  %v909_v29 = vld [vmem:[%s1732_s0 + $0x268] sm:$0x3] }
  0xb7   :  { %v124_v1 = vpop.f32.mrf.mxu0 }
  0xb8   :  { %v1494_v3 = vadd.f32 %v180_v31, %v124_v1  ;;  %510 = vmatmul.f32.gmra.mxu1 %v902_v62  ;;  %v390_v5 = vmax.f32 %v1474_v56, %v1488_v0  ;;  %v908_v31 = vld [vmem:[%s1732_s0 + $0x260] sm:$0x3]  ;;  %v946_v1 = vld [vmem:[%s1732_s0 + $0x328] sm:$0xff] }
  0xb9   :  { %v367_v6 = vpop.f32.mrf.mxu3  ;;  %v945_v62 = vld [vmem:[%s1732_s0 + $0x320] sm:$0xff] }
  0xba   :  { %692 = vmatmul.f32.gmra.mxu0 %v935_v2  ;;  %955 = vmatmul.msk.f32.gmra.mxu2 %vm58_vm0, %v936_v4 }
  0xbc   :  { %v192_v8 = vpop.f32.mrf.mxu1 }
  0xbd   :  { %v302_v10 = vpop.f32.mrf.mxu2 }
  0xbe   :  { %v1508_v11 = vadd.f32 %v358_v36, %v302_v10  ;;  %920 = vmatmul.msk.f32.gmra.mxu3 %vm58_vm0, %v905_v7 }
  0xbf   :  { %v127_v12 = vpop.f32.mrf.mxu0 }
  0xc0   :  { %v1514_v14 = vadd.f32 %v183_v38, %v127_v12  ;;  %513 = vmatmul.f32.gmra.mxu1 %v904_v9  ;;  %v391_v16 = vmax.f32 %v1494_v3, %v1508_v11 }
  0xc1   :  { %v370_v17 = vpop.f32.mrf.mxu3 }
  0xc2   :  { %695 = vmatmul.f32.gmra.mxu0 %v937_v13  ;;  %956 = vmatmul.msk.f32.gmra.mxu2 %vm58_vm0, %v938_v15 }
  0xc5   :  { %v195_v19 = vpop.f32.mrf.mxu1  ;;  %v305_v21 = vpop.f32.mrf.mxu2 }
  0xc6   :  { %v1528_v22 = vadd.f32 %v361_v48, %v305_v21  ;;  %921 = vmatmul.msk.f32.gmra.mxu3 %vm58_vm0, %v907_v18 }
  0xc7   :  { %v130_v23 = vpop.f32.mrf.mxu0 }
  0xc8   :  { %v1534_v25 = vadd.f32 %v186_v50, %v130_v23  ;;  %516 = vmatmul.f32.gmra.mxu1 %v906_v20  ;;  %v392_v27 = vmax.f32 %v1514_v14, %v1528_v22  ;;  %v943_v50 = vld [vmem:[%s1732_s0 + $0x310] sm:$0xff] }
  0xc9   :  { %v373_v28 = vpop.f32.mrf.mxu3 }
  0xca   :  { %698 = vmatmul.f32.gmra.mxu0 %v939_v24  ;;  %957 = vmatmul.msk.f32.gmra.mxu2 %vm58_vm0, %v940_v26 }
  0xcd   :  { %v198_v30 = vpop.f32.mrf.mxu1  ;;  %v308_v32 = vpop.f32.mrf.mxu2 }
  0xce   :  { %v1548_v33 = vadd.f32 %v364_v59, %v308_v32  ;;  %922 = vmatmul.msk.f32.gmra.mxu3 %vm58_vm0, %v909_v29 }
  0xcf   :  { %v133_v34 = vpop.f32.mrf.mxu0 }
  0xd0   :  { %v1554_v36 = vadd.f32 %v189_v61, %v133_v34  ;;  %519 = vmatmul.f32.gmra.mxu1 %v908_v31  ;;  %v393_v38 = vmax.f32 %v1534_v25, %v1548_v33 }
  0xd1   :  { %v376_v39 = vpop.f32.mrf.mxu3 }
  0xd2   :  { %701 = vmatmul.f32.gmra.mxu0 %v941_v35  ;;  %958 = vmatmul.msk.f32.gmra.mxu2 %vm58_vm0, %v942_v37 }
  0xd5   :  { %v201_v43 = vpop.f32.mrf.mxu1  ;;  %v311_v46 = vpop.f32.mrf.mxu2 }
  0xd6   :  { %v1568_v48 = vadd.f32 %v367_v6, %v311_v46  ;;  %961 = vmatmul.msk.f32.vlgmr.msra.gmra.mxu3 %vm58_vm0, %v948_v40 }
  0xd7   :  { %v136_v49 = vpop.f32.mrf.mxu0 }
  0xd8   :  { %v1574_v51 = vadd.f32 %v192_v8, %v136_v49  ;;  %710 = vmatmul.f32.vlgmr.msra.gmra.mxu1 %v947_v44  ;;  %v394_v54 = vmax.f32 %v1554_v36, %v1568_v48 }
  0xd9   :  { %v379_v55 = vpop.f32.mrf.mxu3 }
  0xda   :  { %704 = vmatmul.f32.gmra.mxu0 %v943_v50  ;;  %959 = vmatmul.msk.f32.gmra.mxu2 %vm58_vm0, %v944_v52 }
  0xdd   :  { %v204_v57 = vpop.f32.mrf.mxu1  ;;  %v314_v59 = vpop.f32.mrf.mxu2 }
  0xde   :  { %v1582_v60 = vadd.f32 %v370_v17, %v314_v59 }
  0xdf   :  { %v139_v61 = vpop.f32.mrf.mxu0 }
  0xe0   :  { %v1587_v63 = vadd.f32 %v195_v19, %v139_v61  ;;  %v395_v2 = vmax.f32 %v1574_v51, %v1582_v60 }
  0xe1   :  { %v382_v4 = vpop.f32.mrf.mxu3 }
  0xe2   :  { %707 = vmatmul.f32.gmra.mxu0 %v945_v62  ;;  %960 = vmatmul.msk.f32.gmra.mxu2 %vm58_vm0, %v946_v1 }
  0xe5   :  { %v207_v6 = vpop.f32.mrf.mxu1  ;;  %v317_v7 = vpop.f32.mrf.mxu2 }
  0xe6   :  { %v1595_v8 = vadd.f32 %v373_v28, %v317_v7 }
  0xe7   :  { %v142_v9 = vpop.f32.mrf.mxu0 }
  0xe8   :  { %v1597_v10 = vadd.f32 %v198_v30, %v142_v9  ;;  %v396_v12 = vmax.f32 %v1587_v63, %v1595_v8 }
  0xe9   :  { %v385_v13 = vpop.f32.mrf.mxu3 }
  0xed   :  { %v484_v15 = vpop.f32.mrf.mxu1  ;;  %v320_v17 = vpop.f32.mrf.mxu2 }
  0xee   :  { %v1601_v18 = vadd.f32 %v376_v39, %v320_v17 }
  0xef   :  { %v145_v19 = vpop.f32.mrf.mxu0 }
  0xf0   :  { %v1603_v20 = vadd.f32 %v201_v43, %v145_v19  ;;  %v397_v21 = vmax.f32 %v1597_v10, %v1601_v18 }
  0xf1   :  { %v540_v23 = vpop.f32.mrf.mxu3 }
  0xf2   :  { %v541_v59 = vadd.f32 %v540_v23, %v484_v15 }
  0xf4   :  { %v579_v1 = vmax.f32 %v388_v47, %v541_v59 }
  0xf5   :  { %v487_v24 = vpop.f32.mrf.mxu1  ;;  %v323_v26 = vpop.f32.mrf.mxu2 }
  0xf6   :  { %v1607_v28 = vadd.f32 %v379_v55, %v323_v26 }
  0xf7   :  { %v148_v29 = vpop.f32.mrf.mxu0 }
  0xf8   :  { %v1609_v30 = vadd.f32 %v204_v57, %v148_v29  ;;  %v398_v31 = vmax.f32 %v1603_v20, %v1607_v28 }
  0xf9   :  { %v543_v32 = vpop.f32.mrf.mxu3 }
  0xfa   :  { %v544_v17 = vadd.f32 %v543_v32, %v487_v24 }
  0xfc   :  { %v580_v41 = vmax.f32 %v389_v58, %v544_v17 }
  0xfd   :  { %v490_v34 = vpop.f32.mrf.mxu1  ;;  %v326_v35 = vpop.f32.mrf.mxu2 }
  0xfe   :  { %v1613_v37 = vadd.f32 %v382_v4, %v326_v35 }
  0xff   :  { %v151_v39 = vpop.f32.mrf.mxu0 }
 0x100   :  { %v1615_v40 = vadd.f32 %v207_v6, %v151_v39  ;;  %v399_v43 = vmax.f32 %v1609_v30, %v1613_v37  ;;  %v1629_v6 = vld [vmem:[%s1733_s2] ss:$0 sm:$0xff] }
 0x101   :  { %v546_v44 = vpop.f32.mrf.mxu3 }
 0x102   :  { %v547_v24 = vadd.f32 %v546_v44, %v490_v34 }
 0x104   :  { %v581_v45 = vmax.f32 %v390_v5, %v547_v24 }
 0x105   :  { %v493_v46 = vpop.f32.mrf.mxu1  ;;  %v329_v49 = vpop.f32.mrf.mxu2 }
 0x106   :  { %v1619_v50 = vadd.f32 %v385_v13, %v329_v49 }
 0x107   :  { %v675_v52 = vpop.f32.mrf.mxu0 }
 0x108   :  { %v400_v55 = vmax.f32 %v1615_v40, %v1619_v50 }
 0x109   :  { %v549_v57 = vpop.f32.mrf.mxu3 }
 0x10d   :  { %v496_v61 = vpop.f32.mrf.mxu1  ;;  %v731_v62 = vpop.f32.mrf.mxu2 }
 0x10e   :  { %v732_v4 = vadd.f32 %v731_v62, %v675_v52 }
 0x10f   :  { %v678_v7 = vpop.f32.mrf.mxu0 }
 0x110   :  { %v770_v9 = vmax.f32 %v579_v1, %v732_v4  ;;  %v550_v1 = vadd.f32 %v549_v57, %v493_v46 }
 0x111   :  { %v552_v13 = vpop.f32.mrf.mxu3 }
 0x112   :  { %v787_v19 = vadd.f32 %v1629_v6, %v770_v9  ;;  %v582_v56 = vmax.f32 %v391_v16, %v550_v1 }
 0x114   :  { %v800_v15 = vmax.f32 %v787_v19, 0.0  ;;  %v553_v19 = vadd.f32 %v552_v13, %v496_v61 }
 0x115   :  { %v499_v23 = vpop.f32.mrf.mxu1  ;;  %v734_v26 = vpop.f32.mrf.mxu2 }
 0x116   :  { %814 = vst.msk [vmem:[%s1734_s3] sm:$0xff] %vm813_vm1, %v800_v15  ;;  %v735_v42 = vadd.f32 %v734_v26, %v678_v7  ;;  %v583_v3 = vmax.f32 %v392_v27, %v553_v19 }
 0x117   :  { %v681_v47 = vpop.f32.mrf.mxu0 }
 0x118   :  { %v771_v29 = vmax.f32 %v580_v41, %v735_v42 }
 0x119   :  { %v555_v35 = vpop.f32.mrf.mxu3 }
 0x11a   :  { %v788_v32 = vadd.f32 %v1629_v6, %v771_v29 }
 0x11c   :  { %v801_v39 = vmax.f32 %v788_v32, 0.0 }
 0x11d   :  { %v502_v49 = vpop.f32.mrf.mxu1  ;;  %v737_v52 = vpop.f32.mrf.mxu2 }
 0x11e   :  { %815 = vst.msk [vmem:[%s1734_s3 + $0x8] sm:$0xff] %vm813_vm1, %v801_v39  ;;  %v738_v53 = vadd.f32 %v737_v52, %v681_v47  ;;  %v556_v47 = vadd.f32 %v555_v35, %v499_v23 }
 0x11f   :  { %v684_v58 = vpop.f32.mrf.mxu0 }
 0x120   :  { %v772_v59 = vmax.f32 %v581_v45, %v738_v53  ;;  %v584_v14 = vmax.f32 %v393_v38, %v556_v47 }
 0x121   :  { %v558_v62 = vpop.f32.mrf.mxu3 }
 0x122   :  { %v789_v34 = vadd.f32 %v1629_v6, %v772_v59  ;;  %v559_v52 = vadd.f32 %v558_v62, %v502_v49 }
 0x124   :  { %v802_v44 = vmax.f32 %v789_v34, 0.0  ;;  %v585_v25 = vmax.f32 %v394_v54, %v559_v52 }
 0x125   :  { %v505_v4 = vpop.f32.mrf.mxu1  ;;  %v740_v7 = vpop.f32.mrf.mxu2 }
 0x126   :  { %816 = vst.msk [vmem:[%s1734_s3 + $0x10] sm:$0xff] %vm813_vm1, %v802_v44  ;;  %v741_v0 = vadd.f32 %v740_v7, %v684_v58 }
 0x127   :  { %v687_v5 = vpop.f32.mrf.mxu0 }
 0x128   :  { %v773_v9 = vmax.f32 %v582_v56, %v741_v0 }
 0x129   :  { %v561_v17 = vpop.f32.mrf.mxu3 }
 0x12a   :  { %v790_v46 = vadd.f32 %v1629_v6, %v773_v9  ;;  %v562_v1 = vadd.f32 %v561_v17, %v505_v4 }
 0x12c   :  { %v803_v57 = vmax.f32 %v790_v46, 0.0  ;;  %v586_v36 = vmax.f32 %v395_v2, %v562_v1 }
 0x12d   :  { %v508_v15 = vpop.f32.mrf.mxu1  ;;  %v743_v26 = vpop.f32.mrf.mxu2 }
 0x12e   :  { %817 = vst.msk [vmem:[%s1734_s3 + $0x18] sm:$0xff] %vm813_vm1, %v803_v57  ;;  %v744_v11 = vadd.f32 %v743_v26, %v687_v5 }
 0x12f   :  { %v690_v16 = vpop.f32.mrf.mxu0 }
 0x130   :  { %v774_v41 = vmax.f32 %v583_v3, %v744_v11 }
 0x131   :  { %v564_v42 = vpop.f32.mrf.mxu3 }
 0x132   :  { %v791_v61 = vadd.f32 %v1629_v6, %v774_v41  ;;  %v565_v0 = vadd.f32 %v564_v42, %v508_v15 }
 0x134   :  { %v804_v13 = vmax.f32 %v791_v61, 0.0  ;;  %v587_v51 = vmax.f32 %v396_v12, %v565_v0 }
 0x135   :  { %v511_v29 = vpop.f32.mrf.mxu1  ;;  %v746_v24 = vpop.f32.mrf.mxu2 }
 0x136   :  { %818 = vst.msk [vmem:[%s1734_s3 + $0x20] sm:$0xff] %vm813_vm1, %v804_v13  ;;  %v747_v22 = vadd.f32 %v746_v24, %v690_v16 }
 0x137   :  { %v693_v27 = vpop.f32.mrf.mxu0 }
 0x138   :  { %v775_v32 = vmax.f32 %v584_v14, %v747_v22 }
 0x139   :  { %v567_v39 = vpop.f32.mrf.mxu3 }
 0x13a   :  { %v792_v23 = vadd.f32 %v1629_v6, %v775_v32  ;;  %v568_v57 = vadd.f32 %v567_v39, %v511_v29 }
 0x13c   :  { %v805_v35 = vmax.f32 %v792_v23, 0.0  ;;  %v588_v11 = vmax.f32 %v397_v21, %v568_v57 }
 0x13d   :  { %v514_v45 = vpop.f32.mrf.mxu1  ;;  %v749_v53 = vpop.f32.mrf.mxu2 }
 0x13e   :  { %819 = vst.msk [vmem:[%s1734_s3 + $0x28] sm:$0xff] %vm813_vm1, %v805_v35  ;;  %v750_v33 = vadd.f32 %v749_v53, %v693_v27 }
 0x13f   :  { %v696_v38 = vpop.f32.mrf.mxu0 }
 0x140   :  { %v776_v58 = vmax.f32 %v585_v25, %v750_v33 }
 0x141   :  { %v570_v59 = vpop.f32.mrf.mxu3 }
 0x142   :  { %v793_v49 = vadd.f32 %v1629_v6, %v776_v58  ;;  %v571_v47 = vadd.f32 %v570_v59, %v514_v45 }
 0x144   :  { %v806_v62 = vmax.f32 %v793_v49, 0.0  ;;  %v589_v24 = vmax.f32 %v398_v31, %v571_v47 }
 0x145   :  { %v517_v34 = vpop.f32.mrf.mxu1  ;;  %v752_v44 = vpop.f32.mrf.mxu2 }
 0x146   :  { %820 = vst.msk [vmem:[%s1734_s3 + $0x30] sm:$0xff] %vm813_vm1, %v806_v62  ;;  %v753_v48 = vadd.f32 %v752_v44, %v696_v38 }
 0x147   :  { %v699_v54 = vpop.f32.mrf.mxu0 }
 0x148   :  { %v777_v7 = vmax.f32 %v586_v36, %v753_v48 }
 0x149   :  { %v573_v56 = vpop.f32.mrf.mxu3 }
 0x14a   :  { %v794_v4 = vadd.f32 %v1629_v6, %v777_v7 }
 0x14c   :  { %v807_v5 = vmax.f32 %v794_v4, 0.0 }
 0x14d   :  { %v755_v9 = vpop.f32.mrf.mxu2  ;;  %v520_v17 = vpop.f32.mrf.mxu1 }
 0x14e   :  { %821 = vst.msk [vmem:[%s1734_s3 + $0x38] sm:$0xff] %vm813_vm1, %v807_v5  ;;  %v756_v60 = vadd.f32 %v755_v9, %v699_v54 }
 0x14f   :  { %v702_v2 = vpop.f32.mrf.mxu0 }
 0x150   :  { %v778_v19 = vmax.f32 %v587_v51, %v756_v60 }
 0x151   :  { %v576_v46 = vpop.f32.mrf.mxu3 }
 0x152   :  { %v795_v15 = vadd.f32 %v1629_v6, %v778_v19  ;;  %v577_v63 = vadd.f32 %v576_v46, %v520_v17 }
 0x154   :  { %v808_v26 = vmax.f32 %v795_v15, 0.0  ;;  %v591_v61 = vmax.f32 %v400_v55, %v577_v63  ;;  %v574_v55 = vadd.f32 %v573_v56, %v517_v34 }
 0x155   :  { %v758_v3 = vpop.f32.mrf.mxu2  ;;  %v711_v12 = vpop.f32.mrf.mxu1 }
 0x156   :  { %822 = vst.msk [vmem:[%s1734_s3 + $0x40] sm:$0xff] %vm813_vm1, %v808_v26  ;;  %v759_v8 = vadd.f32 %v758_v3, %v702_v2  ;;  %v590_v32 = vmax.f32 %v399_v43, %v574_v55 }
 0x157   :  { %v705_v42 = vpop.f32.mrf.mxu0 }
 0x158   :  { %v779_v16 = vmax.f32 %v588_v11, %v759_v8 }
 0x159   :  { %v767_v41 = vpop.f32.mrf.mxu3 }
 0x15a   :  { %v796_v13 = vadd.f32 %v1629_v6, %v779_v16  ;;  %v768_v10 = vadd.f32 %v767_v41, %v711_v12 }
 0x15c   :  { %v809_v18 = vmax.f32 %v796_v13, 0.0  ;;  %v782_v21 = vmax.f32 %v591_v61, %v768_v10 }
 0x15d   :  { %v761_v29 = vpop.f32.mrf.mxu2 }
 0x15e   :  { %823 = vst.msk [vmem:[%s1734_s3 + $0x48] sm:$0xff] %vm813_vm1, %v809_v18  ;;  %v799_v14 = vadd.f32 %v1629_v6, %v782_v21  ;;  %v762_v22 = vadd.f32 %v761_v29, %v705_v42 }
 0x15f   :  { %v708_v20 = vpop.f32.mrf.mxu0 }
 0x160   :  { %v812_v40 = vmax.f32 %v799_v14, 0.0  ;;  %v780_v50 = vmax.f32 %v589_v24, %v762_v22 }
 0x162   :  { %827 = vst.msk [vmem:[%s1734_s3 + $0x60] sm:$0x3] %vm826_vm2, %v812_v40  ;;  %v797_v27 = vadd.f32 %v1629_v6, %v780_v50 }
 0x164   :  { %v810_v28 = vmax.f32 %v797_v27, 0.0 }
 0x165   :  { %v764_v31 = vpop.f32.mrf.mxu2 }
 0x166   :  { %824 = vst.msk [vmem:[%s1734_s3 + $0x50] sm:$0xff] %vm813_vm1, %v810_v28  ;;  %v765_v39 = vadd.f32 %v764_v31, %v708_v20 }
 0x168   :  { %v781_v52 = vmax.f32 %v590_v32, %v765_v39 }
 0x16a   :  { %v798_v23 = vadd.f32 %v1629_v6, %v781_v52 }
 0x16c   :  { %v811_v35 = vmax.f32 %v798_v23, 0.0 }
 0x16e   :  { %825 = vst.msk [vmem:[%s1734_s3 + $0x58] sm:$0xff] %vm813_vm1, %v811_v35 }

// kernel: emnist_net_forward.5
= control target key start
LH: loop header
LB: loop body
LE: loop exit
PB: predicated region body
PF: predicated region fallthrough
CT: control target
= control target key end

     0   :  { %s1063_s0 = inlined_call_operand.vmem [shape: f32[4,8,288], index: 0, kind: input, shape index: {}]   ;;  %s1064_s1 = inlined_call_operand.vmem [shape: f32[288,64], index: 1, kind: input, shape index: {}]   ;;  %s1065_s2 = inlined_call_operand.vmem [shape: f32[1,64], index: 2, kind: input, shape index: {}]   ;;  %s1066_s3 = inlined_call_operand.vmem [shape: f32[4,64,62], index: 3, kind: input, shape index: {}]   ;;  %s1067_s4 = inlined_call_operand.vmem [shape: f32[1,62], index: 4, kind: input, shape index: {}]   ;;  %s1068_s5 = inlined_call_operand.hbm [shape: f32[2,62], index: 5, kind: output, shape index: {}]  }
   0x1   :  { %v597_v0 = vld [vmem:[%s1064_s1 + $0x118] sm:$0xff]  ;;  %v607_v2 = vld [vmem:[%s1064_s1 + $0x110] sm:$0xff]  ;;  %v619_v4 = vld [vmem:[%s1064_s1 + $0x108] sm:$0xff] }
   0x2   :  { %v602_v1 = vld [vmem:[%s1064_s1 + $0x78] sm:$0xff]  ;;  %116 = vmatpush.msra.mxu2 %v597_v0  ;;  %v614_v3 = vld [vmem:[%s1064_s1 + $0x70] sm:$0xff]  ;;  %v624_v5 = vld [vmem:[%s1064_s1 + $0x68] sm:$0xff] }
   0x3   :  { %131 = vmatpush.msra.mxu3 %v602_v1  ;;  %64 = vmatpush.msra.mxu0 %v602_v1  ;;  %v632_v6 = vld [vmem:[%s1064_s1 + $0xf8] sm:$0xff]  ;;  %v637_v7 = vld [vmem:[%s1064_s1 + $0x100] sm:$0xff]  ;;  %v651_v9 = vld [vmem:[%s1064_s1 + $0xf0] sm:$0xff] }
   0x4   :  { %117 = vmatpush.msra.mxu2 %v607_v2  ;;  %v642_v8 = vld [vmem:[%s1064_s1 + $0x60] sm:$0xff]  ;;  %84 = vmatpush.msra.mxu1 %v632_v6  ;;  %v656_v10 = vld [vmem:[%s1064_s1 + $0x58] sm:$0xff]  ;;  %v665_v11 = vld [vmem:[%s1064_s1 + $0xe8] sm:$0xff] }
   0x5   :  { %132 = vmatpush.msra.mxu3 %v614_v3  ;;  %65 = vmatpush.msra.mxu0 %v614_v3  ;;  %v671_v12 = vld [vmem:[%s1064_s1 + $0x50] sm:$0xff]  ;;  %v678_v13 = vld [vmem:[%s1064_s1 + $0xe0] sm:$0xff]  ;;  %v685_v14 = vld [vmem:[%s1064_s1 + $0x48] sm:$0xff] }
   0x6   :  { %118 = vmatpush.msra.mxu2 %v619_v4  ;;  %85 = vmatpush.msra.mxu1 %v651_v9  ;;  %v692_v15 = vld [vmem:[%s1064_s1 + $0xd8] sm:$0xff]  ;;  %v699_v16 = vld [vmem:[%s1064_s1 + $0x40] sm:$0xff]  ;;  %v711_v18 = vld [vmem:[%s1064_s1 + $0xd0] sm:$0xff] }
   0x7   :  { %133 = vmatpush.msra.mxu3 %v624_v5  ;;  %66 = vmatpush.msra.mxu0 %v624_v5  ;;  %v706_v17 = vld [vmem:[%s1064_s1 + $0x38] sm:$0xff] }
   0x8   :  { %119 = vmatpush.msra.mxu2 %v637_v7  ;;  %86 = vmatpush.msra.mxu1 %v665_v11 }
   0x9   :  { %134 = vmatpush.msra.mxu3 %v642_v8  ;;  %67 = vmatpush.msra.mxu0 %v642_v8 }
   0xa   :  { %151 = vmatpush.msrb.mxu2 %v632_v6  ;;  %87 = vmatpush.msra.mxu1 %v678_v13 }
   0xb   :  { %135 = vmatpush.msra.mxu3 %v656_v10  ;;  %68 = vmatpush.msra.mxu0 %v656_v10 }
   0xc   :  { %152 = vmatpush.msrb.mxu2 %v651_v9  ;;  %88 = vmatpush.msra.mxu1 %v692_v15 }
   0xd   :  { %136 = vmatpush.msra.mxu3 %v671_v12  ;;  %69 = vmatpush.msra.mxu0 %v671_v12 }
   0xe   :  { %153 = vmatpush.msrb.mxu2 %v665_v11  ;;  %89 = vmatpush.msra.mxu1 %v711_v18 }
   0xf   :  { %137 = vmatpush.msra.mxu3 %v685_v14 }
  0x10   :  { %154 = vmatpush.msrb.mxu2 %v678_v13 }
  0x11   :  { %10 = vsyncpa [#allocation4], 0  ;;  %138 = vmatpush.msra.mxu3 %v699_v16  ;;  %v720_v19 = vld [vmem:[%s1064_s1 + $0xc8] sm:$0xff]  ;;  %70 = vmatpush.msra.mxu0 %v685_v14  ;;  %v727_v20 = vld [vmem:[%s1064_s1 + $0x30] sm:$0xff]  ;;  %vm60_vm0 = vcmask 261120   ;;  %vm334_vm1 = vcmask 523264  }
  0x12   :  { %155 = vmatpush.msrb.mxu2 %v692_v15  ;;  %90 = vmatpush.msra.mxu1 %v720_v19  ;;  %v734_v21 = vld [vmem:[%s1064_s1 + $0xc0] sm:$0xff]  ;;  %v741_v22 = vld [vmem:[%s1064_s1 + $0x28] sm:$0xff]  ;;  %v748_v23 = vld [vmem:[%s1064_s1 + $0xb8] sm:$0xff]  ;;  %s484_s27 = sshll.u32 %s1068_s5, 4  ;;  %vm475_vm2 = vcmask 500736   ;;  %s485_s27 = int_to_ptr.hbm [resolvable:$true] %s484_s27 }
  0x13   :  { %139 = vmatpush.msra.mxu3 %v706_v17  ;;  %71 = vmatpush.msra.mxu0 %v699_v16  ;;  %v755_v24 = vld [vmem:[%s1064_s1 + $0x20] sm:$0xff]  ;;  %v762_v25 = vld [vmem:[%s1064_s1 + $0xb0] sm:$0xff]  ;;  %v769_v26 = vld [vmem:[%s1064_s1 + $0x18] sm:$0xff] }
  0x14   :  { %156 = vmatpush.msrb.mxu2 %v711_v18  ;;  %91 = vmatpush.msra.mxu1 %v734_v21  ;;  %v776_v27 = vld [vmem:[%s1064_s1 + $0xa8] sm:$0xff]  ;;  %v783_v28 = vld [vmem:[%s1064_s1 + $0x10] sm:$0xff]  ;;  %v793_v30 = vld [vmem:[%s1064_s1 + $0xa0] sm:$0xff] }
  0x15   :  { %140 = vmatpush.msra.mxu3 %v727_v20  ;;  %72 = vmatpush.msra.mxu0 %v706_v17  ;;  %v59_v29 = vld [vmem:[%s1063_s0 + $0x10] sm:$0xff]  ;;  %v800_v31 = vld [vmem:[%s1064_s1 + $0x8] sm:$0xff]  ;;  %v809_v32 = vld [vmem:[%s1064_s1] sm:$0xff] }
  0x16   :  { %157 = vmatpush.msrb.mxu2 %v720_v19  ;;  %92 = vmatpush.msra.mxu1 %v748_v23  ;;  %v814_v33 = vld [vmem:[%s1064_s1 + $0x98] sm:$0xff]  ;;  %v826_v35 = vld [vmem:[%s1064_s1 + $0x90] sm:$0xff]  ;;  %v836_v36 = vld [vmem:[%s1064_s1 + $0x88] sm:$0xff] }
  0x17   :  { %141 = vmatpush.msra.mxu3 %v741_v22  ;;  %73 = vmatpush.msra.mxu0 %v727_v20  ;;  %v494_v34 = vld [vmem:[%s1063_s0 + $0x18] sm:$0xff]  ;;  %v845_v37 = vld [vmem:[%s1064_s1 + $0x80] sm:$0xff]  ;;  %v496_v39 = vld [vmem:[%s1063_s0 + $0x28] sm:$0xff] }
  0x18   :  { %158 = vmatpush.msrb.mxu2 %v734_v21  ;;  %93 = vmatpush.msra.mxu1 %v762_v25  ;;  %v495_v38 = vld [vmem:[%s1063_s0 + $0x20] sm:$0xff]  ;;  %v58_v41 = vld [vmem:[%s1063_s0 + $0x8] sm:$0xff]  ;;  %v499_v42 = vld [vmem:[%s1063_s0 + $0x38] sm:$0xff] }
  0x19   :  { %142 = vmatpush.msra.mxu3 %v755_v24  ;;  %74 = vmatpush.msra.mxu0 %v741_v22  ;;  %v57_v40 = vld [vmem:[%s1063_s0] sm:$0xff]  ;;  %v498_v44 = vld [vmem:[%s1063_s0 + $0x30] sm:$0xff]  ;;  %v502_v45 = vld [vmem:[%s1063_s0 + $0x48] sm:$0xff] }
  0x1a   :  { %159 = vmatpush.msrb.mxu2 %v748_v23  ;;  %94 = vmatpush.msra.mxu1 %v776_v27  ;;  %v500_v43 = vld [vmem:[%s1063_s0 + $0x40] sm:$0xff]  ;;  %v503_v46 = vld [vmem:[%s1063_s0 + $0x50] sm:$0xff]  ;;  %v504_v47 = vld [vmem:[%s1063_s0 + $0x58] sm:$0xff] }
  0x1b   :  { %143 = vmatpush.msra.mxu3 %v769_v26  ;;  %75 = vmatpush.msra.mxu0 %v755_v24  ;;  %v345_v48 = vld [vmem:[%s1066_s3 + $0x38] sm:$0xff]  ;;  %v344_v52 = vld [vmem:[%s1066_s3 + $0x30] sm:$0xff]  ;;  %v343_v56 = vld [vmem:[%s1066_s3 + $0x28] sm:$0xff] }
  0x1c   :  { %160 = vmatpush.msrb.mxu2 %v762_v25  ;;  %95 = vmatpush.msra.mxu1 %v793_v30  ;;  %v514_v49 = vld [vmem:[%s1066_s3 + $0x78] sm:$0xff]  ;;  %v513_v53 = vld [vmem:[%s1066_s3 + $0x70] sm:$0xff]  ;;  %v512_v57 = vld [vmem:[%s1066_s3 + $0x68] sm:$0xff] }
  0x1d   :  { %144 = vmatpush.msra.mxu3 %v783_v28  ;;  %493 = vmatmul.msk.f32.vlgmr.msra.gmra.mxu2 %vm60_vm0, %v59_v29  ;;  %v523_v50 = vld [vmem:[%s1066_s3 + $0xb8] sm:$0xff]  ;;  %v522_v54 = vld [vmem:[%s1066_s3 + $0xb0] sm:$0xff]  ;;  %v521_v58 = vld [vmem:[%s1066_s3 + $0xa8] sm:$0xff] }
  0x1e   :  { %161 = vmatpush.msrb.mxu2 %v776_v27  ;;  %76 = vmatpush.msra.mxu0 %v769_v26  ;;  %v532_v51 = vld [vmem:[%s1066_s3 + $0xf8] sm:$0xff]  ;;  %v531_v55 = vld [vmem:[%s1066_s3 + $0xf0] sm:$0xff]  ;;  %v530_v59 = vld [vmem:[%s1066_s3 + $0xe8] sm:$0xff] }
  0x1f   :  { %145 = vmatpush.msra.mxu3 %v800_v31  ;;  %96 = vmatpush.msra.mxu1 %v814_v33  ;;  %v342_v60 = vld [vmem:[%s1066_s3 + $0x20] sm:$0xff] }
  0x20   :  { %162 = vmatpush.msrb.mxu2 %v793_v30  ;;  %77 = vmatpush.msra.mxu0 %v783_v28  ;;  %v511_v61 = vld [vmem:[%s1066_s3 + $0x60] sm:$0xff] }
  0x21   :  { %146 = vmatpush.msra.mxu3 %v809_v32  ;;  %97 = vmatpush.msra.mxu1 %v826_v35  ;;  %v520_v62 = vld [vmem:[%s1066_s3 + $0xa0] sm:$0xff] }
  0x22   :  { %163 = vmatpush.msrb.mxu2 %v814_v33  ;;  %147 = vmatmul.f32.vlgmr.msra.gmra.mxu3 %v494_v34  ;;  %v529_v63 = vld [vmem:[%s1066_s3 + $0xe0] sm:$0xff] }
  0x23   :  { %183 = vmatpush.msrb.mxu3 %v597_v0  ;;  %78 = vmatpush.msra.mxu0 %v800_v31 }
  0x24   :  { %164 = vmatpush.msrb.mxu2 %v826_v35  ;;  %98 = vmatpush.msra.mxu1 %v836_v36 }
  0x25   :  { %184 = vmatpush.msrb.mxu3 %v607_v2  ;;  %79 = vmatpush.msra.mxu0 %v809_v32 }
  0x26   :  { %165 = vmatpush.msrb.mxu2 %v836_v36  ;;  %99 = vmatpush.msra.mxu1 %v845_v37 }
  0x27   :  { %185 = vmatpush.msrb.mxu3 %v619_v4  ;;  %251 = vmatpush.msrb.mxu0 %v597_v0 }
  0x28   :  { %166 = vmatpush.msrb.mxu2 %v845_v37  ;;  %199 = vmatpush.msrb.mxu1 %v602_v1 }
  0x29   :  { %186 = vmatpush.msrb.mxu3 %v637_v7  ;;  %167 = vmatmul.f32.vlgmr.msrb.gmra.mxu2 %v495_v38  ;;  %v535_v38 = vld [vmem:[%s1065_s2] ss:$0 sm:$0xff]  ;;  %s563_s2 = smov [#allocation3]  }
  0x2a   :  { %267 = vmatpush.msra.mxu2 %v602_v1  ;;  %497 = vmatmul.msk.f32.vlgmr.msrb.gmra.mxu3 %vm60_vm0, %v496_v39  ;;  %v510_v1 = vld [vmem:[%s1066_s3 + $0x58] sm:$0xff]  ;;  %s482_s24 = sshll.u32 %s563_s2, 4  ;;  %s483_s24 = int_to_ptr.vmem [resolvable:$true] %s482_s24 }
  0x2b   :  { %219 = vmatpush.msra.mxu3 %v632_v6  ;;  %252 = vmatpush.msrb.mxu0 %v607_v2 }
  0x2c   :  { %200 = vmatpush.msrb.mxu1 %v614_v3  ;;  %268 = vmatpush.msra.mxu2 %v614_v3 }
  0x2d   :  { %220 = vmatpush.msra.mxu3 %v651_v9  ;;  %253 = vmatpush.msrb.mxu0 %v619_v4 }
  0x2e   :  { %80 = vmatmul.f32.vlgmr.msra.gmra.mxu0 %v57_v40  ;;  %100 = vmatmul.f32.vlgmr.msra.gmra.mxu1 %v58_v41 }
  0x2f   :  { %221 = vmatpush.msra.mxu3 %v665_v11  ;;  %269 = vmatpush.msra.mxu2 %v624_v5 }
  0x30   :  { %201 = vmatpush.msrb.mxu1 %v624_v5  ;;  %254 = vmatpush.msrb.mxu0 %v637_v7  ;;  %v528_v5 = vld [vmem:[%s1066_s3 + $0xd8] sm:$0xff] }
  0x31   :  { %222 = vmatpush.msra.mxu3 %v678_v13  ;;  %270 = vmatpush.msra.mxu2 %v642_v8 }
  0x32   :  { %202 = vmatpush.msrb.mxu1 %v642_v8  ;;  %287 = vmatpush.msra.mxu0 %v632_v6  ;;  %v340_v6 = vld [vmem:[%s1066_s3 + $0x10] sm:$0xff] }
  0x33   :  { %223 = vmatpush.msra.mxu3 %v692_v15  ;;  %271 = vmatpush.msra.mxu2 %v656_v10  ;;  %v518_v8 = vld [vmem:[%s1066_s3 + $0x90] sm:$0xff] }
  0x34   :  { %203 = vmatpush.msrb.mxu1 %v656_v10  ;;  %288 = vmatpush.msra.mxu0 %v651_v9  ;;  %v527_v9 = vld [vmem:[%s1066_s3 + $0xd0] sm:$0xff]  ;;  %v339_v10 = vld [vmem:[%s1066_s3 + $0x8] sm:$0xff] }
  0x35   :  { %224 = vmatpush.msra.mxu3 %v711_v18  ;;  %272 = vmatpush.msra.mxu2 %v671_v12 }
  0x36   :  { %204 = vmatpush.msrb.mxu1 %v671_v12  ;;  %289 = vmatpush.msra.mxu0 %v665_v11  ;;  %v508_v11 = vld [vmem:[%s1066_s3 + $0x48] sm:$0xff] }
  0x37   :  { %225 = vmatpush.msra.mxu3 %v720_v19  ;;  %273 = vmatpush.msra.mxu2 %v685_v14  ;;  %v517_v12 = vld [vmem:[%s1066_s3 + $0x88] sm:$0xff] }
  0x38   :  { %205 = vmatpush.msrb.mxu1 %v685_v14  ;;  %290 = vmatpush.msra.mxu0 %v678_v13  ;;  %v526_v13 = vld [vmem:[%s1066_s3 + $0xc8] sm:$0xff]  ;;  %v338_v14 = vld [vmem:[%s1066_s3] sm:$0xff] }
  0x39   :  { %226 = vmatpush.msra.mxu3 %v734_v21  ;;  %274 = vmatpush.msra.mxu2 %v699_v16 }
  0x3a   :  { %206 = vmatpush.msrb.mxu1 %v699_v16  ;;  %291 = vmatpush.msra.mxu0 %v692_v15  ;;  %v507_v15 = vld [vmem:[%s1066_s3 + $0x40] sm:$0xff] }
  0x3b   :  { %227 = vmatpush.msra.mxu3 %v748_v23  ;;  %275 = vmatpush.msra.mxu2 %v706_v17 }
  0x3c   :  { %207 = vmatpush.msrb.mxu1 %v706_v17  ;;  %292 = vmatpush.msra.mxu0 %v711_v18  ;;  %v516_v17 = vld [vmem:[%s1066_s3 + $0x80] sm:$0xff] }
  0x3d   :  { %228 = vmatpush.msra.mxu3 %v762_v25  ;;  %276 = vmatpush.msra.mxu2 %v727_v20  ;;  %v525_v18 = vld [vmem:[%s1066_s3 + $0xc0] sm:$0xff] }
  0x3e   :  { %208 = vmatpush.msrb.mxu1 %v727_v20  ;;  %293 = vmatpush.msra.mxu0 %v720_v19 }
  0x3f   :  { %229 = vmatpush.msra.mxu3 %v776_v27  ;;  %277 = vmatpush.msra.mxu2 %v741_v22 }
  0x40   :  { %209 = vmatpush.msrb.mxu1 %v741_v22  ;;  %294 = vmatpush.msra.mxu0 %v734_v21 }
  0x41   :  { %230 = vmatpush.msra.mxu3 %v793_v30  ;;  %278 = vmatpush.msra.mxu2 %v755_v24 }
  0x42   :  { %210 = vmatpush.msrb.mxu1 %v755_v24  ;;  %295 = vmatpush.msra.mxu0 %v748_v23 }
  0x43   :  { %231 = vmatpush.msra.mxu3 %v814_v33  ;;  %279 = vmatpush.msra.mxu2 %v769_v26 }
  0x44   :  { %211 = vmatpush.msrb.mxu1 %v769_v26  ;;  %296 = vmatpush.msra.mxu0 %v762_v25 }
  0x45   :  { %232 = vmatpush.msra.mxu3 %v826_v35  ;;  %280 = vmatpush.msra.mxu2 %v783_v28 }
  0x46   :  { %212 = vmatpush.msrb.mxu1 %v783_v28  ;;  %297 = vmatpush.msra.mxu0 %v776_v27 }
  0x47   :  { %233 = vmatpush.msra.mxu3 %v836_v36  ;;  %281 = vmatpush.msra.mxu2 %v800_v31 }
  0x48   :  { %213 = vmatpush.msrb.mxu1 %v800_v31  ;;  %298 = vmatpush.msra.mxu0 %v793_v30 }
  0x49   :  { %234 = vmatpush.msra.mxu3 %v845_v37  ;;  %501 = vmatmul.msk.f32.vlgmr.msrb.gmra.mxu0 %vm60_vm0, %v500_v43 }
  0x4a   :  { %235 = vmatmul.f32.vlgmr.msra.gmra.mxu3 %v499_v42  ;;  %214 = vmatpush.msrb.mxu1 %v809_v32 }
  0x4b   :  { %282 = vmatpush.msra.mxu2 %v809_v32  ;;  %299 = vmatpush.msra.mxu0 %v814_v33 }
  0x4c   :  { %215 = vmatmul.f32.vlgmr.msrb.gmra.mxu1 %v498_v44  ;;  %283 = vmatmul.f32.vlgmr.msra.gmra.mxu2 %v502_v45 }
  0x4d   :  { %319 = vmatpush.msra.mxu1 %v597_v0  ;;  %300 = vmatpush.msra.mxu0 %v826_v35  ;;  %v341_v0 = vld [vmem:[%s1066_s3 + $0x18] sm:$0xff] }
  0x4e   :  { %357 = vmatpush.msrb.mxu3 %v345_v48  ;;  %428 = vmatpush.msrb.mxu2 %v523_v50 }
  0x4f   :  { %320 = vmatpush.msra.mxu1 %v607_v2  ;;  %301 = vmatpush.msra.mxu0 %v836_v36 }
  0x50   :  { %358 = vmatpush.msrb.mxu3 %v344_v52  ;;  %429 = vmatpush.msrb.mxu2 %v522_v54 }
  0x51   :  { %321 = vmatpush.msra.mxu1 %v619_v4  ;;  %302 = vmatpush.msra.mxu0 %v845_v37  ;;  %v519_v4 = vld [vmem:[%s1066_s3 + $0x98] sm:$0xff] }
  0x52   :  { %303 = vmatmul.f32.vlgmr.msra.gmra.mxu0 %v503_v46  ;;  %359 = vmatpush.msrb.mxu3 %v343_v56  ;;  %v536_v46 = vld [vmem:[%s1067_s4] ss:$0 sm:$0xff] }
  0x53   :  { %322 = vmatpush.msra.mxu1 %v637_v7  ;;  %462 = vmatpush.msrb.mxu0 %v532_v51  ;;  %v509_v7 = vld [vmem:[%s1066_s3 + $0x50] sm:$0xff] }
  0x54   :  { %505 = vmatmul.msk.f32.vlgmr.msra.gmra.mxu1 %vm60_vm0, %v504_v47  ;;  %430 = vmatpush.msrb.mxu2 %v521_v58 }
  0x55   :  { %394 = vmatpush.msrb.mxu1 %v514_v49  ;;  %463 = vmatpush.msrb.mxu0 %v531_v55 }
  0x56   :  { %360 = vmatpush.msrb.mxu3 %v342_v60  ;;  %431 = vmatpush.msrb.mxu2 %v520_v62 }
  0x57   :  { %395 = vmatpush.msrb.mxu1 %v513_v53  ;;  %464 = vmatpush.msrb.mxu0 %v530_v59 }
  0x58   :  { %361 = vmatpush.msrb.mxu3 %v341_v0  ;;  %432 = vmatpush.msrb.mxu2 %v519_v4 }
  0x59   :  { %396 = vmatpush.msrb.mxu1 %v512_v57  ;;  %465 = vmatpush.msrb.mxu0 %v529_v63 }
  0x5a   :  { %362 = vmatpush.msrb.mxu3 %v340_v6  ;;  %433 = vmatpush.msrb.mxu2 %v518_v8 }
  0x5b   :  { %397 = vmatpush.msrb.mxu1 %v511_v61  ;;  %466 = vmatpush.msrb.mxu0 %v528_v5 }
  0x5c   :  { %363 = vmatpush.msrb.mxu3 %v339_v10  ;;  %434 = vmatpush.msrb.mxu2 %v517_v12 }
  0x5d   :  { %398 = vmatpush.msrb.mxu1 %v510_v1  ;;  %467 = vmatpush.msrb.mxu0 %v527_v9 }
  0x5e   :  { %364 = vmatpush.msrb.mxu3 %v338_v14  ;;  %435 = vmatpush.msrb.mxu2 %v516_v17 }
  0x5f   :  { %399 = vmatpush.msrb.mxu1 %v509_v7  ;;  %468 = vmatpush.msrb.mxu0 %v526_v13 }
  0x61   :  { %400 = vmatpush.msrb.mxu1 %v508_v11  ;;  %469 = vmatpush.msrb.mxu0 %v525_v18 }
  0x63   :  { %401 = vmatpush.msrb.mxu1 %v507_v15 }
  0xa0   :  { %v121_v2 = vpop.f32.mrf.mxu2 }
  0xa5   :  { %v148_v3 = vpop.f32.mrf.mxu3 }
  0xab   :  { %v81_v16 = vpop.f32.mrf.mxu0  ;;  %v101_v19 = vpop.f32.mrf.mxu1 }
  0xac   :  { %v168_v20 = vpop.f32.mrf.mxu2  ;;  %v102_v22 = vadd.f32 %v101_v19, %v81_v16 }
  0xad   :  { %v188_v21 = vpop.f32.mrf.mxu3  ;;  %v169_v23 = vadd.f32 %v168_v20, %v148_v3 }
  0xae   :  { %v122_v26 = vadd.f32 %v121_v2, %v102_v22 }
  0xaf   :  { %v189_v27 = vadd.f32 %v188_v21, %v169_v23 }
  0xb1   :  { %v191_v30 = vmax.f32 %v122_v26, %v189_v27 }
  0xc6   :  { %v256_v24 = vpop.f32.mrf.mxu0 }
  0xc9   :  { %v216_v25 = vpop.f32.mrf.mxu1 }
  0xcd   :  { %v236_v28 = vpop.f32.mrf.mxu3 }
  0xce   :  { %v237_v29 = vadd.f32 %v236_v28, %v216_v25 }
  0xcf   :  { %v284_v32 = vpop.f32.mrf.mxu2  ;;  %v304_v33 = vpop.f32.mrf.mxu0 }
  0xd0   :  { %v257_v31 = vadd.f32 %v256_v24, %v237_v29  ;;  %v305_v34 = vadd.f32 %v304_v33, %v284_v32 }
  0xd1   :  { %v324_v36 = vpop.f32.mrf.mxu1 }
  0xd2   :  { %v259_v35 = vmax.f32 %v191_v30, %v257_v31  ;;  %v325_v37 = vadd.f32 %v324_v36, %v305_v34 }
  0xd4   :  { %v327_v39 = vmax.f32 %v259_v35, %v325_v37 }
  0xd6   :  { %v332_v40 = vadd.f32 %v535_v38, %v327_v39 }
  0xd8   :  { %v333_v41 = vmax.f32 %v332_v40, 0.0 }
  0xda   :  { %335 = vst.msk [vmem:[#allocation2] sm:$0xff] %vm334_vm1, %v333_v41 }
  0xe1   :  { %v337_v42 = vld [vmem:[#allocation2] sm:$0x3]  ;;  %v373_v43 = vld [vmem:[#allocation2 + $0x2] sm:$0x3]  ;;  %v407_v44 = vld [vmem:[#allocation2 + $0x4] sm:$0x3] }
  0xe2   :  { %506 = vmatmul.msk.f32.vlgmr.msrb.gmra.mxu3 %vm334_vm1, %v337_v42  ;;  %515 = vmatmul.msk.f32.vlgmr.msrb.gmra.mxu1 %vm334_vm1, %v373_v43  ;;  %v441_v45 = vld [vmem:[#allocation2 + $0x6] sm:$0x3] }
  0xe3   :  { %524 = vmatmul.msk.f32.vlgmr.msrb.gmra.mxu2 %vm334_vm1, %v407_v44  ;;  %533 = vmatmul.msk.f32.vlgmr.msrb.gmra.mxu0 %vm334_vm1, %v441_v45 }
 0x15f   :  { %v403_v49 = vpop.f32.mrf.mxu1 }
 0x160   :  { %v471_v53 = vpop.f32.mrf.mxu0 }
 0x165   :  { %v366_v47 = vpop.f32.mrf.mxu3 }
 0x166   :  { %v372_v48 = vadd.f32 %v536_v46, %v366_v47  ;;  %v437_v51 = vpop.f32.mrf.mxu2 }
 0x168   :  { %v406_v50 = vadd.f32 %v403_v49, %v372_v48 }
 0x16a   :  { %v440_v52 = vadd.f32 %v437_v51, %v406_v50 }
 0x16c   :  { %v474_v54 = vadd.f32 %v471_v53, %v440_v52 }
 0x16e   :  { %476 = vst.msk [vmem:[#allocation3] sm:$0x3] %vm475_vm2, %v474_v54 }
 0x16f   :  { %487 = dma.vmem_to_hbm [thread:$0]  %s483_s24, 32, %s485_s27, [#allocation4]  }
 0x170   :  { %561 = dma.done.wait [#allocation4], 32  }
 0x171   :  { %562 = vsyncadd [#allocation4], 4294967264 }
 0x172   :  { %492 = vsyncpa [#allocation4], 1 }

</bundles_post_ra>
